<compile_context>
chip_gen: v7x
topology: tpu7x:2x2x1
jax: 0.10.0
libtpu: 0.0.40
codegen_flags: <defaults>
</compile_context>

<pallas_src>
import jax
import jax.numpy as jnp
from jax.experimental import pallas as pl
from jax.experimental.pallas import tpu as pltpu

INPUT_DIM = 768   # matches nn.Linear(input_dim=768, 768)
HIDDEN = 768
NEG_SLOPE = 0.01  # nn.LeakyReLU default


def _leaky_relu(x):
    return jnp.where(x >= 0, x, NEG_SLOPE * x)


def _round_up(n, m):
    return ((n + m - 1) // m) * m


def question_alignment_kernel(x_ref, w1_ref, b1_ref, w2_ref, b2_ref,
                              w3_ref, b3_ref, o_ref):
    # Layer 1: bf16 x @ bf16 W on the MXU, f32 accumulate; bias + LeakyReLU in f32.
    h = jnp.dot(x_ref[...], w1_ref[...],
                preferred_element_type=jnp.float32) + b1_ref[...]
    h = _leaky_relu(h)

    # Layer 2 (feed bf16 into the MXU, keep f32 accumulation).
    h = jnp.dot(h.astype(jnp.bfloat16), w2_ref[...],
                preferred_element_type=jnp.float32) + b2_ref[...]
    h = _leaky_relu(h)

    # Layer 3
    h = jnp.dot(h.astype(jnp.bfloat16), w3_ref[...],
                preferred_element_type=jnp.float32) + b3_ref[...]
    h = _leaky_relu(h)

    o_ref[...] = h.astype(o_ref.dtype)


def question_alignment(x, params, *, tile_m=None):
    """x: (batch, input_dim) float32.  params: dict of w1,b1,w2,b2,w3,b3
    (weights pre-transposed (in, out), stored/streamed as bf16; biases f32)."""
    batch, d_in = x.shape
    w1, b1 = params["w1"], params["b1"]
    w2, b2 = params["w2"], params["b2"]
    w3, b3 = params["w3"], params["b3"]
    d_out = w3.shape[1]

    # Tile selection: whole batch in one block when small (no grid overhead),
    # otherwise 256-row tiles (multiple of MXU dim; gives >=2 tiles so both
    # v7x TensorCores get work via the "parallel" grid axis).
    if tile_m is None:
        tile_m = min(256, _round_up(batch, 8))
    tile_m = _round_up(tile_m, 8)

    padded = _round_up(batch, tile_m)
    x_in = x.astype(jnp.bfloat16)                  # halve activation HBM traffic
    if padded != batch:
        x_in = jnp.pad(x_in, ((0, padded - batch), (0, 0)))
    grid = (padded // tile_m,)

    def const_spec(shape):
        # Grid-invariant operand: single-buffer it (no point double-buffering
        # something whose block index never changes).
        return pl.BlockSpec(shape, lambda i: (0,) * len(shape),
                            pipeline_mode=pl.Buffered(1))

    out = pl.pallas_call(
        question_alignment_kernel,
        out_shape=jax.ShapeDtypeStruct((padded, d_out), x.dtype),
        grid_spec=pltpu.PrefetchScalarGridSpec(
            num_scalar_prefetch=0,
            grid=grid,
            in_specs=[
                pl.BlockSpec((tile_m, d_in), lambda i: (i, 0)),   # x tile
                const_spec(w1.shape), const_spec(b1.shape),
                const_spec(w2.shape), const_spec(b2.shape),
                const_spec(w3.shape), const_spec(b3.shape),
            ],
            out_specs=pl.BlockSpec((tile_m, d_out), lambda i: (i, 0)),
        ),
        compiler_params=pltpu.CompilerParams(
            dimension_semantics=("parallel",),
        ),
    )(x_in,
      w1.astype(jnp.bfloat16), b1.astype(jnp.float32),
      w2.astype(jnp.bfloat16), b2.astype(jnp.float32),
      w3.astype(jnp.bfloat16), b3.astype(jnp.float32))

    if padded != batch:
        out = out[:batch]
    return out


def init_params(key, input_dim=INPUT_DIM, hidden=HIDDEN):
    """Deterministic synthetic init (PyTorch-like uniform fan-in scaling).

    Weights are stored transposed (in_features, out_features) and kept in bf16
    so the kernel streams half the weight bytes from HBM; biases stay f32."""
    dims = [(input_dim, hidden), (hidden, hidden), (hidden, hidden)]
    params = {}
    for idx, (d_in, d_out) in enumerate(dims, start=1):
        key, kw, kb = jax.random.split(key, 3)
        bound = 1.0 / jnp.sqrt(d_in)
        w = jax.random.uniform(kw, (d_in, d_out), jnp.float32,
                               minval=-bound, maxval=bound)
        b = jax.random.uniform(kb, (1, d_out), jnp.float32,
                               minval=-bound, maxval=bound)
        params[f"w{idx}"] = w.astype(jnp.bfloat16)
        params[f"b{idx}"] = b
    return params


def reference(x, params):
    """Precision-matched reference: same bf16 inputs to each matmul, f32 math."""
    h = x.astype(jnp.bfloat16)
    y = None
    for i in (1, 2, 3):
        y = (h.astype(jnp.float32) @ params[f"w{i}"].astype(jnp.float32)
             + params[f"b{i}"].astype(jnp.float32))
        y = jnp.where(y >= 0, y, NEG_SLOPE * y)
        h = y.astype(jnp.bfloat16)
    return y


if __name__ == "__main__":
    key = jax.random.PRNGKey(0)
    k_x, k_p = jax.random.split(key)

    batch = 16  # small batch; features = 768 are fixed by the module definition
    x = jax.random.normal(k_x, (batch, INPUT_DIM), jnp.float32)
    params = init_params(k_p)

    out = question_alignment(x, params)
    out = jax.block_until_ready(out)

    ref = reference(x, params)
    assert out.shape == (batch, HIDDEN)
    assert jnp.allclose(out, ref, atol=1e-2, rtol=1e-2), "mismatch vs reference"

    print("KERNEL_OK")
</pallas_src>

<mosaic_0001>
module attributes {stable_mosaic.version = 11 : i64} {
  func.func @question_alignment_kernel(%arg0: i32, %arg1: memref<16x768xbf16, #tpu.memory_space<vmem>>, %arg2: memref<768x768xbf16, #tpu.memory_space<vmem>>, %arg3: memref<1x768xf32, #tpu.memory_space<vmem>>, %arg4: memref<768x768xbf16, #tpu.memory_space<vmem>>, %arg5: memref<1x768xf32, #tpu.memory_space<vmem>>, %arg6: memref<768x768xbf16, #tpu.memory_space<vmem>>, %arg7: memref<1x768xf32, #tpu.memory_space<vmem>>, %arg8: memref<16x768xf32, #tpu.memory_space<vmem>>) attributes {dimension_semantics = [#tpu.dimension_semantics<parallel>], iteration_bounds = array<i64: 1>, scalar_prefetch = 0 : i64, scratch_operands = 0 : i64, tpu.core_type = #tpu.core_type<tc>, window_params = [{transform_indices = @transform_0, window_bounds = array<i64: 16, 768>}, {pipeline_mode = #tpu.pipeline_mode<synchronous>, transform_indices = @transform_1, window_bounds = array<i64: 768, 768>}, {pipeline_mode = #tpu.pipeline_mode<synchronous>, transform_indices = @transform_2, window_bounds = array<i64: 1, 768>}, {pipeline_mode = #tpu.pipeline_mode<synchronous>, transform_indices = @transform_3, window_bounds = array<i64: 768, 768>}, {pipeline_mode = #tpu.pipeline_mode<synchronous>, transform_indices = @transform_4, window_bounds = array<i64: 1, 768>}, {pipeline_mode = #tpu.pipeline_mode<synchronous>, transform_indices = @transform_5, window_bounds = array<i64: 768, 768>}, {pipeline_mode = #tpu.pipeline_mode<synchronous>, transform_indices = @transform_6, window_bounds = array<i64: 1, 768>}, {transform_indices = @transform_7, window_bounds = array<i64: 16, 768>}]} {
    %c0 = arith.constant 0 : index
    %c0_0 = arith.constant 0 : index
    %0 = vector.load %arg1[%c0, %c0_0] : memref<16x768xbf16, #tpu.memory_space<vmem>>, vector<16x768xbf16>
    %c0_1 = arith.constant 0 : index
    %c0_2 = arith.constant 0 : index
    %1 = vector.load %arg2[%c0_1, %c0_2] : memref<768x768xbf16, #tpu.memory_space<vmem>>, vector<768x768xbf16>
    %cst = arith.constant dense<0.000000e+00> : vector<16x768xf32>
    %2 = tpu.matmul %0, %1, %cst {dimension_numbers = #tpu.dot_dimension_numbers<[1], [0], [0], [1], [0, 0, 1, 1], [], []>} : vector<16x768xbf16>, vector<768x768xbf16>, vector<16x768xf32> -> vector<16x768xf32>
    %c0_3 = arith.constant 0 : index
    %c0_4 = arith.constant 0 : index
    %3 = vector.load %arg3[%c0_3, %c0_4] : memref<1x768xf32, #tpu.memory_space<vmem>>, vector<1x768xf32>
    %4 = vector.broadcast %3 : vector<1x768xf32> to vector<16x768xf32>
    %5 = arith.addf %2, %4 : vector<16x768xf32>
    %cst_5 = arith.constant 0.000000e+00 : f32
    %6 = vector.broadcast %cst_5 : f32 to vector<16x768xf32>
    %7 = arith.cmpf oge, %5, %6 : vector<16x768xf32>
    %cst_6 = arith.constant 0.00999999977 : f32
    %8 = vector.broadcast %cst_6 : f32 to vector<16x768xf32>
    %9 = arith.mulf %8, %5 : vector<16x768xf32>
    %10 = arith.select %7, %5, %9 : vector<16x768xi1>, vector<16x768xf32>
    %11 = arith.truncf %10 : vector<16x768xf32> to vector<16x768xbf16>
    %c0_7 = arith.constant 0 : index
    %c0_8 = arith.constant 0 : index
    %12 = vector.load %arg4[%c0_7, %c0_8] : memref<768x768xbf16, #tpu.memory_space<vmem>>, vector<768x768xbf16>
    %cst_9 = arith.constant dense<0.000000e+00> : vector<16x768xf32>
    %13 = tpu.matmul %11, %12, %cst_9 {dimension_numbers = #tpu.dot_dimension_numbers<[1], [0], [0], [1], [0, 0, 1, 1], [], []>} : vector<16x768xbf16>, vector<768x768xbf16>, vector<16x768xf32> -> vector<16x768xf32>
    %c0_10 = arith.constant 0 : index
    %c0_11 = arith.constant 0 : index
    %14 = vector.load %arg5[%c0_10, %c0_11] : memref<1x768xf32, #tpu.memory_space<vmem>>, vector<1x768xf32>
    %15 = vector.broadcast %14 : vector<1x768xf32> to vector<16x768xf32>
    %16 = arith.addf %13, %15 : vector<16x768xf32>
    %cst_12 = arith.constant 0.000000e+00 : f32
    %17 = vector.broadcast %cst_12 : f32 to vector<16x768xf32>
    %18 = arith.cmpf oge, %16, %17 : vector<16x768xf32>
    %cst_13 = arith.constant 0.00999999977 : f32
    %19 = vector.broadcast %cst_13 : f32 to vector<16x768xf32>
    %20 = arith.mulf %19, %16 : vector<16x768xf32>
    %21 = arith.select %18, %16, %20 : vector<16x768xi1>, vector<16x768xf32>
    %22 = arith.truncf %21 : vector<16x768xf32> to vector<16x768xbf16>
    %c0_14 = arith.constant 0 : index
    %c0_15 = arith.constant 0 : index
    %23 = vector.load %arg6[%c0_14, %c0_15] : memref<768x768xbf16, #tpu.memory_space<vmem>>, vector<768x768xbf16>
    %cst_16 = arith.constant dense<0.000000e+00> : vector<16x768xf32>
    %24 = tpu.matmul %22, %23, %cst_16 {dimension_numbers = #tpu.dot_dimension_numbers<[1], [0], [0], [1], [0, 0, 1, 1], [], []>} : vector<16x768xbf16>, vector<768x768xbf16>, vector<16x768xf32> -> vector<16x768xf32>
    %c0_17 = arith.constant 0 : index
    %c0_18 = arith.constant 0 : index
    %25 = vector.load %arg7[%c0_17, %c0_18] : memref<1x768xf32, #tpu.memory_space<vmem>>, vector<1x768xf32>
    %26 = vector.broadcast %25 : vector<1x768xf32> to vector<16x768xf32>
    %27 = arith.addf %24, %26 : vector<16x768xf32>
    %cst_19 = arith.constant 0.000000e+00 : f32
    %28 = vector.broadcast %cst_19 : f32 to vector<16x768xf32>
    %29 = arith.cmpf oge, %27, %28 : vector<16x768xf32>
    %cst_20 = arith.constant 0.00999999977 : f32
    %30 = vector.broadcast %cst_20 : f32 to vector<16x768xf32>
    %31 = arith.mulf %30, %27 : vector<16x768xf32>
    %32 = arith.select %29, %27, %31 : vector<16x768xi1>, vector<16x768xf32>
    %c0_21 = arith.constant 0 : index
    %c0_22 = arith.constant 0 : index
    %33 = vector.load %arg8[%c0_21, %c0_22] : memref<16x768xf32, #tpu.memory_space<vmem>>, vector<16x768xf32>
    tpu.vector_store %arg8[%c0_21, %c0_22], %32 {strides = array<i32>} : memref<16x768xf32, #tpu.memory_space<vmem>>, vector<16x768xf32>,
    return
  }
  func.func @transform_0(%arg0: i32) -> (i32, i32) {
    %c0_i32 = arith.constant 0 : i32
    %c0_i32_0 = arith.constant 0 : i32
    return %arg0, %c0_i32 : i32, i32
  }
  func.func @transform_1(%arg0: i32) -> (i32, i32) {
    %c0_i32 = arith.constant 0 : i32
    %c0_i32_0 = arith.constant 0 : i32
    %c0_i32_1 = arith.constant 0 : i32
    return %c0_i32, %c0_i32_0 : i32, i32
  }
  func.func @transform_2(%arg0: i32) -> (i32, i32) {
    %c0_i32 = arith.constant 0 : i32
    %c0_i32_0 = arith.constant 0 : i32
    %c0_i32_1 = arith.constant 0 : i32
    return %c0_i32, %c0_i32_0 : i32, i32
  }
  func.func @transform_3(%arg0: i32) -> (i32, i32) {
    %c0_i32 = arith.constant 0 : i32
    %c0_i32_0 = arith.constant 0 : i32
    %c0_i32_1 = arith.constant 0 : i32
    return %c0_i32, %c0_i32_0 : i32, i32
  }
  func.func @transform_4(%arg0: i32) -> (i32, i32) {
    %c0_i32 = arith.constant 0 : i32
    %c0_i32_0 = arith.constant 0 : i32
    %c0_i32_1 = arith.constant 0 : i32
    return %c0_i32, %c0_i32_0 : i32, i32
  }
  func.func @transform_5(%arg0: i32) -> (i32, i32) {
    %c0_i32 = arith.constant 0 : i32
    %c0_i32_0 = arith.constant 0 : i32
    %c0_i32_1 = arith.constant 0 : i32
    return %c0_i32, %c0_i32_0 : i32, i32
  }
  func.func @transform_6(%arg0: i32) -> (i32, i32) {
    %c0_i32 = arith.constant 0 : i32
    %c0_i32_0 = arith.constant 0 : i32
    %c0_i32_1 = arith.constant 0 : i32
    return %c0_i32, %c0_i32_0 : i32, i32
  }
  func.func @transform_7(%arg0: i32) -> (i32, i32) {
    %c0_i32 = arith.constant 0 : i32
    %c0_i32_0 = arith.constant 0 : i32
    return %arg0, %c0_i32 : i32, i32
  }
}

</mosaic_0001>

<bundles_post_ra>
// kernel: tpu_custom_call.1
= control target key start
LH: loop header
LB: loop body
LE: loop exit
PB: predicated region body
PF: predicated region fallthrough
CT: control target
= control target key end

     0   :  { %12 = vsyncpa [#allocation3], 0  ;;  %s9557_s0 = inlined_call_operand.hbm [shape: bf16[16,768], index: 0, kind: input, shape index: {}]   ;;  %s9558_s1 = inlined_call_operand.hbm [shape: bf16[768,768], index: 1, kind: input, shape index: {}]   ;;  %s9559_s2 = inlined_call_operand.hbm [shape: f32[1,768], index: 2, kind: input, shape index: {}]   ;;  %s9560_s3 = inlined_call_operand.hbm [shape: bf16[768,768], index: 3, kind: input, shape index: {}]   ;;  %s9561_s4 = inlined_call_operand.hbm [shape: f32[1,768], index: 4, kind: input, shape index: {}]   ;;  %s9562_s5 = inlined_call_operand.hbm [shape: bf16[768,768], index: 5, kind: input, shape index: {}]   ;;  %s9563_s6 = inlined_call_operand.hbm [shape: f32[1,768], index: 6, kind: input, shape index: {}]   ;;  %s9564_s7 = inlined_call_operand.hbm [shape: f32[16,768], index: 7, kind: output, shape index: {}]  }
   0x1   :  { %13 = vsyncpa [#allocation6], 0 }
   0x2   :  { %14 = vsyncpa [#allocation9], 0 }
   0x3   :  { %15 = vsyncpa [#allocation12], 0 }
   0x4   :  { %16 = vsyncpa [#allocation4], 0  ;;  %s9231_s24 = smov [#allocation5]   ;;  %s9232_s26 = smov [#allocation8]  }
   0x5   :  { %s34_s25 = sshll.u32 %s9231_s24, 4  ;;  %s56_s27 = sshll.u32 %s9232_s26, 4  ;;  %s35_s25 = int_to_ptr.vmem [resolvable:$true] %s34_s25  ;;  %s9283_s27 = int_to_ptr.vmem [resolvable:$true] %s56_s27 }
   0x6   :  { %s9045_s30 = scalar_lea.hbm %s9558_s1, 36864 }
   0x7   :  { %p9046_p0 = scmp.ne.s32.totalorder %s9558_s1, %s9045_s30  ;;  %p9049_p1 = scmp.lt.u32.totalorder %s9045_s30, %s9558_s1 }
   0x9   :  { %p9051_p2 = pnand %p9049_p1, %p9046_p0 }
   0xb   :  { %9054 = shalt.err (!%p9051_p2)
}
   0xc   :  { %s9055_s12 = scalar_lea.vmem %s35_s25, 36864  ;;  %p9060_p4 = scmp.lt.s32.totalorder %s35_s25, %s35_s25 }
   0xd   :  { %p9056_p3 = scmp.ne.s32.totalorder %s35_s25, %s9055_s12  ;;  %p9061_p5 = scmp.lt.s32.totalorder %s9055_s12, %s9055_s12 }
   0xf   :  { %p9062_p6 = por %p9061_p5, %p9060_p4 }
  0x11   :  { %p9063_p7 = pnand %p9062_p6, %p9056_p3 }
  0x13   :  { %9066 = shalt.err (!%p9063_p7)
}
  0x14   :  { %s9233_s13 = smov 384   ;;  %s9234_s14 = smov 24  }
  0x15   :  { %40 = dma.hbm_to_vmem [thread:$0]  %s9558_s1, 36864, %s35_s25, [#allocation6], %s9233_s13, %s9233_s13, %s9234_s14  }
  0x16   :  { %s9067_s19 = scalar_lea.hbm %s9560_s3, 36864 }
  0x17   :  { %p9068_p8 = scmp.ne.s32.totalorder %s9560_s3, %s9067_s19  ;;  %p9071_p9 = scmp.lt.u32.totalorder %s9067_s19, %s9560_s3 }
  0x19   :  { %p9073_p10 = pnand %p9071_p9, %p9068_p8 }
  0x1b   :  { %9076 = shalt.err (!%p9073_p10)
}
  0x1c   :  { %s9077_s24 = scalar_lea.vmem %s9283_s27, 36864  ;;  %p9082_p12 = scmp.lt.s32.totalorder %s9283_s27, %s9283_s27 }
  0x1d   :  { %p9078_p11 = scmp.ne.s32.totalorder %s9283_s27, %s9077_s24  ;;  %p9083_p13 = scmp.lt.s32.totalorder %s9077_s24, %s9077_s24 }
  0x1f   :  { %p9084_p0 = por %p9083_p13, %p9082_p12 }
  0x21   :  { %p9085_p1 = pnand %p9084_p0, %p9078_p11 }
  0x23   :  { %9088 = shalt.err (!%p9085_p1)
}
  0x24   :  { %62 = dma.hbm_to_vmem [thread:$0]  %s9560_s3, 36864, %s9283_s27, [#allocation9], %s9233_s13, %s9233_s13, %s9234_s14  }
  0x25   :  { %s9235_s26 = smov [#allocation11]   ;;  %s9236_s29 = smov [#allocation2]  }
  0x26   :  { %s78_s28 = sshll.u32 %s9235_s26, 4  ;;  %s22_s30 = sshll.u32 %s9236_s29, 4  ;;  %s79_s28 = int_to_ptr.vmem [resolvable:$true] %s78_s28  ;;  %s9320_s30 = int_to_ptr.vmem [resolvable:$true] %s22_s30 }
  0x27   :  { %s9089_s10 = scalar_lea.hbm %s9562_s5, 36864 }
  0x28   :  { %p9090_p2 = scmp.ne.s32.totalorder %s9562_s5, %s9089_s10  ;;  %p9093_p3 = scmp.lt.u32.totalorder %s9089_s10, %s9562_s5 }
  0x2a   :  { %p9095_p4 = pnand %p9093_p3, %p9090_p2 }
  0x2c   :  { %9098 = shalt.err (!%p9095_p4)
}
  0x2d   :  { %s9099_s3 = scalar_lea.vmem %s79_s28, 36864  ;;  %p9104_p6 = scmp.lt.s32.totalorder %s79_s28, %s79_s28 }
  0x2e   :  { %p9100_p5 = scmp.ne.s32.totalorder %s79_s28, %s9099_s3  ;;  %p9105_p7 = scmp.lt.s32.totalorder %s9099_s3, %s9099_s3 }
  0x30   :  { %p9106_p8 = por %p9105_p7, %p9104_p6 }
  0x32   :  { %p9107_p9 = pnand %p9106_p8, %p9100_p5 }
  0x34   :  { %9110 = shalt.err (!%p9107_p9)
}
  0x35   :  { %84 = dma.hbm_to_vmem [thread:$0]  %s9562_s5, 36864, %s79_s28, [#allocation12], %s9233_s13, %s9233_s13, %s9234_s14  }
  0x36   :  { %s9111_s20 = scalar_lea.hbm %s9557_s0, 768 }
  0x37   :  { %p9112_p10 = scmp.ne.s32.totalorder %s9557_s0, %s9111_s20  ;;  %p9115_p11 = scmp.lt.u32.totalorder %s9111_s20, %s9557_s0 }
  0x39   :  { %p9117_p12 = pnand %p9115_p11, %p9112_p10 }
  0x3b   :  { %9120 = shalt.err (!%p9117_p12)
}
  0x3c   :  { %s9121_s1 = scalar_lea.vmem %s9320_s30, 768  ;;  %p9126_p0 = scmp.lt.s32.totalorder %s9320_s30, %s9320_s30 }
  0x3d   :  { %p9122_p13 = scmp.ne.s32.totalorder %s9320_s30, %s9121_s1  ;;  %p9127_p1 = scmp.lt.s32.totalorder %s9121_s1, %s9121_s1 }
  0x3f   :  { %p9128_p2 = por %p9127_p1, %p9126_p0 }
  0x41   :  { %p9129_p3 = pnand %p9128_p2, %p9122_p13 }
  0x43   :  { %9132 = shalt.err (!%p9129_p3)
}
  0x44   :  { %28 = dma.hbm_to_vmem [thread:$0]  %s9557_s0, 768, %s9320_s30, [#allocation3], %s9233_s13, %s9233_s13, %s9234_s14  }
  0x45   :  { %s9237_s26 = smov [#allocation7]   ;;  %s9238_s29 = smov [#allocation10]  }
  0x46   :  { %s47_s28 = sshll.u32 %s9237_s26, 4  ;;  %s69_s8 = sshll.u32 %s9238_s29, 4  ;;  %s48_s28 = int_to_ptr.vmem [resolvable:$true] %s47_s28  ;;  %s70_s8 = int_to_ptr.vmem [resolvable:$true] %s69_s8 }
  0x47   :  { %s9133_s11 = scalar_lea.hbm %s9559_s2, 96 }
  0x48   :  { %p9134_p4 = scmp.ne.s32.totalorder %s9559_s2, %s9133_s11  ;;  %p9137_p5 = scmp.lt.u32.totalorder %s9133_s11, %s9559_s2 }
  0x4a   :  { %p9139_p6 = pnand %p9137_p5, %p9134_p4 }
  0x4c   :  { %9142 = shalt.err (!%p9139_p6)
}
  0x4d   :  { %s9143_s0 = scalar_lea.vmem %s48_s28, 96  ;;  %p9148_p8 = scmp.lt.s32.totalorder %s48_s28, %s48_s28 }
  0x4e   :  { %p9144_p7 = scmp.ne.s32.totalorder %s48_s28, %s9143_s0  ;;  %p9149_p9 = scmp.lt.s32.totalorder %s9143_s0, %s9143_s0 }
  0x50   :  { %p9150_p10 = por %p9149_p9, %p9148_p8 }
  0x52   :  { %p9151_p11 = pnand %p9150_p10, %p9144_p7 }
  0x54   :  { %9154 = shalt.err (!%p9151_p11)
}
  0x55   :  { %50 = dma.hbm_to_vmem [thread:$0]  %s9559_s2, 96, %s48_s28, [#allocation6]  }
  0x56   :  { %s9155_s17 = scalar_lea.hbm %s9561_s4, 96 }
  0x57   :  { %p9156_p12 = scmp.ne.s32.totalorder %s9561_s4, %s9155_s17  ;;  %p9159_p13 = scmp.lt.u32.totalorder %s9155_s17, %s9561_s4 }
  0x59   :  { %p9161_p0 = pnand %p9159_p13, %p9156_p12 }
  0x5b   :  { %9164 = shalt.err (!%p9161_p0)
}
  0x5c   :  { %s9165_s22 = scalar_lea.vmem %s70_s8, 96  ;;  %p9170_p2 = scmp.lt.s32.totalorder %s70_s8, %s70_s8 }
  0x5d   :  { %p9166_p1 = scmp.ne.s32.totalorder %s70_s8, %s9165_s22  ;;  %p9171_p3 = scmp.lt.s32.totalorder %s9165_s22, %s9165_s22 }
  0x5f   :  { %p9172_p4 = por %p9171_p3, %p9170_p2 }
  0x61   :  { %p9173_p5 = pnand %p9172_p4, %p9166_p1 }
  0x63   :  { %9176 = shalt.err (!%p9173_p5)
}
  0x64   :  { %72 = dma.hbm_to_vmem [thread:$0]  %s9561_s4, 96, %s70_s8, [#allocation9]  }
  0x65   :  { %s9239_s24 = smov [#allocation13]   ;;  %s9177_s26 = scalar_lea.hbm %s9563_s6, 96 }
  0x66   :  { %s91_s1 = sshll.u32 %s9239_s24, 4  ;;  %p9178_p6 = scmp.ne.s32.totalorder %s9563_s6, %s9177_s26  ;;  %s92_s1 = int_to_ptr.vmem [resolvable:$true] %s91_s1 }
  0x67   :  { %p9181_p7 = scmp.lt.u32.totalorder %s9177_s26, %s9563_s6 }
  0x69   :  { %p9183_p8 = pnand %p9181_p7, %p9178_p6 }
  0x6b   :  { %9186 = shalt.err (!%p9183_p8)
}
  0x6c   :  { %s9187_s11 = scalar_lea.vmem %s92_s1, 96  ;;  %p9192_p10 = scmp.lt.s32.totalorder %s92_s1, %s92_s1 }
  0x6d   :  { %p9188_p9 = scmp.ne.s32.totalorder %s92_s1, %s9187_s11  ;;  %p9193_p11 = scmp.lt.s32.totalorder %s9187_s11, %s9187_s11 }
  0x6f   :  { %p9194_p12 = por %p9193_p11, %p9192_p10 }
  0x71   :  { %p9195_p13 = pnand %p9194_p12, %p9188_p9 }
  0x73   :  { %9198 = shalt.err (!%p9195_p13)
}
  0x74   :  { %94 = dma.hbm_to_vmem [thread:$0]  %s9563_s6, 96, %s92_s1, [#allocation12]  }
  0x75   :  { %9221 = dma.done.wait [#allocation3], 768  }
  0x76   :  { %9222 = vsyncadd [#allocation3], 4294966528 }
  0x77   :  { %9223 = dma.done.wait [#allocation6], 36960  }
  0x78   :  { %9224 = vsyncadd [#allocation6], 4294930336 }
  0x79   :  { %9225 = dma.done.wait [#allocation9], 36960  }
  0x7a   :  { %9226 = vsyncadd [#allocation9], 4294930336 }
  0x7b   :  { %9227 = dma.done.wait [#allocation12], 36960  }
  0x7c   :  { %9228 = vsyncadd [#allocation12], 4294930336  ;;  %v7735_v0 = vld [vmem:[#allocation5 + $0x4] ss:$24 sps:$4 sm:$0xff]   ;;  %v7739_v2 = vld [vmem:[#allocation5] ss:$24 sps:$4 sm:$0xff]  }
  0x7d   :  { %v7737_v1 = vld [vmem:[#allocation5 + $0x304] ss:$24 sps:$4 sm:$0xff]   ;;  %1912 = vmatprep.subr.bf16.mxu1 %v7735_v0  ;;  %v7740_v3 = vld [vmem:[#allocation5 + $0x300] ss:$24 sps:$4 sm:$0xff]   ;;  %v7741_v4 = vld [vmem:[#allocation5 + $0x34] ss:$24 sps:$4 sm:$0xff]  }
  0x7e   :  { %1955 = vmatprep.subr.bf16.mxu0 %v7737_v1  ;;  %1913 = vmatpush1.bf16.msra.mxu1 %v7739_v2  ;;  %v7743_v5 = vld [vmem:[#allocation5 + $0x334] ss:$24 sps:$4 sm:$0xff]   ;;  %v7745_v6 = vld [vmem:[#allocation5 + $0x30] ss:$24 sps:$4 sm:$0xff]   ;;  %v7747_v8 = vld [vmem:[#allocation5 + $0x64] ss:$24 sps:$4 sm:$0xff]  }
  0x7f   :  { %1956 = vmatpush1.bf16.msra.mxu0 %v7740_v3  ;;  %1914 = vmatprep.subr.bf16.mxu1 %v7741_v4  ;;  %v7746_v7 = vld [vmem:[#allocation5 + $0x330] ss:$24 sps:$4 sm:$0xff]   ;;  %v7749_v9 = vld [vmem:[#allocation5 + $0x364] ss:$24 sps:$4 sm:$0xff]   ;;  %v7751_v10 = vld [vmem:[#allocation5 + $0x60] ss:$24 sps:$4 sm:$0xff]  }
  0x80   :  { %1957 = vmatprep.subr.bf16.mxu0 %v7743_v5  ;;  %v7752_v11 = vld [vmem:[#allocation5 + $0x360] ss:$24 sps:$4 sm:$0xff]   ;;  %v7753_v12 = vld [vmem:[#allocation5 + $0x94] ss:$24 sps:$4 sm:$0xff]   ;;  %v7757_v14 = vld [vmem:[#allocation5 + $0x90] ss:$24 sps:$4 sm:$0xff]  }
  0x81   :  { %v7755_v13 = vld [vmem:[#allocation5 + $0x394] ss:$24 sps:$4 sm:$0xff]   ;;  %v7758_v15 = vld [vmem:[#allocation5 + $0x390] ss:$24 sps:$4 sm:$0xff]   ;;  %v7759_v16 = vld [vmem:[#allocation5 + $0xc4] ss:$24 sps:$4 sm:$0xff]  }
  0x82   :  { %1915 = vmatpush1.bf16.msra.mxu1 %v7745_v6  ;;  %v7761_v17 = vld [vmem:[#allocation5 + $0x3c4] ss:$24 sps:$4 sm:$0xff]   ;;  %v7763_v18 = vld [vmem:[#allocation5 + $0xc0] ss:$24 sps:$4 sm:$0xff]   ;;  %v7765_v20 = vld [vmem:[#allocation5 + $0xf4] ss:$24 sps:$4 sm:$0xff]  }
  0x83   :  { %1958 = vmatpush1.bf16.msra.mxu0 %v7746_v7  ;;  %1916 = vmatprep.subr.bf16.mxu1 %v7747_v8  ;;  %v7764_v19 = vld [vmem:[#allocation5 + $0x3c0] ss:$24 sps:$4 sm:$0xff]   ;;  %v7767_v21 = vld [vmem:[#allocation5 + $0x3f4] ss:$24 sps:$4 sm:$0xff]   ;;  %v7769_v22 = vld [vmem:[#allocation5 + $0xf0] ss:$24 sps:$4 sm:$0xff]  }
  0x84   :  { %1959 = vmatprep.subr.bf16.mxu0 %v7749_v9  ;;  %v7770_v23 = vld [vmem:[#allocation5 + $0x3f0] ss:$24 sps:$4 sm:$0xff]   ;;  %v7771_v24 = vld [vmem:[#allocation5 + $0x124] ss:$24 sps:$4 sm:$0xff]   ;;  %v7775_v26 = vld [vmem:[#allocation5 + $0x120] ss:$24 sps:$4 sm:$0xff]  }
  0x85   :  { %v7773_v25 = vld [vmem:[#allocation5 + $0x424] ss:$24 sps:$4 sm:$0xff]   ;;  %v7776_v27 = vld [vmem:[#allocation5 + $0x420] ss:$24 sps:$4 sm:$0xff]   ;;  %v7777_v28 = vld [vmem:[#allocation5 + $0x154] ss:$24 sps:$4 sm:$0xff]  }
  0x86   :  { %1917 = vmatpush1.bf16.msra.mxu1 %v7751_v10  ;;  %v7779_v29 = vld [vmem:[#allocation5 + $0x454] ss:$24 sps:$4 sm:$0xff]   ;;  %v7781_v30 = vld [vmem:[#allocation5 + $0x150] ss:$24 sps:$4 sm:$0xff]   ;;  %v7783_v32 = vld [vmem:[#allocation5 + $0x184] ss:$24 sps:$4 sm:$0xff]  }
  0x87   :  { %1960 = vmatpush1.bf16.msra.mxu0 %v7752_v11  ;;  %1918 = vmatprep.subr.bf16.mxu1 %v7753_v12  ;;  %v7782_v31 = vld [vmem:[#allocation5 + $0x450] ss:$24 sps:$4 sm:$0xff]   ;;  %v7785_v33 = vld [vmem:[#allocation5 + $0x484] ss:$24 sps:$4 sm:$0xff]   ;;  %v7787_v34 = vld [vmem:[#allocation5 + $0x180] ss:$24 sps:$4 sm:$0xff]  }
  0x88   :  { %1961 = vmatprep.subr.bf16.mxu0 %v7755_v13  ;;  %v7788_v35 = vld [vmem:[#allocation5 + $0x480] ss:$24 sps:$4 sm:$0xff]   ;;  %v7789_v36 = vld [vmem:[#allocation5 + $0x1b4] ss:$24 sps:$4 sm:$0xff]   ;;  %v7793_v38 = vld [vmem:[#allocation5 + $0x1b0] ss:$24 sps:$4 sm:$0xff]  }
  0x89   :  { %v7791_v37 = vld [vmem:[#allocation5 + $0x4b4] ss:$24 sps:$4 sm:$0xff]   ;;  %v7794_v39 = vld [vmem:[#allocation5 + $0x4b0] ss:$24 sps:$4 sm:$0xff]   ;;  %v7795_v40 = vld [vmem:[#allocation5 + $0x1e4] ss:$24 sps:$4 sm:$0xff]  }
  0x8a   :  { %1919 = vmatpush1.bf16.msra.mxu1 %v7757_v14  ;;  %v7797_v41 = vld [vmem:[#allocation5 + $0x4e4] ss:$24 sps:$4 sm:$0xff]   ;;  %v7799_v42 = vld [vmem:[#allocation5 + $0x1e0] ss:$24 sps:$4 sm:$0xff]   ;;  %v7801_v44 = vld [vmem:[#allocation5 + $0x214] ss:$24 sps:$4 sm:$0xff]  }
  0x8b   :  { %1962 = vmatpush1.bf16.msra.mxu0 %v7758_v15  ;;  %1920 = vmatprep.subr.bf16.mxu1 %v7759_v16  ;;  %v7800_v43 = vld [vmem:[#allocation5 + $0x4e0] ss:$24 sps:$4 sm:$0xff]   ;;  %v7803_v45 = vld [vmem:[#allocation5 + $0x514] ss:$24 sps:$4 sm:$0xff]   ;;  %v7805_v46 = vld [vmem:[#allocation5 + $0x210] ss:$24 sps:$4 sm:$0xff]  }
  0x8c   :  { %1963 = vmatprep.subr.bf16.mxu0 %v7761_v17  ;;  %v7806_v47 = vld [vmem:[#allocation5 + $0x510] ss:$24 sps:$4 sm:$0xff]   ;;  %v7807_v48 = vld [vmem:[#allocation5 + $0x244] ss:$24 sps:$4 sm:$0xff]   ;;  %v9393_v49 = vld [vmem:[#allocation2 + $0x4] ss:$24 sps:$4 sm:$0xff]  }
  0x8d   :  { %v9395_v50 = vld [vmem:[#allocation2 + $0xc] ss:$24 sps:$4 sm:$0xff]   ;;  %1944 = vmatprep.mubr.bf16.mxu1 %v9393_v49  ;;  %v7811_v52 = vld [vmem:[#allocation5 + $0x240] ss:$24 sps:$4 sm:$0xff]   ;;  %v7817_v56 = vld [vmem:[#allocation5 + $0x270] ss:$24 sps:$4 sm:$0xff]  }
  0x8e   :  { %1921 = vmatpush1.bf16.msra.mxu1 %v7763_v18  ;;  %v7809_v51 = vld [vmem:[#allocation5 + $0x544] ss:$24 sps:$4 sm:$0xff]   ;;  %1987 = vmatprep.mubr.bf16.mxu0 %v9395_v50  ;;  %v7812_v53 = vld [vmem:[#allocation5 + $0x540] ss:$24 sps:$4 sm:$0xff]   ;;  %v7813_v54 = vld [vmem:[#allocation5 + $0x274] ss:$24 sps:$4 sm:$0xff]  }
  0x8f   :  { %1964 = vmatpush1.bf16.msra.mxu0 %v7764_v19  ;;  %1922 = vmatprep.subr.bf16.mxu1 %v7765_v20  ;;  %v7815_v55 = vld [vmem:[#allocation5 + $0x574] ss:$24 sps:$4 sm:$0xff]   ;;  %v7818_v57 = vld [vmem:[#allocation5 + $0x570] ss:$24 sps:$4 sm:$0xff]   ;;  %v7819_v58 = vld [vmem:[#allocation5 + $0x2a4] ss:$24 sps:$4 sm:$0xff]  }
  0x90   :  { %1965 = vmatprep.subr.bf16.mxu0 %v7767_v21  ;;  %v7821_v59 = vld [vmem:[#allocation5 + $0x5a4] ss:$24 sps:$4 sm:$0xff]   ;;  %v7823_v60 = vld [vmem:[#allocation5 + $0x2a0] ss:$24 sps:$4 sm:$0xff]   ;;  %v7825_v62 = vld [vmem:[#allocation5 + $0x2d4] ss:$24 sps:$4 sm:$0xff]  }
  0x91   :  { %v7824_v61 = vld [vmem:[#allocation5 + $0x5a0] ss:$24 sps:$4 sm:$0xff]   ;;  %v7827_v63 = vld [vmem:[#allocation5 + $0x5d4] ss:$24 sps:$4 sm:$0xff]   ;;  %v7829_v0 = vld [vmem:[#allocation5 + $0x2d0] ss:$24 sps:$4 sm:$0xff]  }
  0x92   :  { %1923 = vmatpush1.bf16.msra.mxu1 %v7769_v22  ;;  %v7830_v1 = vld [vmem:[#allocation5 + $0x5d0] ss:$24 sps:$4 sm:$0xff]   ;;  %v7838_v2 = vld [vmem:[#allocation5 + $0x604] ss:$24 sps:$4 sm:$0xff]   ;;  %v7836_v5 = vld [vmem:[#allocation5 + $0x600] ss:$24 sps:$4 sm:$0xff]  }
  0x93   :  { %1966 = vmatpush1.bf16.msra.mxu0 %v7770_v23  ;;  %1924 = vmatprep.subr.bf16.mxu1 %v7771_v24  ;;  %v7841_v3 = vld [vmem:[#allocation5 + $0xc] ss:$24 sps:$4 sm:$0xff]   ;;  %v9399_v4 = vld [vmem:[#allocation2] ss:$24 sps:$4 sm:$0xff]   ;;  %v7848_v9 = vld [vmem:[#allocation5 + $0x3c] ss:$24 sps:$4 sm:$0xff]  }
  0x94   :  { %1967 = vmatprep.subr.bf16.mxu0 %v7773_v25  ;;  %v7839_v6 = vld [vmem:[#allocation5 + $0x8] ss:$24 sps:$4 sm:$0xff]   ;;  %v9401_v7 = vld [vmem:[#allocation2 + $0x8] ss:$24 sps:$4 sm:$0xff]   ;;  %v7845_v8 = vld [vmem:[#allocation5 + $0x634] ss:$24 sps:$4 sm:$0xff]  }
  0x95   :  { %v7843_v10 = vld [vmem:[#allocation5 + $0x630] ss:$24 sps:$4 sm:$0xff]   ;;  %v7851_v12 = vld [vmem:[#allocation5 + $0x664] ss:$24 sps:$4 sm:$0xff]   ;;  %v7849_v14 = vld [vmem:[#allocation5 + $0x660] ss:$24 sps:$4 sm:$0xff]  }
  0x96   :  { %1925 = vmatpush1.bf16.msra.mxu1 %v7775_v26  ;;  %v7846_v11 = vld [vmem:[#allocation5 + $0x38] ss:$24 sps:$4 sm:$0xff]   ;;  %v7854_v13 = vld [vmem:[#allocation5 + $0x6c] ss:$24 sps:$4 sm:$0xff]   ;;  %v7852_v15 = vld [vmem:[#allocation5 + $0x68] ss:$24 sps:$4 sm:$0xff]  }
  0x97   :  { %1968 = vmatpush1.bf16.msra.mxu0 %v7776_v27  ;;  %1926 = vmatprep.subr.bf16.mxu1 %v7777_v28  ;;  %v7857_v16 = vld [vmem:[#allocation5 + $0x694] ss:$24 sps:$4 sm:$0xff]   ;;  %v7855_v18 = vld [vmem:[#allocation5 + $0x690] ss:$24 sps:$4 sm:$0xff]   ;;  %v7863_v20 = vld [vmem:[#allocation5 + $0x6c4] ss:$24 sps:$4 sm:$0xff]  }
  0x98   :  { %1969 = vmatprep.subr.bf16.mxu0 %v7779_v29  ;;  %v7860_v17 = vld [vmem:[#allocation5 + $0x9c] ss:$24 sps:$4 sm:$0xff]   ;;  %v7858_v19 = vld [vmem:[#allocation5 + $0x98] ss:$24 sps:$4 sm:$0xff]   ;;  %v7866_v21 = vld [vmem:[#allocation5 + $0xcc] ss:$24 sps:$4 sm:$0xff]  }
  0x99   :  { %v7861_v22 = vld [vmem:[#allocation5 + $0x6c0] ss:$24 sps:$4 sm:$0xff]   ;;  %v7869_v24 = vld [vmem:[#allocation5 + $0x6f4] ss:$24 sps:$4 sm:$0xff]   ;;  %v7867_v26 = vld [vmem:[#allocation5 + $0x6f0] ss:$24 sps:$4 sm:$0xff]  }
  0x9a   :  { %1927 = vmatpush1.bf16.msra.mxu1 %v7781_v30  ;;  %v7864_v23 = vld [vmem:[#allocation5 + $0xc8] ss:$24 sps:$4 sm:$0xff]   ;;  %v7872_v25 = vld [vmem:[#allocation5 + $0xfc] ss:$24 sps:$4 sm:$0xff]   ;;  %v7870_v27 = vld [vmem:[#allocation5 + $0xf8] ss:$24 sps:$4 sm:$0xff]  }
  0x9b   :  { %1970 = vmatpush1.bf16.msra.mxu0 %v7782_v31  ;;  %1928 = vmatprep.subr.bf16.mxu1 %v7783_v32  ;;  %v7875_v28 = vld [vmem:[#allocation5 + $0x724] ss:$24 sps:$4 sm:$0xff]   ;;  %v7873_v30 = vld [vmem:[#allocation5 + $0x720] ss:$24 sps:$4 sm:$0xff]   ;;  %v7881_v32 = vld [vmem:[#allocation5 + $0x754] ss:$24 sps:$4 sm:$0xff]  }
  0x9c   :  { %1971 = vmatprep.subr.bf16.mxu0 %v7785_v33  ;;  %v7878_v29 = vld [vmem:[#allocation5 + $0x12c] ss:$24 sps:$4 sm:$0xff]   ;;  %v7876_v31 = vld [vmem:[#allocation5 + $0x128] ss:$24 sps:$4 sm:$0xff]   ;;  %v7884_v33 = vld [vmem:[#allocation5 + $0x15c] ss:$24 sps:$4 sm:$0xff]  }
  0x9d   :  { %s9240_s6 = smov [#allocation14]  }
  0x9e   :  { %1929 = vmatpush1.bf16.msra.mxu1 %v7787_v34  ;;  %v9406_v34 = vld [vmem:[#allocation2 + $0x14] ss:$24 sps:$4 sm:$0xff]   ;;  %s6730_s12 = sshll.u32 %s9240_s6, 4  ;;  %s6731_s12 = int_to_ptr.vmem [resolvable:$true] %s6730_s12 }
  0x9f   :  { %1972 = vmatpush1.bf16.msra.mxu0 %v7788_v35  ;;  %1930 = vmatprep.subr.bf16.mxu1 %v7789_v36  ;;  %v7879_v35 = vld [vmem:[#allocation5 + $0x750] ss:$24 sps:$4 sm:$0xff]   ;;  %s9199_s15 = scalar_lea.vmem %s6731_s12, 1536  ;;  %p9204_p1 = scmp.lt.s32.totalorder %s6731_s12, %s6731_s12 }
  0xa0   :  { %1973 = vmatprep.subr.bf16.mxu0 %v7791_v37  ;;  %v7882_v36 = vld [vmem:[#allocation5 + $0x158] ss:$24 sps:$4 sm:$0xff]   ;;  %v7887_v37 = vld [vmem:[#allocation5 + $0x784] ss:$24 sps:$4 sm:$0xff]   ;;  %p9200_p0 = scmp.ne.s32.totalorder %s6731_s12, %s9199_s15  ;;  %p9205_p2 = scmp.lt.s32.totalorder %s9199_s15, %s9199_s15 }
  0xa2   :  { %1931 = vmatpush1.bf16.msra.mxu1 %v7793_v38  ;;  %v7890_v38 = vld [vmem:[#allocation5 + $0x18c] ss:$24 sps:$4 sm:$0xff]   ;;  %p9206_p3 = por %p9205_p2, %p9204_p1 }
  0xa3   :  { %1974 = vmatpush1.bf16.msra.mxu0 %v7794_v39  ;;  %1932 = vmatprep.subr.bf16.mxu1 %v7795_v40  ;;  %v7885_v39 = vld [vmem:[#allocation5 + $0x780] ss:$24 sps:$4 sm:$0xff]  }
  0xa4   :  { %1975 = vmatprep.subr.bf16.mxu0 %v7797_v41  ;;  %v7888_v40 = vld [vmem:[#allocation5 + $0x188] ss:$24 sps:$4 sm:$0xff]   ;;  %v7893_v41 = vld [vmem:[#allocation5 + $0x7b4] ss:$24 sps:$4 sm:$0xff]   ;;  %p9207_p4 = pnand %p9206_p3, %p9200_p0 }
  0xa6   :  { %1933 = vmatpush1.bf16.msra.mxu1 %v7799_v42  ;;  %v7896_v42 = vld [vmem:[#allocation5 + $0x1bc] ss:$24 sps:$4 sm:$0xff]  }
  0xa7   :  { %1976 = vmatpush1.bf16.msra.mxu0 %v7800_v43  ;;  %1934 = vmatprep.subr.bf16.mxu1 %v7801_v44  ;;  %v7891_v43 = vld [vmem:[#allocation5 + $0x7b0] ss:$24 sps:$4 sm:$0xff]  }
  0xa8   :  { %1977 = vmatprep.subr.bf16.mxu0 %v7803_v45  ;;  %v7894_v44 = vld [vmem:[#allocation5 + $0x1b8] ss:$24 sps:$4 sm:$0xff]   ;;  %v7899_v45 = vld [vmem:[#allocation5 + $0x7e4] ss:$24 sps:$4 sm:$0xff]  }
  0xaa   :  { %1935 = vmatpush1.bf16.msra.mxu1 %v7805_v46  ;;  %v7902_v46 = vld [vmem:[#allocation5 + $0x1ec] ss:$24 sps:$4 sm:$0xff]  }
  0xab   :  { %1978 = vmatpush1.bf16.msra.mxu0 %v7806_v47  ;;  %1936 = vmatprep.subr.bf16.mxu1 %v7807_v48  ;;  %v7897_v47 = vld [vmem:[#allocation5 + $0x7e0] ss:$24 sps:$4 sm:$0xff]  }
  0xac   :  { %1979 = vmatprep.subr.bf16.mxu0 %v7809_v51  ;;  %v7900_v48 = vld [vmem:[#allocation5 + $0x1e8] ss:$24 sps:$4 sm:$0xff]   ;;  %v7905_v51 = vld [vmem:[#allocation5 + $0x814] ss:$24 sps:$4 sm:$0xff]  }
  0xae   :  { %1937 = vmatpush1.bf16.msra.mxu1 %v7811_v52  ;;  %v7908_v52 = vld [vmem:[#allocation5 + $0x21c] ss:$24 sps:$4 sm:$0xff]  }
  0xaf   :  { %1980 = vmatpush1.bf16.msra.mxu0 %v7812_v53  ;;  %1938 = vmatprep.subr.bf16.mxu1 %v7813_v54  ;;  %v7903_v53 = vld [vmem:[#allocation5 + $0x810] ss:$24 sps:$4 sm:$0xff]  }
  0xb0   :  { %1981 = vmatprep.subr.bf16.mxu0 %v7815_v55  ;;  %v7906_v54 = vld [vmem:[#allocation5 + $0x218] ss:$24 sps:$4 sm:$0xff]   ;;  %v7911_v55 = vld [vmem:[#allocation5 + $0x844] ss:$24 sps:$4 sm:$0xff]  }
  0xb2   :  { %1939 = vmatpush1.bf16.msra.mxu1 %v7817_v56  ;;  %v7914_v56 = vld [vmem:[#allocation5 + $0x24c] ss:$24 sps:$4 sm:$0xff]  }
  0xb3   :  { %1982 = vmatpush1.bf16.msra.mxu0 %v7818_v57  ;;  %1940 = vmatprep.subr.bf16.mxu1 %v7819_v58  ;;  %v7909_v57 = vld [vmem:[#allocation5 + $0x840] ss:$24 sps:$4 sm:$0xff]  }
  0xb4   :  { %1983 = vmatprep.subr.bf16.mxu0 %v7821_v59  ;;  %v7912_v58 = vld [vmem:[#allocation5 + $0x248] ss:$24 sps:$4 sm:$0xff]   ;;  %v7917_v59 = vld [vmem:[#allocation5 + $0x874] ss:$24 sps:$4 sm:$0xff]  }
  0xb6   :  { %1941 = vmatpush1.bf16.msra.mxu1 %v7823_v60  ;;  %v7920_v60 = vld [vmem:[#allocation5 + $0x27c] ss:$24 sps:$4 sm:$0xff]  }
  0xb7   :  { %1984 = vmatpush1.bf16.msra.mxu0 %v7824_v61  ;;  %1942 = vmatprep.subr.bf16.mxu1 %v7825_v62  ;;  %v7915_v61 = vld [vmem:[#allocation5 + $0x870] ss:$24 sps:$4 sm:$0xff]  }
  0xb8   :  { %1985 = vmatprep.subr.bf16.mxu0 %v7827_v63  ;;  %v7918_v62 = vld [vmem:[#allocation5 + $0x278] ss:$24 sps:$4 sm:$0xff]   ;;  %v7923_v63 = vld [vmem:[#allocation5 + $0x8a4] ss:$24 sps:$4 sm:$0xff]  }
  0xba   :  { %1943 = vmatpush1.bf16.msra.mxu1 %v7829_v0  ;;  %v7926_v0 = vld [vmem:[#allocation5 + $0x2ac] ss:$24 sps:$4 sm:$0xff]  }
  0xbb   :  { %1986 = vmatpush1.bf16.msra.mxu0 %v7830_v1  ;;  %2041 = vmatprep.subr.bf16.mxu1 %v7841_v3  ;;  %v7921_v1 = vld [vmem:[#allocation5 + $0x8a0] ss:$24 sps:$4 sm:$0xff]   ;;  %v7929_v3 = vld [vmem:[#allocation5 + $0x8d4] ss:$24 sps:$4 sm:$0xff]  }
  0xbc   :  { %1998 = vmatprep.subr.bf16.mxu0 %v7838_v2  ;;  %v7924_v2 = vld [vmem:[#allocation5 + $0x2a8] ss:$24 sps:$4 sm:$0xff]  }
  0xbd   :  { %1945 = vmatmul.mubr.bf16.vlgmr.msra.gmra.mrb[0].mxu1 %v9399_v4 }
  0xbe   :  { %1988 = vmatmul.mubr.bf16.vlgmr.msra.gmra.mrb[0].mxu0 %v9401_v7  ;;  %2042 = vmatpush1.bf16.msra.mxu1 %v7839_v6  ;;  %v7927_v6 = vld [vmem:[#allocation5 + $0x8d0] ss:$24 sps:$4 sm:$0xff]  }
  0xbf   :  { %1999 = vmatpush1.bf16.msra.mxu0 %v7836_v5  ;;  %2043 = vmatprep.subr.bf16.mxu1 %v7848_v9  ;;  %v7932_v5 = vld [vmem:[#allocation5 + $0x2dc] ss:$24 sps:$4 sm:$0xff]   ;;  %v7938_v9 = vld [vmem:[#allocation5 + $0x30c] ss:$24 sps:$4 sm:$0xff]  }
  0xc0   :  { %2000 = vmatprep.subr.bf16.mxu0 %v7845_v8  ;;  %2073 = vmatprep.mubr.bf16.mxu1 %v9393_v49  ;;  %v7930_v8 = vld [vmem:[#allocation5 + $0x2d8] ss:$24 sps:$4 sm:$0xff]  }
  0xc1   :  { %2030 = vmatprep.mubr.bf16.mxu0 %v9406_v34 }
  0xc2   :  { %2044 = vmatpush1.bf16.msra.mxu1 %v7846_v11  ;;  %v9409_v11 = vld [vmem:[#allocation2 + $0x10] ss:$24 sps:$4 sm:$0xff]  }
  0xc3   :  { %2001 = vmatpush1.bf16.msra.mxu0 %v7843_v10  ;;  %2045 = vmatprep.subr.bf16.mxu1 %v7854_v13  ;;  %v7941_v10 = vld [vmem:[#allocation5 + $0x14] ss:$24 sps:$4 sm:$0xff]   ;;  %v7939_v13 = vld [vmem:[#allocation5 + $0x10] ss:$24 sps:$4 sm:$0xff]  }
  0xc4   :  { %2002 = vmatprep.subr.bf16.mxu0 %v7851_v12  ;;  %v7936_v12 = vld [vmem:[#allocation5 + $0x308] ss:$24 sps:$4 sm:$0xff]  }
  0xc6   :  { %2046 = vmatpush1.bf16.msra.mxu1 %v7852_v15  ;;  %v7947_v15 = vld [vmem:[#allocation5 + $0x44] ss:$24 sps:$4 sm:$0xff]  }
  0xc7   :  { %2003 = vmatpush1.bf16.msra.mxu0 %v7849_v14  ;;  %2047 = vmatprep.subr.bf16.mxu1 %v7860_v17  ;;  %v7944_v14 = vld [vmem:[#allocation5 + $0x33c] ss:$24 sps:$4 sm:$0xff]   ;;  %v7945_v17 = vld [vmem:[#allocation5 + $0x40] ss:$24 sps:$4 sm:$0xff]  }
  0xc8   :  { %2004 = vmatprep.subr.bf16.mxu0 %v7857_v16  ;;  %v7942_v16 = vld [vmem:[#allocation5 + $0x338] ss:$24 sps:$4 sm:$0xff]  }
  0xca   :  { %2048 = vmatpush1.bf16.msra.mxu1 %v7858_v19  ;;  %v7953_v19 = vld [vmem:[#allocation5 + $0x74] ss:$24 sps:$4 sm:$0xff]  }
  0xcb   :  { %2005 = vmatpush1.bf16.msra.mxu0 %v7855_v18  ;;  %2049 = vmatprep.subr.bf16.mxu1 %v7866_v21  ;;  %v7950_v18 = vld [vmem:[#allocation5 + $0x36c] ss:$24 sps:$4 sm:$0xff]   ;;  %v7951_v21 = vld [vmem:[#allocation5 + $0x70] ss:$24 sps:$4 sm:$0xff]  }
  0xcc   :  { %2006 = vmatprep.subr.bf16.mxu0 %v7863_v20  ;;  %v7948_v20 = vld [vmem:[#allocation5 + $0x368] ss:$24 sps:$4 sm:$0xff]  }
  0xce   :  { %2050 = vmatpush1.bf16.msra.mxu1 %v7864_v23  ;;  %v7959_v23 = vld [vmem:[#allocation5 + $0xa4] ss:$24 sps:$4 sm:$0xff]  }
  0xcf   :  { %2007 = vmatpush1.bf16.msra.mxu0 %v7861_v22  ;;  %2051 = vmatprep.subr.bf16.mxu1 %v7872_v25  ;;  %v7956_v22 = vld [vmem:[#allocation5 + $0x39c] ss:$24 sps:$4 sm:$0xff]   ;;  %v7957_v25 = vld [vmem:[#allocation5 + $0xa0] ss:$24 sps:$4 sm:$0xff]  }
  0xd0   :  { %2008 = vmatprep.subr.bf16.mxu0 %v7869_v24  ;;  %v7954_v24 = vld [vmem:[#allocation5 + $0x398] ss:$24 sps:$4 sm:$0xff]  }
  0xd2   :  { %2052 = vmatpush1.bf16.msra.mxu1 %v7870_v27  ;;  %v7965_v27 = vld [vmem:[#allocation5 + $0xd4] ss:$24 sps:$4 sm:$0xff]  }
  0xd3   :  { %2009 = vmatpush1.bf16.msra.mxu0 %v7867_v26  ;;  %2053 = vmatprep.subr.bf16.mxu1 %v7878_v29  ;;  %v7962_v26 = vld [vmem:[#allocation5 + $0x3cc] ss:$24 sps:$4 sm:$0xff]  }
  0xd4   :  { %2010 = vmatprep.subr.bf16.mxu0 %v7875_v28  ;;  %v7960_v28 = vld [vmem:[#allocation5 + $0x3c8] ss:$24 sps:$4 sm:$0xff]   ;;  %v7971_v29 = vld [vmem:[#allocation5 + $0x104] ss:$24 sps:$4 sm:$0xff]  }
  0xd6   :  { %2054 = vmatpush1.bf16.msra.mxu1 %v7876_v31  ;;  %v7969_v31 = vld [vmem:[#allocation5 + $0x100] ss:$24 sps:$4 sm:$0xff]  }
  0xd7   :  { %2011 = vmatpush1.bf16.msra.mxu0 %v7873_v30  ;;  %2055 = vmatprep.subr.bf16.mxu1 %v7884_v33  ;;  %v7966_v30 = vld [vmem:[#allocation5 + $0x3f8] ss:$24 sps:$4 sm:$0xff]   ;;  %v7977_v33 = vld [vmem:[#allocation5 + $0x134] ss:$24 sps:$4 sm:$0xff]  }
  0xd8   :  { %2012 = vmatprep.subr.bf16.mxu0 %v7881_v32  ;;  %v7974_v32 = vld [vmem:[#allocation5 + $0x42c] ss:$24 sps:$4 sm:$0xff]  }
  0xda   :  { %2056 = vmatpush1.bf16.msra.mxu1 %v7882_v36  ;;  %v7975_v36 = vld [vmem:[#allocation5 + $0x130] ss:$24 sps:$4 sm:$0xff]  }
  0xdb   :  { %2013 = vmatpush1.bf16.msra.mxu0 %v7879_v35  ;;  %2057 = vmatprep.subr.bf16.mxu1 %v7890_v38  ;;  %v7972_v35 = vld [vmem:[#allocation5 + $0x428] ss:$24 sps:$4 sm:$0xff]   ;;  %v7983_v38 = vld [vmem:[#allocation5 + $0x164] ss:$24 sps:$4 sm:$0xff]  }
  0xdc   :  { %2014 = vmatprep.subr.bf16.mxu0 %v7887_v37  ;;  %v7980_v37 = vld [vmem:[#allocation5 + $0x45c] ss:$24 sps:$4 sm:$0xff]  }
  0xde   :  { %2058 = vmatpush1.bf16.msra.mxu1 %v7888_v40  ;;  %v7981_v40 = vld [vmem:[#allocation5 + $0x160] ss:$24 sps:$4 sm:$0xff]  }
  0xdf   :  { %2015 = vmatpush1.bf16.msra.mxu0 %v7885_v39  ;;  %2059 = vmatprep.subr.bf16.mxu1 %v7896_v42  ;;  %v7978_v39 = vld [vmem:[#allocation5 + $0x458] ss:$24 sps:$4 sm:$0xff]   ;;  %v7989_v42 = vld [vmem:[#allocation5 + $0x194] ss:$24 sps:$4 sm:$0xff]  }
  0xe0   :  { %2016 = vmatprep.subr.bf16.mxu0 %v7893_v41  ;;  %v7986_v41 = vld [vmem:[#allocation5 + $0x48c] ss:$24 sps:$4 sm:$0xff]  }
  0xe2   :  { %2060 = vmatpush1.bf16.msra.mxu1 %v7894_v44  ;;  %v7987_v44 = vld [vmem:[#allocation5 + $0x190] ss:$24 sps:$4 sm:$0xff]  }
  0xe3   :  { %2017 = vmatpush1.bf16.msra.mxu0 %v7891_v43  ;;  %2061 = vmatprep.subr.bf16.mxu1 %v7902_v46  ;;  %v7984_v43 = vld [vmem:[#allocation5 + $0x488] ss:$24 sps:$4 sm:$0xff]   ;;  %v7995_v46 = vld [vmem:[#allocation5 + $0x1c4] ss:$24 sps:$4 sm:$0xff]  }
  0xe4   :  { %2018 = vmatprep.subr.bf16.mxu0 %v7899_v45  ;;  %v7992_v45 = vld [vmem:[#allocation5 + $0x4bc] ss:$24 sps:$4 sm:$0xff]  }
  0xe6   :  { %2062 = vmatpush1.bf16.msra.mxu1 %v7900_v48  ;;  %v7993_v48 = vld [vmem:[#allocation5 + $0x1c0] ss:$24 sps:$4 sm:$0xff]  }
  0xe7   :  { %2019 = vmatpush1.bf16.msra.mxu0 %v7897_v47  ;;  %2063 = vmatprep.subr.bf16.mxu1 %v7908_v52  ;;  %v7990_v47 = vld [vmem:[#allocation5 + $0x4b8] ss:$24 sps:$4 sm:$0xff]   ;;  %v8001_v52 = vld [vmem:[#allocation5 + $0x1f4] ss:$24 sps:$4 sm:$0xff]  }
  0xe8   :  { %2020 = vmatprep.subr.bf16.mxu0 %v7905_v51  ;;  %v7998_v51 = vld [vmem:[#allocation5 + $0x4ec] ss:$24 sps:$4 sm:$0xff]  }
  0xea   :  { %2064 = vmatpush1.bf16.msra.mxu1 %v7906_v54  ;;  %v7999_v54 = vld [vmem:[#allocation5 + $0x1f0] ss:$24 sps:$4 sm:$0xff]  }
  0xeb   :  { %2021 = vmatpush1.bf16.msra.mxu0 %v7903_v53  ;;  %2065 = vmatprep.subr.bf16.mxu1 %v7914_v56  ;;  %v7996_v53 = vld [vmem:[#allocation5 + $0x4e8] ss:$24 sps:$4 sm:$0xff]   ;;  %v8007_v56 = vld [vmem:[#allocation5 + $0x224] ss:$24 sps:$4 sm:$0xff]  }
  0xec   :  { %2022 = vmatprep.subr.bf16.mxu0 %v7911_v55  ;;  %v8004_v55 = vld [vmem:[#allocation5 + $0x51c] ss:$24 sps:$4 sm:$0xff]  }
  0xee   :  { %2066 = vmatpush1.bf16.msra.mxu1 %v7912_v58  ;;  %v8005_v58 = vld [vmem:[#allocation5 + $0x220] ss:$24 sps:$4 sm:$0xff]  }
  0xef   :  { %2023 = vmatpush1.bf16.msra.mxu0 %v7909_v57  ;;  %2067 = vmatprep.subr.bf16.mxu1 %v7920_v60  ;;  %v8002_v57 = vld [vmem:[#allocation5 + $0x518] ss:$24 sps:$4 sm:$0xff]   ;;  %v8013_v60 = vld [vmem:[#allocation5 + $0x254] ss:$24 sps:$4 sm:$0xff]  }
  0xf0   :  { %2024 = vmatprep.subr.bf16.mxu0 %v7917_v59  ;;  %v8010_v59 = vld [vmem:[#allocation5 + $0x54c] ss:$24 sps:$4 sm:$0xff]  }
  0xf2   :  { %2068 = vmatpush1.bf16.msra.mxu1 %v7918_v62  ;;  %v8011_v62 = vld [vmem:[#allocation5 + $0x250] ss:$24 sps:$4 sm:$0xff]  }
  0xf3   :  { %2025 = vmatpush1.bf16.msra.mxu0 %v7915_v61  ;;  %2069 = vmatprep.subr.bf16.mxu1 %v7926_v0  ;;  %v8008_v61 = vld [vmem:[#allocation5 + $0x548] ss:$24 sps:$4 sm:$0xff]   ;;  %v8019_v0 = vld [vmem:[#allocation5 + $0x284] ss:$24 sps:$4 sm:$0xff]  }
  0xf4   :  { %2026 = vmatprep.subr.bf16.mxu0 %v7923_v63  ;;  %v8016_v63 = vld [vmem:[#allocation5 + $0x57c] ss:$24 sps:$4 sm:$0xff]  }
  0xf6   :  { %2070 = vmatpush1.bf16.msra.mxu1 %v7924_v2  ;;  %v8017_v2 = vld [vmem:[#allocation5 + $0x280] ss:$24 sps:$4 sm:$0xff]  }
  0xf7   :  { %2027 = vmatpush1.bf16.msra.mxu0 %v7921_v1  ;;  %2071 = vmatprep.subr.bf16.mxu1 %v7932_v5  ;;  %v8014_v1 = vld [vmem:[#allocation5 + $0x578] ss:$24 sps:$4 sm:$0xff]   ;;  %v8025_v5 = vld [vmem:[#allocation5 + $0x2b4] ss:$24 sps:$4 sm:$0xff]  }
  0xf8   :  { %2028 = vmatprep.subr.bf16.mxu0 %v7929_v3  ;;  %v8022_v3 = vld [vmem:[#allocation5 + $0x5ac] ss:$24 sps:$4 sm:$0xff]  }
  0xfa   :  { %2072 = vmatpush1.bf16.msra.mxu1 %v7930_v8  ;;  %v8023_v8 = vld [vmem:[#allocation5 + $0x2b0] ss:$24 sps:$4 sm:$0xff]  }
  0xfb   :  { %2029 = vmatpush1.bf16.msra.mxu0 %v7927_v6  ;;  %2084 = vmatprep.subr.bf16.mxu1 %v7938_v9  ;;  %v8020_v6 = vld [vmem:[#allocation5 + $0x5a8] ss:$24 sps:$4 sm:$0xff]   ;;  %v8028_v9 = vld [vmem:[#allocation5 + $0x5dc] ss:$24 sps:$4 sm:$0xff]  }
  0xfc   :  { %2170 = vmatprep.subr.bf16.mxu0 %v7941_v10  ;;  %v8031_v10 = vld [vmem:[#allocation5 + $0x2e4] ss:$24 sps:$4 sm:$0xff]  }
  0xfd   :  { %2074 = vmatmul.mubr.bf16.vlgmr.msra.gmra.mrb[4].mxu1 %v9399_v4 }
  0xfe   :  { %2031 = vmatmul.mubr.bf16.vlgmr.msra.gmra.mrb[0].mxu0 %v9409_v11  ;;  %2085 = vmatpush1.bf16.msra.mxu1 %v7936_v12  ;;  %v8026_v12 = vld [vmem:[#allocation5 + $0x5d8] ss:$24 sps:$4 sm:$0xff]  }
  0xff   :  { %2171 = vmatpush1.bf16.msra.mxu0 %v7939_v13  ;;  %2086 = vmatprep.subr.bf16.mxu1 %v7944_v14  ;;  %v8029_v13 = vld [vmem:[#allocation5 + $0x2e0] ss:$24 sps:$4 sm:$0xff]   ;;  %v8034_v14 = vld [vmem:[#allocation5 + $0x60c] ss:$24 sps:$4 sm:$0xff]  }
 0x100   :  { %2172 = vmatprep.subr.bf16.mxu0 %v7947_v15  ;;  %2116 = vmatprep.mubr.bf16.mxu1 %v9395_v50  ;;  %v7963_v50 = vld [vmem:[#allocation5 + $0xd0] ss:$24 sps:$4 sm:$0xff]   ;;  %v8037_v15 = vld [vmem:[#allocation5 + $0x314] ss:$24 sps:$4 sm:$0xff]  }
 0x101   :  { %2202 = vmatprep.mubr.bf16.mxu0 %v9393_v49  ;;  %v7968_v49 = vld [vmem:[#allocation5 + $0x3fc] ss:$24 sps:$4 sm:$0xff]  }
 0x102   :  { %2087 = vmatpush1.bf16.msra.mxu1 %v7942_v16  ;;  %v8032_v16 = vld [vmem:[#allocation5 + $0x608] ss:$24 sps:$4 sm:$0xff]  }
 0x103   :  { %2173 = vmatpush1.bf16.msra.mxu0 %v7945_v17  ;;  %2088 = vmatprep.subr.bf16.mxu1 %v7950_v18  ;;  %v8035_v17 = vld [vmem:[#allocation5 + $0x310] ss:$24 sps:$4 sm:$0xff]   ;;  %v8040_v18 = vld [vmem:[#allocation5 + $0x63c] ss:$24 sps:$4 sm:$0xff]  }
 0x104   :  { %2174 = vmatprep.subr.bf16.mxu0 %v7953_v19  ;;  %v8043_v19 = vld [vmem:[#allocation5 + $0x344] ss:$24 sps:$4 sm:$0xff]  }
 0x106   :  { %2089 = vmatpush1.bf16.msra.mxu1 %v7948_v20  ;;  %v8038_v20 = vld [vmem:[#allocation5 + $0x638] ss:$24 sps:$4 sm:$0xff]  }
 0x107   :  { %2175 = vmatpush1.bf16.msra.mxu0 %v7951_v21  ;;  %2090 = vmatprep.subr.bf16.mxu1 %v7956_v22  ;;  %v8041_v21 = vld [vmem:[#allocation5 + $0x340] ss:$24 sps:$4 sm:$0xff]   ;;  %v8046_v22 = vld [vmem:[#allocation5 + $0x66c] ss:$24 sps:$4 sm:$0xff]  }
 0x108   :  { %2176 = vmatprep.subr.bf16.mxu0 %v7959_v23  ;;  %v8049_v23 = vld [vmem:[#allocation5 + $0x374] ss:$24 sps:$4 sm:$0xff]  }
 0x10a   :  { %2091 = vmatpush1.bf16.msra.mxu1 %v7954_v24  ;;  %v9040_v24 = vld [vmem:[#allocation2 + $0xc] ss:$24 sps:$4 sm:$0xff]  }
 0x10b   :  { %2177 = vmatpush1.bf16.msra.mxu0 %v7957_v25  ;;  %2092 = vmatprep.subr.bf16.mxu1 %v7962_v26  ;;  %v8044_v25 = vld [vmem:[#allocation5 + $0x668] ss:$24 sps:$4 sm:$0xff]  }
 0x10c   :  { %2178 = vmatprep.subr.bf16.mxu0 %v7965_v27  ;;  %v8047_v26 = vld [vmem:[#allocation5 + $0x370] ss:$24 sps:$4 sm:$0xff]  }
 0x10d   :  { %v8050_v27 = vld [vmem:[#allocation5 + $0x698] ss:$24 sps:$4 sm:$0xff]  }
 0x10e   :  { %2093 = vmatpush1.bf16.msra.mxu1 %v7960_v28  ;;  %v8053_v28 = vld [vmem:[#allocation5 + $0x3a0] ss:$24 sps:$4 sm:$0xff]  }
 0x10f   :  { %2179 = vmatpush1.bf16.msra.mxu0 %v7963_v50  ;;  %2094 = vmatprep.subr.bf16.mxu1 %v7968_v49  ;;  %v8058_v50 = vld [vmem:[#allocation5 + $0x6cc] ss:$24 sps:$4 sm:$0xff]  }
 0x110   :  { %2180 = vmatprep.subr.bf16.mxu0 %v7971_v29  ;;  %v8061_v49 = vld [vmem:[#allocation5 + $0x3d4] ss:$24 sps:$4 sm:$0xff]   ;;  %v8056_v29 = vld [vmem:[#allocation5 + $0x6c8] ss:$24 sps:$4 sm:$0xff]  }
 0x112   :  { %2095 = vmatpush1.bf16.msra.mxu1 %v7966_v30  ;;  %v8064_v30 = vld [vmem:[#allocation5 + $0x6fc] ss:$24 sps:$4 sm:$0xff]  }
 0x113   :  { %2181 = vmatpush1.bf16.msra.mxu0 %v7969_v31  ;;  %2096 = vmatprep.subr.bf16.mxu1 %v7974_v32  ;;  %v8067_v31 = vld [vmem:[#allocation5 + $0x404] ss:$24 sps:$4 sm:$0xff]   ;;  %v8062_v32 = vld [vmem:[#allocation5 + $0x6f8] ss:$24 sps:$4 sm:$0xff]  }
 0x114   :  { %2182 = vmatprep.subr.bf16.mxu0 %v7977_v33  ;;  %v8065_v33 = vld [vmem:[#allocation5 + $0x400] ss:$24 sps:$4 sm:$0xff]  }
 0x116   :  { %2097 = vmatpush1.bf16.msra.mxu1 %v7972_v35  ;;  %v8070_v35 = vld [vmem:[#allocation5 + $0x72c] ss:$24 sps:$4 sm:$0xff]  }
 0x117   :  { %2183 = vmatpush1.bf16.msra.mxu0 %v7975_v36  ;;  %2098 = vmatprep.subr.bf16.mxu1 %v7980_v37  ;;  %v8073_v36 = vld [vmem:[#allocation5 + $0x434] ss:$24 sps:$4 sm:$0xff]   ;;  %v8068_v37 = vld [vmem:[#allocation5 + $0x728] ss:$24 sps:$4 sm:$0xff]  }
 0x118   :  { %2184 = vmatprep.subr.bf16.mxu0 %v7983_v38  ;;  %v8071_v38 = vld [vmem:[#allocation5 + $0x430] ss:$24 sps:$4 sm:$0xff]  }
 0x11a   :  { %2099 = vmatpush1.bf16.msra.mxu1 %v7978_v39  ;;  %v8076_v39 = vld [vmem:[#allocation5 + $0x75c] ss:$24 sps:$4 sm:$0xff]  }
 0x11b   :  { %2185 = vmatpush1.bf16.msra.mxu0 %v7981_v40  ;;  %2100 = vmatprep.subr.bf16.mxu1 %v7986_v41  ;;  %v8079_v40 = vld [vmem:[#allocation5 + $0x464] ss:$24 sps:$4 sm:$0xff]   ;;  %v8074_v41 = vld [vmem:[#allocation5 + $0x758] ss:$24 sps:$4 sm:$0xff]  }
 0x11c   :  { %2186 = vmatprep.subr.bf16.mxu0 %v7989_v42  ;;  %v8077_v42 = vld [vmem:[#allocation5 + $0x460] ss:$24 sps:$4 sm:$0xff]  }
 0x11e   :  { %2101 = vmatpush1.bf16.msra.mxu1 %v7984_v43  ;;  %v8082_v43 = vld [vmem:[#allocation5 + $0x78c] ss:$24 sps:$4 sm:$0xff]  }
 0x11f   :  { %2187 = vmatpush1.bf16.msra.mxu0 %v7987_v44  ;;  %2102 = vmatprep.subr.bf16.mxu1 %v7992_v45  ;;  %v8085_v44 = vld [vmem:[#allocation5 + $0x494] ss:$24 sps:$4 sm:$0xff]   ;;  %v8080_v45 = vld [vmem:[#allocation5 + $0x788] ss:$24 sps:$4 sm:$0xff]  }
 0x120   :  { %2188 = vmatprep.subr.bf16.mxu0 %v7995_v46  ;;  %v8083_v46 = vld [vmem:[#allocation5 + $0x490] ss:$24 sps:$4 sm:$0xff]  }
 0x122   :  { %2103 = vmatpush1.bf16.msra.mxu1 %v7990_v47  ;;  %v8088_v47 = vld [vmem:[#allocation5 + $0x7bc] ss:$24 sps:$4 sm:$0xff]  }
 0x123   :  { %2189 = vmatpush1.bf16.msra.mxu0 %v7993_v48  ;;  %2104 = vmatprep.subr.bf16.mxu1 %v7998_v51  ;;  %v8091_v48 = vld [vmem:[#allocation5 + $0x4c4] ss:$24 sps:$4 sm:$0xff]   ;;  %v8086_v51 = vld [vmem:[#allocation5 + $0x7b8] ss:$24 sps:$4 sm:$0xff]  }
 0x124   :  { %2190 = vmatprep.subr.bf16.mxu0 %v8001_v52  ;;  %v8089_v52 = vld [vmem:[#allocation5 + $0x4c0] ss:$24 sps:$4 sm:$0xff]  }
 0x126   :  { %2105 = vmatpush1.bf16.msra.mxu1 %v7996_v53  ;;  %v8094_v53 = vld [vmem:[#allocation5 + $0x7ec] ss:$24 sps:$4 sm:$0xff]  }
 0x127   :  { %2191 = vmatpush1.bf16.msra.mxu0 %v7999_v54  ;;  %2106 = vmatprep.subr.bf16.mxu1 %v8004_v55  ;;  %v8097_v54 = vld [vmem:[#allocation5 + $0x4f4] ss:$24 sps:$4 sm:$0xff]   ;;  %v8092_v55 = vld [vmem:[#allocation5 + $0x7e8] ss:$24 sps:$4 sm:$0xff]  }
 0x128   :  { %2192 = vmatprep.subr.bf16.mxu0 %v8007_v56  ;;  %v8095_v56 = vld [vmem:[#allocation5 + $0x4f0] ss:$24 sps:$4 sm:$0xff]  }
 0x12a   :  { %2107 = vmatpush1.bf16.msra.mxu1 %v8002_v57  ;;  %v8100_v57 = vld [vmem:[#allocation5 + $0x81c] ss:$24 sps:$4 sm:$0xff]  }
 0x12b   :  { %2193 = vmatpush1.bf16.msra.mxu0 %v8005_v58  ;;  %2108 = vmatprep.subr.bf16.mxu1 %v8010_v59  ;;  %v8103_v58 = vld [vmem:[#allocation5 + $0x524] ss:$24 sps:$4 sm:$0xff]   ;;  %v8098_v59 = vld [vmem:[#allocation5 + $0x818] ss:$24 sps:$4 sm:$0xff]  }
 0x12c   :  { %2194 = vmatprep.subr.bf16.mxu0 %v8013_v60  ;;  %v8101_v60 = vld [vmem:[#allocation5 + $0x520] ss:$24 sps:$4 sm:$0xff]  }
 0x12e   :  { %2109 = vmatpush1.bf16.msra.mxu1 %v8008_v61  ;;  %v8106_v61 = vld [vmem:[#allocation5 + $0x84c] ss:$24 sps:$4 sm:$0xff]  }
 0x12f   :  { %2195 = vmatpush1.bf16.msra.mxu0 %v8011_v62  ;;  %2110 = vmatprep.subr.bf16.mxu1 %v8016_v63  ;;  %v8109_v62 = vld [vmem:[#allocation5 + $0x554] ss:$24 sps:$4 sm:$0xff]   ;;  %v8104_v63 = vld [vmem:[#allocation5 + $0x848] ss:$24 sps:$4 sm:$0xff]  }
 0x130   :  { %2196 = vmatprep.subr.bf16.mxu0 %v8019_v0  ;;  %v8107_v0 = vld [vmem:[#allocation5 + $0x550] ss:$24 sps:$4 sm:$0xff]  }
 0x132   :  { %2111 = vmatpush1.bf16.msra.mxu1 %v8014_v1  ;;  %v8112_v1 = vld [vmem:[#allocation5 + $0x87c] ss:$24 sps:$4 sm:$0xff]  }
 0x133   :  { %2197 = vmatpush1.bf16.msra.mxu0 %v8017_v2  ;;  %2112 = vmatprep.subr.bf16.mxu1 %v8022_v3  ;;  %v8115_v2 = vld [vmem:[#allocation5 + $0x584] ss:$24 sps:$4 sm:$0xff]   ;;  %v8110_v3 = vld [vmem:[#allocation5 + $0x878] ss:$24 sps:$4 sm:$0xff]  }
 0x134   :  { %2198 = vmatprep.subr.bf16.mxu0 %v8025_v5  ;;  %v8113_v5 = vld [vmem:[#allocation5 + $0x580] ss:$24 sps:$4 sm:$0xff]  }
 0x136   :  { %2113 = vmatpush1.bf16.msra.mxu1 %v8020_v6  ;;  %v8118_v6 = vld [vmem:[#allocation5 + $0x8ac] ss:$24 sps:$4 sm:$0xff]  }
 0x137   :  { %2199 = vmatpush1.bf16.msra.mxu0 %v8023_v8  ;;  %2114 = vmatprep.subr.bf16.mxu1 %v8028_v9  ;;  %v8121_v8 = vld [vmem:[#allocation5 + $0x5b4] ss:$24 sps:$4 sm:$0xff]   ;;  %v8116_v9 = vld [vmem:[#allocation5 + $0x8a8] ss:$24 sps:$4 sm:$0xff]  }
 0x138   :  { %2200 = vmatprep.subr.bf16.mxu0 %v8031_v10  ;;  %v8119_v10 = vld [vmem:[#allocation5 + $0x5b0] ss:$24 sps:$4 sm:$0xff]  }
 0x13a   :  { %2115 = vmatpush1.bf16.msra.mxu1 %v8026_v12  ;;  %v8124_v12 = vld [vmem:[#allocation5 + $0x8dc] ss:$24 sps:$4 sm:$0xff]  }
 0x13b   :  { %2201 = vmatpush1.bf16.msra.mxu0 %v8029_v13  ;;  %2127 = vmatprep.subr.bf16.mxu1 %v8034_v14  ;;  %v8127_v13 = vld [vmem:[#allocation5 + $0x5e4] ss:$24 sps:$4 sm:$0xff]   ;;  %v8122_v14 = vld [vmem:[#allocation5 + $0x8d8] ss:$24 sps:$4 sm:$0xff]  }
 0x13c   :  { %2213 = vmatprep.subr.bf16.mxu0 %v8037_v15  ;;  %v8125_v15 = vld [vmem:[#allocation5 + $0x5e0] ss:$24 sps:$4 sm:$0xff]  }
 0x13d   :  { %2117 = vmatmul.mubr.bf16.vlgmr.msra.gmra.mrb[4].mxu1 %v9401_v7  ;;  %v8052_v7 = vld [vmem:[#allocation5 + $0x69c] ss:$24 sps:$4 sm:$0xff]  }
 0x13e   :  { %2203 = vmatmul.mubr.bf16.vlgmr.msra.gmra.mrb[4].mxu0 %v9399_v4  ;;  %2128 = vmatpush1.bf16.msra.mxu1 %v8032_v16  ;;  %v8055_v4 = vld [vmem:[#allocation5 + $0x3a4] ss:$24 sps:$4 sm:$0xff]   ;;  %v8130_v16 = vld [vmem:[#allocation5 + $0x614] ss:$24 sps:$4 sm:$0xff]  }
 0x13f   :  { %2214 = vmatpush1.bf16.msra.mxu0 %v8035_v17  ;;  %2129 = vmatprep.subr.bf16.mxu1 %v8040_v18  ;;  %v8154_v17 = vld [vmem:[#allocation8 + $0x4] ss:$24 sps:$4 sm:$0xff]  }
 0x140   :  { %2215 = vmatprep.subr.bf16.mxu0 %v8043_v19  ;;  %2159 = vmatprep.mubr.bf16.mxu1 %v9406_v34  ;;  %v8059_v34 = vld [vmem:[#allocation5 + $0x3d0] ss:$24 sps:$4 sm:$0xff]  }
 0x141   :  { %2245 = vmatprep.mubr.bf16.mxu0 %v9040_v24  ;;  %v8128_v18 = vld [vmem:[#allocation5 + $0x610] ss:$24 sps:$4 sm:$0xff]  }
 0x142   :  { %2130 = vmatpush1.bf16.msra.mxu1 %v8038_v20  ;;  %v8152_v19 = vld [vmem:[#allocation8] ss:$24 sps:$4 sm:$0xff]   ;;  %v8158_v24 = vld [vmem:[#allocation8 + $0x30] ss:$24 sps:$4 sm:$0xff]  }
 0x143   :  { %2216 = vmatpush1.bf16.msra.mxu0 %v8041_v21  ;;  %2131 = vmatprep.subr.bf16.mxu1 %v8046_v22  ;;  %v8133_v20 = vld [vmem:[#allocation5 + $0x644] ss:$24 sps:$4 sm:$0xff]   ;;  %v9041_v22 = vld [vmem:[#allocation2 + $0x8] ss:$24 sps:$4 sm:$0xff]  }
 0x144   :  { %2217 = vmatprep.subr.bf16.mxu0 %v8049_v23  ;;  %v8160_v21 = vld [vmem:[#allocation8 + $0x34] ss:$24 sps:$4 sm:$0xff]  }
 0x145   :  { %v8131_v23 = vld [vmem:[#allocation5 + $0x640] ss:$24 sps:$4 sm:$0xff]  }
 0x146   :  { %2132 = vmatpush1.bf16.msra.mxu1 %v8044_v25  ;;  %v8136_v25 = vld [vmem:[#allocation5 + $0x674] ss:$24 sps:$4 sm:$0xff]  }
 0x147   :  { %2218 = vmatpush1.bf16.msra.mxu0 %v8047_v26  ;;  %2133 = vmatprep.subr.bf16.mxu1 %v8052_v7  ;;  %v8166_v26 = vld [vmem:[#allocation8 + $0x64] ss:$24 sps:$4 sm:$0xff]  }
 0x148   :  { %2219 = vmatprep.subr.bf16.mxu0 %v8055_v4  ;;  %v9042_v7 = vld [vmem:[#allocation2 + $0x14] ss:$24 sps:$4 sm:$0xff]   ;;  %v8134_v4 = vld [vmem:[#allocation5 + $0x670] ss:$24 sps:$4 sm:$0xff]  }
 0x14a   :  { %2134 = vmatpush1.bf16.msra.mxu1 %v8050_v27  ;;  %v8139_v27 = vld [vmem:[#allocation5 + $0x6a4] ss:$24 sps:$4 sm:$0xff]  }
 0x14b   :  { %2220 = vmatpush1.bf16.msra.mxu0 %v8053_v28  ;;  %2135 = vmatprep.subr.bf16.mxu1 %v8058_v50  ;;  %v8164_v28 = vld [vmem:[#allocation8 + $0x60] ss:$24 sps:$4 sm:$0xff]  }
 0x14c   :  { %2221 = vmatprep.subr.bf16.mxu0 %v8061_v49  ;;  %v8137_v50 = vld [vmem:[#allocation5 + $0x6a0] ss:$24 sps:$4 sm:$0xff]   ;;  %v8142_v49 = vld [vmem:[#allocation5 + $0x6d4] ss:$24 sps:$4 sm:$0xff]  }
 0x14e   :  { %2136 = vmatpush1.bf16.msra.mxu1 %v8056_v29  ;;  %v8170_v29 = vld [vmem:[#allocation8 + $0x90] ss:$24 sps:$4 sm:$0xff]  }
 0x14f   :  { %2222 = vmatpush1.bf16.msra.mxu0 %v8059_v34  ;;  %2137 = vmatprep.subr.bf16.mxu1 %v8064_v30  ;;  %v8178_v34 = vld [vmem:[#allocation8 + $0xc4] ss:$24 sps:$4 sm:$0xff]  }
 0x150   :  { %2223 = vmatprep.subr.bf16.mxu0 %v8067_v31  ;;  %v8140_v30 = vld [vmem:[#allocation5 + $0x6d0] ss:$24 sps:$4 sm:$0xff]   ;;  %v8145_v31 = vld [vmem:[#allocation5 + $0x704] ss:$24 sps:$4 sm:$0xff]  }
 0x152   :  { %2138 = vmatpush1.bf16.msra.mxu1 %v8062_v32  ;;  %v8176_v32 = vld [vmem:[#allocation8 + $0xc0] ss:$24 sps:$4 sm:$0xff]  }
 0x153   :  { %2224 = vmatpush1.bf16.msra.mxu0 %v8065_v33  ;;  %2139 = vmatprep.subr.bf16.mxu1 %v8070_v35  ;;  %v8184_v33 = vld [vmem:[#allocation8 + $0xf4] ss:$24 sps:$4 sm:$0xff]  }
 0x154   :  { %2225 = vmatprep.subr.bf16.mxu0 %v8073_v36  ;;  %v8143_v35 = vld [vmem:[#allocation5 + $0x700] ss:$24 sps:$4 sm:$0xff]   ;;  %v8148_v36 = vld [vmem:[#allocation5 + $0x734] ss:$24 sps:$4 sm:$0xff]  }
 0x156   :  { %2140 = vmatpush1.bf16.msra.mxu1 %v8068_v37  ;;  %v8182_v37 = vld [vmem:[#allocation8 + $0xf0] ss:$24 sps:$4 sm:$0xff]  }
 0x157   :  { %2226 = vmatpush1.bf16.msra.mxu0 %v8071_v38  ;;  %2141 = vmatprep.subr.bf16.mxu1 %v8076_v39  ;;  %v8190_v38 = vld [vmem:[#allocation8 + $0x124] ss:$24 sps:$4 sm:$0xff]  }
 0x158   :  { %2227 = vmatprep.subr.bf16.mxu0 %v8079_v40 }
 0x15a   :  { %2142 = vmatpush1.bf16.msra.mxu1 %v8074_v41 }
 0x15b   :  { %2228 = vmatpush1.bf16.msra.mxu0 %v8077_v42  ;;  %2143 = vmatprep.subr.bf16.mxu1 %v8082_v43  ;;  %v8146_v42 = vld [vmem:[#allocation5 + $0x730] ss:$24 sps:$4 sm:$0xff]  }
 0x15c   :  { %2229 = vmatprep.subr.bf16.mxu0 %v8085_v44  ;;  %v8188_v43 = vld [vmem:[#allocation8 + $0x120] ss:$24 sps:$4 sm:$0xff]  }
 0x15e   :  { %2144 = vmatpush1.bf16.msra.mxu1 %v8080_v45  ;;  %v8151_v45 = vld [vmem:[#allocation5 + $0x764] ss:$24 sps:$4 sm:$0xff]  }
 0x15f   :  { %2230 = vmatpush1.bf16.msra.mxu0 %v8083_v46  ;;  %2145 = vmatprep.subr.bf16.mxu1 %v8088_v47  ;;  %v8196_v46 = vld [vmem:[#allocation8 + $0x154] ss:$24 sps:$4 sm:$0xff]  }
 0x160   :  { %2231 = vmatprep.subr.bf16.mxu0 %v8091_v48  ;;  %v8149_v47 = vld [vmem:[#allocation5 + $0x760] ss:$24 sps:$4 sm:$0xff]   ;;  %v8157_v48 = vld [vmem:[#allocation5 + $0x794] ss:$24 sps:$4 sm:$0xff]  }
 0x162   :  { %2146 = vmatpush1.bf16.msra.mxu1 %v8086_v51  ;;  %v8194_v51 = vld [vmem:[#allocation8 + $0x150] ss:$24 sps:$4 sm:$0xff]  }
 0x163   :  { %2232 = vmatpush1.bf16.msra.mxu0 %v8089_v52  ;;  %2147 = vmatprep.subr.bf16.mxu1 %v8094_v53  ;;  %v8202_v52 = vld [vmem:[#allocation8 + $0x184] ss:$24 sps:$4 sm:$0xff]  }
 0x164   :  { %2233 = vmatprep.subr.bf16.mxu0 %v8097_v54  ;;  %v8155_v53 = vld [vmem:[#allocation5 + $0x790] ss:$24 sps:$4 sm:$0xff]   ;;  %v8163_v54 = vld [vmem:[#allocation5 + $0x7c4] ss:$24 sps:$4 sm:$0xff]  }
 0x166   :  { %2148 = vmatpush1.bf16.msra.mxu1 %v8092_v55  ;;  %v8200_v55 = vld [vmem:[#allocation8 + $0x180] ss:$24 sps:$4 sm:$0xff]  }
 0x167   :  { %2234 = vmatpush1.bf16.msra.mxu0 %v8095_v56  ;;  %2149 = vmatprep.subr.bf16.mxu1 %v8100_v57  ;;  %v8208_v56 = vld [vmem:[#allocation8 + $0x1b4] ss:$24 sps:$4 sm:$0xff]  }
 0x168   :  { %2235 = vmatprep.subr.bf16.mxu0 %v8103_v58  ;;  %v8161_v57 = vld [vmem:[#allocation5 + $0x7c0] ss:$24 sps:$4 sm:$0xff]   ;;  %v8169_v58 = vld [vmem:[#allocation5 + $0x7f4] ss:$24 sps:$4 sm:$0xff]  }
 0x16a   :  { %2150 = vmatpush1.bf16.msra.mxu1 %v8098_v59  ;;  %v8206_v59 = vld [vmem:[#allocation8 + $0x1b0] ss:$24 sps:$4 sm:$0xff]  }
 0x16b   :  { %2236 = vmatpush1.bf16.msra.mxu0 %v8101_v60  ;;  %2151 = vmatprep.subr.bf16.mxu1 %v8106_v61  ;;  %v8214_v60 = vld [vmem:[#allocation8 + $0x1e4] ss:$24 sps:$4 sm:$0xff]  }
 0x16c   :  { %2237 = vmatprep.subr.bf16.mxu0 %v8109_v62  ;;  %v8167_v61 = vld [vmem:[#allocation5 + $0x7f0] ss:$24 sps:$4 sm:$0xff]   ;;  %v8175_v62 = vld [vmem:[#allocation5 + $0x824] ss:$24 sps:$4 sm:$0xff]  }
 0x16e   :  { %2152 = vmatpush1.bf16.msra.mxu1 %v8104_v63  ;;  %v8212_v63 = vld [vmem:[#allocation8 + $0x1e0] ss:$24 sps:$4 sm:$0xff]  }
 0x16f   :  { %2238 = vmatpush1.bf16.msra.mxu0 %v8107_v0  ;;  %2153 = vmatprep.subr.bf16.mxu1 %v8112_v1  ;;  %v8220_v0 = vld [vmem:[#allocation8 + $0x214] ss:$24 sps:$4 sm:$0xff]  }
 0x170   :  { %2239 = vmatprep.subr.bf16.mxu0 %v8115_v2  ;;  %v8173_v1 = vld [vmem:[#allocation5 + $0x820] ss:$24 sps:$4 sm:$0xff]   ;;  %v8181_v2 = vld [vmem:[#allocation5 + $0x854] ss:$24 sps:$4 sm:$0xff]  }
 0x172   :  { %2154 = vmatpush1.bf16.msra.mxu1 %v8110_v3  ;;  %v8218_v3 = vld [vmem:[#allocation8 + $0x210] ss:$24 sps:$4 sm:$0xff]  }
 0x173   :  { %2240 = vmatpush1.bf16.msra.mxu0 %v8113_v5  ;;  %2155 = vmatprep.subr.bf16.mxu1 %v8118_v6  ;;  %v8226_v5 = vld [vmem:[#allocation8 + $0x244] ss:$24 sps:$4 sm:$0xff]  }
 0x174   :  { %2241 = vmatprep.subr.bf16.mxu0 %v8121_v8  ;;  %v8179_v6 = vld [vmem:[#allocation5 + $0x850] ss:$24 sps:$4 sm:$0xff]   ;;  %v8187_v8 = vld [vmem:[#allocation5 + $0x884] ss:$24 sps:$4 sm:$0xff]  }
 0x176   :  { %2156 = vmatpush1.bf16.msra.mxu1 %v8116_v9  ;;  %v8224_v9 = vld [vmem:[#allocation8 + $0x240] ss:$24 sps:$4 sm:$0xff]  }
 0x177   :  { %2242 = vmatpush1.bf16.msra.mxu0 %v8119_v10  ;;  %2157 = vmatprep.subr.bf16.mxu1 %v8124_v12  ;;  %v8232_v10 = vld [vmem:[#allocation8 + $0x274] ss:$24 sps:$4 sm:$0xff]  }
 0x178   :  { %2243 = vmatprep.subr.bf16.mxu0 %v8127_v13  ;;  %v8185_v12 = vld [vmem:[#allocation5 + $0x880] ss:$24 sps:$4 sm:$0xff]   ;;  %v8193_v13 = vld [vmem:[#allocation5 + $0x8b4] ss:$24 sps:$4 sm:$0xff]  }
 0x17a   :  { %2158 = vmatpush1.bf16.msra.mxu1 %v8122_v14  ;;  %v8230_v14 = vld [vmem:[#allocation8 + $0x270] ss:$24 sps:$4 sm:$0xff]  }
 0x17b   :  { %2244 = vmatpush1.bf16.msra.mxu0 %v8125_v15  ;;  %4101 = vmatprep.subr.bf16.mxu1 %v8154_v17  ;;  %v8238_v15 = vld [vmem:[#allocation8 + $0x2a4] ss:$24 sps:$4 sm:$0xff]   ;;  %v8236_v17 = vld [vmem:[#allocation8 + $0x2a0] ss:$24 sps:$4 sm:$0xff]  }
 0x17c   :  { %2256 = vmatprep.subr.bf16.mxu0 %v8130_v16  ;;  %v8191_v16 = vld [vmem:[#allocation5 + $0x8b0] ss:$24 sps:$4 sm:$0xff]  }
 0x17d   :  { %2160 = vmatmul.mubr.bf16.vlgmr.msra.gmra.mrb[4].mxu1 %v9409_v11  ;;  %v8172_v11 = vld [vmem:[#allocation8 + $0x94] ss:$24 sps:$4 sm:$0xff]  }
 0x17e   :  { %2246 = vmatmul.mubr.bf16.vlgmr.msra.gmra.mrb[4].mxu0 %v9041_v22  ;;  %4102 = vmatpush1.bf16.msra.mxu1 %v8152_v19  ;;  %v8244_v19 = vld [vmem:[#allocation8 + $0x2d4] ss:$24 sps:$4 sm:$0xff]  }
 0x17f   :  { %2257 = vmatpush1.bf16.msra.mxu0 %v8128_v18  ;;  %4103 = vmatprep.subr.bf16.mxu1 %v8160_v21  ;;  %v8199_v18 = vld [vmem:[#allocation5 + $0x8e4] ss:$24 sps:$4 sm:$0xff]   ;;  %v8242_v21 = vld [vmem:[#allocation8 + $0x2d0] ss:$24 sps:$4 sm:$0xff]   ;;  %v8205_v22 = vld [vmem:[#allocation8 + $0xc] ss:$24 sps:$4 sm:$0xff]  }
 0x180   :  { %2258 = vmatprep.subr.bf16.mxu0 %v8133_v20  ;;  %2288 = vmatprep.mubr.bf16.mxu0 %v9042_v7  ;;  %v8197_v20 = vld [vmem:[#allocation5 + $0x8e0] ss:$24 sps:$4 sm:$0xff]  }
 0x181   :  { %v9043_v7 = vld [vmem:[#allocation2 + $0x10] ss:$24 sps:$4 sm:$0xff]  }
 0x182   :  { %4104 = vmatpush1.bf16.msra.mxu1 %v8158_v24  ;;  %v8203_v24 = vld [vmem:[#allocation8 + $0x8] ss:$24 sps:$4 sm:$0xff]  }
 0x183   :  { %2259 = vmatpush1.bf16.msra.mxu0 %v8131_v23  ;;  %4105 = vmatprep.subr.bf16.mxu1 %v8166_v26  ;;  %v8274_v23 = vld [vmem:[#allocation8 + $0x304] ss:$24 sps:$4 sm:$0xff]   ;;  %v8209_v26 = vld [vmem:[#allocation8 + $0x38] ss:$24 sps:$4 sm:$0xff]  }
 0x184   :  { %2260 = vmatprep.subr.bf16.mxu0 %v8136_v25  ;;  %v8211_v25 = vld [vmem:[#allocation8 + $0x3c] ss:$24 sps:$4 sm:$0xff]  }
 0x186   :  { %4106 = vmatpush1.bf16.msra.mxu1 %v8164_v28  ;;  %v8215_v28 = vld [vmem:[#allocation8 + $0x68] ss:$24 sps:$4 sm:$0xff]  }
 0x187   :  { %2261 = vmatpush1.bf16.msra.mxu0 %v8134_v4  ;;  %4107 = vmatprep.subr.bf16.mxu1 %v8172_v11  ;;  %v8217_v4 = vld [vmem:[#allocation8 + $0x6c] ss:$24 sps:$4 sm:$0xff]   ;;  %v8223_v11 = vld [vmem:[#allocation8 + $0x9c] ss:$24 sps:$4 sm:$0xff]  }
 0x188   :  { %2262 = vmatprep.subr.bf16.mxu0 %v8139_v27  ;;  %v412_v27 = vlaneseq }
 0x18a   :  { %4108 = vmatpush1.bf16.msra.mxu1 %v8170_v29  ;;  %v8229_v29 = vld [vmem:[#allocation8 + $0xcc] ss:$24 sps:$4 sm:$0xff]  }
 0x18b   :  { %2263 = vmatpush1.bf16.msra.mxu0 %v8137_v50  ;;  %4109 = vmatprep.subr.bf16.mxu1 %v8178_v34  ;;  %v9427_v50 = vshrl.u32 %v412_v27, 7  ;;  %v9429_v34 = vld [vmem:[#allocation7] sm:$0x3f]  ;;  %v8268_v27 = vld [vmem:[#allocation8 + $0x2ac] ss:$24 sps:$4 sm:$0xff]  }
 0x18c   :  { %2264 = vmatprep.subr.bf16.mxu0 %v8142_v49  ;;  %v8221_v49 = vld [vmem:[#allocation8 + $0x98] ss:$24 sps:$4 sm:$0xff]  }
 0x18e   :  { %4110 = vmatpush1.bf16.msra.mxu1 %v8176_v32  ;;  %v8227_v32 = vld [vmem:[#allocation8 + $0xc8] ss:$24 sps:$4 sm:$0xff]  }
 0x18f   :  { %2265 = vmatpush1.bf16.msra.mxu0 %v8140_v30  ;;  %4111 = vmatprep.subr.bf16.mxu1 %v8184_v33  ;;  %v9432_v30 = vsub.s32 0, %v9427_v50  ;;  %v8235_v33 = vld [vmem:[#allocation8 + $0xfc] ss:$24 sps:$4 sm:$0xff]  }
 0x190   :  { %2266 = vmatprep.subr.bf16.mxu0 %v8145_v31  ;;  %v9419_v39 = vpop.f32.mrb[0].mxu1  ;;  %v9435_v31 = vsub.s32 1, %v9427_v50 }
 0x191   :  { %v9421_v40 = vpop.f32.mrb[1].mxu1 }
 0x192   :  { %v9423_v41 = vpop.f32.mrb[2].mxu1  ;;  %4112 = vmatpush1.bf16.msra.mxu1 %v8182_v37  ;;  %v8233_v37 = vld [vmem:[#allocation8 + $0xf8] ss:$24 sps:$4 sm:$0xff]  }
 0x193   :  { %2267 = vmatpush1.bf16.msra.mxu0 %v8143_v35  ;;  %v9425_v44 = vpop.f32.mrb[3].mxu1  ;;  %4113 = vmatprep.subr.bf16.mxu1 %v8190_v38  ;;  %v415_v35 = vrot.slane %v9429_v34, %v9432_v30 }
 0x194   :  { %2268 = vmatprep.subr.bf16.mxu0 %v8148_v36  ;;  %v419_v36 = vrot.slane %v9429_v34, %v9435_v31 }
 0x195   :  { %v1947_v38 = vadd.f32 %v9419_v39, %v415_v35  ;;  %v8247_v39 = vld [vmem:[#allocation8 + $0x15c] ss:$24 sps:$4 sm:$0xff]  }
 0x196   :  { %4114 = vmatpush1.bf16.msra.mxu1 %v8188_v43  ;;  %v1949_v43 = vadd.f32 %v9421_v40, %v419_v36 }
 0x197   :  { %2269 = vmatpush1.bf16.msra.mxu0 %v8146_v42  ;;  %4115 = vmatprep.subr.bf16.mxu1 %v8196_v46  ;;  %v8241_v42 = vld [vmem:[#allocation8 + $0x12c] ss:$24 sps:$4 sm:$0xff]   ;;  %v1951_v46 = vadd.f32 %v9423_v41, %v415_v35 }
 0x198   :  { %2270 = vmatprep.subr.bf16.mxu0 %v8151_v45  ;;  %v8322_v35 = vld [vmem:[#allocation8 + $0x484] ss:$24 sps:$4 sm:$0xff]  }
 0x19a   :  { %4116 = vmatpush1.bf16.msra.mxu1 %v8194_v51  ;;  %v1953_v51 = vadd.f32 %v9425_v44, %v419_v36  ;;  %v8277_v36 = vld [vmem:[#allocation8 + $0x30c] ss:$24 sps:$4 sm:$0xff]  }
 0x19b   :  { %2271 = vmatpush1.bf16.msra.mxu0 %v8149_v47  ;;  %4117 = vmatprep.subr.bf16.mxu1 %v8202_v52 }
 0x19c   :  { %2272 = vmatprep.subr.bf16.mxu0 %v8157_v48 }
 0x19e   :  { %4118 = vmatpush1.bf16.msra.mxu1 %v8200_v55 }
 0x19f   :  { %2273 = vmatpush1.bf16.msra.mxu0 %v8155_v53  ;;  %4119 = vmatprep.subr.bf16.mxu1 %v8208_v56 }
 0x1a0   :  { %2274 = vmatprep.subr.bf16.mxu0 %v8163_v54  ;;  %v8239_v54 = vld [vmem:[#allocation8 + $0x128] ss:$24 sps:$4 sm:$0xff]  }
 0x1a2   :  { %4120 = vmatpush1.bf16.msra.mxu1 %v8206_v59 }
 0x1a3   :  { %2275 = vmatpush1.bf16.msra.mxu0 %v8161_v57  ;;  %4121 = vmatprep.subr.bf16.mxu1 %v8214_v60  ;;  %v8245_v60 = vld [vmem:[#allocation8 + $0x158] ss:$24 sps:$4 sm:$0xff]  }
 0x1a4   :  { %2276 = vmatprep.subr.bf16.mxu0 %v8169_v58 }
 0x1a6   :  { %4122 = vmatpush1.bf16.msra.mxu1 %v8212_v63 }
 0x1a7   :  { %2277 = vmatpush1.bf16.msra.mxu0 %v8167_v61  ;;  %4123 = vmatprep.subr.bf16.mxu1 %v8220_v0 }
 0x1a8   :  { %2278 = vmatprep.subr.bf16.mxu0 %v8175_v62  ;;  %v8250_v62 = vld [vmem:[#allocation8 + $0x18c] ss:$24 sps:$4 sm:$0xff]  }
 0x1aa   :  { %4124 = vmatpush1.bf16.msra.mxu1 %v8218_v3 }
 0x1ab   :  { %2279 = vmatpush1.bf16.msra.mxu0 %v8173_v1  ;;  %4125 = vmatprep.subr.bf16.mxu1 %v8226_v5  ;;  %v8272_v5 = vld [vmem:[#allocation8 + $0x300] ss:$24 sps:$4 sm:$0xff]  }
 0x1ac   :  { %2280 = vmatprep.subr.bf16.mxu0 %v8181_v2  ;;  %v8248_v2 = vld [vmem:[#allocation8 + $0x188] ss:$24 sps:$4 sm:$0xff]  }
 0x1ae   :  { %4126 = vmatpush1.bf16.msra.mxu1 %v8224_v9  ;;  %v8251_v9 = vld [vmem:[#allocation8 + $0x1b8] ss:$24 sps:$4 sm:$0xff]  }
 0x1af   :  { %2281 = vmatpush1.bf16.msra.mxu0 %v8179_v6  ;;  %4127 = vmatprep.subr.bf16.mxu1 %v8232_v10  ;;  %v8280_v6 = vld [vmem:[#allocation8 + $0x334] ss:$24 sps:$4 sm:$0xff]   ;;  %v8278_v10 = vld [vmem:[#allocation8 + $0x330] ss:$24 sps:$4 sm:$0xff]  }
 0x1b0   :  { %2282 = vmatprep.subr.bf16.mxu0 %v8187_v8  ;;  %v8253_v8 = vld [vmem:[#allocation8 + $0x1bc] ss:$24 sps:$4 sm:$0xff]  }
 0x1b2   :  { %4128 = vmatpush1.bf16.msra.mxu1 %v8230_v14  ;;  %v8254_v14 = vld [vmem:[#allocation8 + $0x1e8] ss:$24 sps:$4 sm:$0xff]  }
 0x1b3   :  { %2283 = vmatpush1.bf16.msra.mxu0 %v8185_v12  ;;  %4129 = vmatprep.subr.bf16.mxu1 %v8238_v15  ;;  %v8286_v12 = vld [vmem:[#allocation8 + $0x364] ss:$24 sps:$4 sm:$0xff]   ;;  %v8284_v15 = vld [vmem:[#allocation8 + $0x360] ss:$24 sps:$4 sm:$0xff]  }
 0x1b4   :  { %2284 = vmatprep.subr.bf16.mxu0 %v8193_v13  ;;  %v8256_v13 = vld [vmem:[#allocation8 + $0x1ec] ss:$24 sps:$4 sm:$0xff]  }
 0x1b6   :  { %4130 = vmatpush1.bf16.msra.mxu1 %v8236_v17  ;;  %v8259_v17 = vld [vmem:[#allocation8 + $0x21c] ss:$24 sps:$4 sm:$0xff]  }
 0x1b7   :  { %2285 = vmatpush1.bf16.msra.mxu0 %v8191_v16  ;;  %4131 = vmatprep.subr.bf16.mxu1 %v8244_v19  ;;  %v8292_v16 = vld [vmem:[#allocation8 + $0x394] ss:$24 sps:$4 sm:$0xff]   ;;  %v8290_v19 = vld [vmem:[#allocation8 + $0x390] ss:$24 sps:$4 sm:$0xff]  }
 0x1b8   :  { %2286 = vmatprep.subr.bf16.mxu0 %v8199_v18  ;;  %v8257_v18 = vld [vmem:[#allocation8 + $0x218] ss:$24 sps:$4 sm:$0xff]  }
 0x1ba   :  { %4132 = vmatpush1.bf16.msra.mxu1 %v8242_v21  ;;  %v8262_v21 = vld [vmem:[#allocation8 + $0x24c] ss:$24 sps:$4 sm:$0xff]  }
 0x1bb   :  { %2287 = vmatpush1.bf16.msra.mxu0 %v8197_v20  ;;  %4144 = vmatprep.subr.bf16.mxu1 %v8274_v23  ;;  %v8298_v20 = vld [vmem:[#allocation8 + $0x3c4] ss:$24 sps:$4 sm:$0xff]   ;;  %v8296_v23 = vld [vmem:[#allocation8 + $0x3c0] ss:$24 sps:$4 sm:$0xff]  }
 0x1bc   :  { %4230 = vmatprep.subr.bf16.mxu0 %v8205_v22  ;;  %v8260_v22 = vld [vmem:[#allocation8 + $0x248] ss:$24 sps:$4 sm:$0xff]  }
 0x1be   :  { %2289 = vmatmul.mubr.bf16.vlgmr.msra.gmra.mrb[4].mxu0 %v9043_v7  ;;  %v8302_v7 = vld [vmem:[#allocation8 + $0x3f0] ss:$24 sps:$4 sm:$0xff]  }
 0x1bf   :  { %4231 = vmatpush1.bf16.msra.mxu0 %v8203_v24  ;;  %v8304_v24 = vld [vmem:[#allocation8 + $0x3f4] ss:$24 sps:$4 sm:$0xff]  }
 0x1c0   :  { %4232 = vmatprep.subr.bf16.mxu0 %v8211_v25  ;;  %v8265_v25 = vld [vmem:[#allocation8 + $0x27c] ss:$24 sps:$4 sm:$0xff]  }
 0x1c3   :  { %4233 = vmatpush1.bf16.msra.mxu0 %v8209_v26  ;;  %v8263_v26 = vld [vmem:[#allocation8 + $0x278] ss:$24 sps:$4 sm:$0xff]  }
 0x1c4   :  { %4234 = vmatprep.subr.bf16.mxu0 %v8217_v4  ;;  %v8310_v4 = vld [vmem:[#allocation8 + $0x424] ss:$24 sps:$4 sm:$0xff]  }
 0x1c7   :  { %4235 = vmatpush1.bf16.msra.mxu0 %v8215_v28  ;;  %v8266_v28 = vld [vmem:[#allocation8 + $0x2a8] ss:$24 sps:$4 sm:$0xff]  }
 0x1c8   :  { %4236 = vmatprep.subr.bf16.mxu0 %v8223_v11  ;;  %v8308_v11 = vld [vmem:[#allocation8 + $0x420] ss:$24 sps:$4 sm:$0xff]  }
 0x1cb   :  { %4237 = vmatpush1.bf16.msra.mxu0 %v8221_v49  ;;  %v8316_v49 = vld [vmem:[#allocation8 + $0x454] ss:$24 sps:$4 sm:$0xff]  }
 0x1cc   :  { %4238 = vmatprep.subr.bf16.mxu0 %v8229_v29  ;;  %v8271_v29 = vld [vmem:[#allocation8 + $0x2dc] ss:$24 sps:$4 sm:$0xff]  }
 0x1cf   :  { %4239 = vmatpush1.bf16.msra.mxu0 %v8227_v32  ;;  %v8269_v32 = vld [vmem:[#allocation8 + $0x2d8] ss:$24 sps:$4 sm:$0xff]  }
 0x1d0   :  { %4240 = vmatprep.subr.bf16.mxu0 %v8235_v33  ;;  %v8314_v33 = vld [vmem:[#allocation8 + $0x450] ss:$24 sps:$4 sm:$0xff]  }
 0x1d1   :  { %v2032_v45 = vpop.f32.mrb[0].mxu0 }
 0x1d2   :  { %v7616_v47 = vadd.f32 %v2032_v45, %v1947_v38  ;;  %v2034_v48 = vpop.f32.mrb[1].mxu0  ;;  %v8320_v38 = vld [vmem:[#allocation8 + $0x480] ss:$24 sps:$4 sm:$0xff]  }
 0x1d3   :  { %v7618_v52 = vadd.f32 %v2034_v48, %v1949_v43  ;;  %v2036_v53 = vpop.f32.mrb[2].mxu0  ;;  %4241 = vmatpush1.bf16.msra.mxu0 %v8233_v37  ;;  %v8275_v37 = vld [vmem:[#allocation8 + $0x308] ss:$24 sps:$4 sm:$0xff]   ;;  %v8283_v43 = vld [vmem:[#allocation8 + $0x33c] ss:$24 sps:$4 sm:$0xff]  }
 0x1d4   :  { %v2311_v55 = vmul.f32 0.01, %v7616_v47  ;;  %v7620_v56 = vadd.f32 %v2036_v53, %v1951_v46  ;;  %v2038_v57 = vpop.f32.mrb[3].mxu0  ;;  %4242 = vmatprep.subr.bf16.mxu0 %v8241_v42  ;;  %vm2299_vm0 = vcmp.ge.f32.partialorder %v7616_v47, 0.0  ;;  %v8328_v42 = vld [vmem:[#allocation8 + $0x4b4] ss:$24 sps:$4 sm:$0xff]  }
 0x1d5   :  { %v2312_v58 = vmul.f32 0.01, %v7618_v52  ;;  %v7622_v59 = vadd.f32 %v2038_v57, %v1953_v51  ;;  %vm2300_vm1 = vcmp.ge.f32.partialorder %v7618_v52, 0.0  ;;  %v8281_v45 = vld [vmem:[#allocation8 + $0x338] ss:$24 sps:$4 sm:$0xff]  }
 0x1d6   :  { %vm2305_vm2 = vcmp.ge.f32.partialorder %v7620_v56, 0.0  ;;  %v2317_v40 = vmul.f32 0.01, %v7620_v56  ;;  %v2323_v44 = vsel %vm2299_vm0, %v7616_v47, %v2311_v55  ;;  %v8326_v46 = vld [vmem:[#allocation8 + $0x4b0] ss:$24 sps:$4 sm:$0xff]  }
 0x1d7   :  { %vm2306_vm3 = vcmp.ge.f32.partialorder %v7622_v59, 0.0  ;;  %v2318_v41 = vmul.f32 0.01, %v7622_v59  ;;  %4243 = vmatpush1.bf16.msra.mxu0 %v8239_v54  ;;  %v2324_v0 = vsel %vm2300_vm1, %v7618_v52, %v2312_v58  ;;  %v8334_v47 = vld [vmem:[#allocation8 + $0x4e4] ss:$24 sps:$4 sm:$0xff]  }
 0x1d8   :  { %v2329_v61 = vsel %vm2305_vm2, %v7620_v56, %v2317_v40  ;;  %4244 = vmatprep.subr.bf16.mxu0 %v8247_v39  ;;  %v8289_v48 = vld [vmem:[#allocation8 + $0x36c] ss:$24 sps:$4 sm:$0xff]   ;;  %v8287_v51 = vld [vmem:[#allocation8 + $0x368] ss:$24 sps:$4 sm:$0xff]   ;;  %v8295_v54 = vld [vmem:[#allocation8 + $0x39c] ss:$24 sps:$4 sm:$0xff]  }
 0x1d9   :  { %v9445_v63 = vpack.c.bf16 %v2329_v61, %v2323_v44  ;;  %v2330_v1 = vsel %vm2306_vm3, %v7622_v59, %v2318_v41  ;;  %v8332_v52 = vld [vmem:[#allocation8 + $0x4e0] ss:$24 sps:$4 sm:$0xff]   ;;  %v8340_v53 = vld [vmem:[#allocation8 + $0x514] ss:$24 sps:$4 sm:$0xff]   ;;  %v8338_v56 = vld [vmem:[#allocation8 + $0x510] ss:$24 sps:$4 sm:$0xff]  }
 0x1da   :  { %v9447_v3 = vpack.c.bf16 %v2330_v1, %v2324_v0  ;;  %v8293_v55 = vld [vmem:[#allocation8 + $0x398] ss:$24 sps:$4 sm:$0xff]   ;;  %v8346_v57 = vld [vmem:[#allocation8 + $0x544] ss:$24 sps:$4 sm:$0xff]   ;;  %v8299_v58 = vld [vmem:[#allocation8 + $0x3c8] ss:$24 sps:$4 sm:$0xff]  }
 0x1db   :  { %4245 = vmatpush1.bf16.msra.mxu0 %v8245_v60  ;;  %v8301_v39 = vld [vmem:[#allocation8 + $0x3cc] ss:$24 sps:$4 sm:$0xff]   ;;  %v8344_v59 = vld [vmem:[#allocation8 + $0x540] ss:$24 sps:$4 sm:$0xff]   ;;  %v8307_v41 = vld [vmem:[#allocation8 + $0x3fc] ss:$24 sps:$4 sm:$0xff]  }
 0x1dc   :  { %4133 = vmatprep.mubr.bf16.mxu1 %v9447_v3  ;;  %4262 = vmatprep.mubr.bf16.mxu0 %v9447_v3  ;;  %v8352_v40 = vld [vmem:[#allocation8 + $0x574] ss:$24 sps:$4 sm:$0xff]   ;;  %v8305_v60 = vld [vmem:[#allocation8 + $0x3f8] ss:$24 sps:$4 sm:$0xff]   ;;  %v8358_v61 = vld [vmem:[#allocation8 + $0x5a4] ss:$24 sps:$4 sm:$0xff]  }
 0x1dd   :  { %4134 = vmatmul.mubr.bf16.vlgmr.msra.gmra.mrb[8].mxu1 %v9445_v63  ;;  %4246 = vmatprep.subr.bf16.mxu0 %v8250_v62  ;;  %v8350_v44 = vld [vmem:[#allocation8 + $0x570] ss:$24 sps:$4 sm:$0xff]   ;;  %v8313_v62 = vld [vmem:[#allocation8 + $0x42c] ss:$24 sps:$4 sm:$0xff]   ;;  %v8356_v1 = vld [vmem:[#allocation8 + $0x5a0] ss:$24 sps:$4 sm:$0xff]  }
 0x1de   :  { %4145 = vmatpush1.bf16.msra.mxu1 %v8272_v5  ;;  %v8311_v0 = vld [vmem:[#allocation8 + $0x428] ss:$24 sps:$4 sm:$0xff]   ;;  %v8319_v5 = vld [vmem:[#allocation8 + $0x45c] ss:$24 sps:$4 sm:$0xff]  }
 0x1df   :  { %4247 = vmatpush1.bf16.msra.mxu0 %v8248_v2  ;;  %4146 = vmatprep.subr.bf16.mxu1 %v8280_v6  ;;  %v8364_v2 = vld [vmem:[#allocation8 + $0x5d4] ss:$24 sps:$4 sm:$0xff]   ;;  %v8317_v6 = vld [vmem:[#allocation8 + $0x458] ss:$24 sps:$4 sm:$0xff]  }
 0x1e0   :  { %4248 = vmatprep.subr.bf16.mxu0 %v8253_v8  ;;  %v8362_v8 = vld [vmem:[#allocation8 + $0x5d0] ss:$24 sps:$4 sm:$0xff]  }
 0x1e2   :  { %4147 = vmatpush1.bf16.msra.mxu1 %v8278_v10  ;;  %v8325_v10 = vld [vmem:[#allocation8 + $0x48c] ss:$24 sps:$4 sm:$0xff]  }
 0x1e3   :  { %4249 = vmatpush1.bf16.msra.mxu0 %v8251_v9  ;;  %4148 = vmatprep.subr.bf16.mxu1 %v8286_v12  ;;  %v8370_v9 = vld [vmem:[#allocation8 + $0x604] ss:$24 sps:$4 sm:$0xff]   ;;  %v8323_v12 = vld [vmem:[#allocation8 + $0x488] ss:$24 sps:$4 sm:$0xff]  }
 0x1e4   :  { %4250 = vmatprep.subr.bf16.mxu0 %v8256_v13  ;;  %v8331_v13 = vld [vmem:[#allocation8 + $0x4bc] ss:$24 sps:$4 sm:$0xff]  }
 0x1e6   :  { %4149 = vmatpush1.bf16.msra.mxu1 %v8284_v15  ;;  %v8337_v15 = vld [vmem:[#allocation8 + $0x4ec] ss:$24 sps:$4 sm:$0xff]  }
 0x1e7   :  { %4251 = vmatpush1.bf16.msra.mxu0 %v8254_v14  ;;  %4150 = vmatprep.subr.bf16.mxu1 %v8292_v16  ;;  %v8329_v14 = vld [vmem:[#allocation8 + $0x4b8] ss:$24 sps:$4 sm:$0xff]   ;;  %v8335_v16 = vld [vmem:[#allocation8 + $0x4e8] ss:$24 sps:$4 sm:$0xff]  }
 0x1e8   :  { %4252 = vmatprep.subr.bf16.mxu0 %v8259_v17  ;;  %v8343_v17 = vld [vmem:[#allocation8 + $0x51c] ss:$24 sps:$4 sm:$0xff]  }
 0x1ea   :  { %4151 = vmatpush1.bf16.msra.mxu1 %v8290_v19  ;;  %v8349_v19 = vld [vmem:[#allocation8 + $0x54c] ss:$24 sps:$4 sm:$0xff]  }
 0x1eb   :  { %4253 = vmatpush1.bf16.msra.mxu0 %v8257_v18  ;;  %4152 = vmatprep.subr.bf16.mxu1 %v8298_v20  ;;  %v8341_v18 = vld [vmem:[#allocation8 + $0x518] ss:$24 sps:$4 sm:$0xff]   ;;  %v8347_v20 = vld [vmem:[#allocation8 + $0x548] ss:$24 sps:$4 sm:$0xff]  }
 0x1ec   :  { %4254 = vmatprep.subr.bf16.mxu0 %v8262_v21  ;;  %v8355_v21 = vld [vmem:[#allocation8 + $0x57c] ss:$24 sps:$4 sm:$0xff]  }
 0x1ee   :  { %4153 = vmatpush1.bf16.msra.mxu1 %v8296_v23  ;;  %v8361_v23 = vld [vmem:[#allocation8 + $0x5ac] ss:$24 sps:$4 sm:$0xff]  }
 0x1ef   :  { %4255 = vmatpush1.bf16.msra.mxu0 %v8260_v22  ;;  %4154 = vmatprep.subr.bf16.mxu1 %v8304_v24  ;;  %v8353_v22 = vld [vmem:[#allocation8 + $0x578] ss:$24 sps:$4 sm:$0xff]   ;;  %v8359_v24 = vld [vmem:[#allocation8 + $0x5a8] ss:$24 sps:$4 sm:$0xff]  }
 0x1f0   :  { %4256 = vmatprep.subr.bf16.mxu0 %v8265_v25  ;;  %v8367_v25 = vld [vmem:[#allocation8 + $0x5dc] ss:$24 sps:$4 sm:$0xff]  }
 0x1f2   :  { %4155 = vmatpush1.bf16.msra.mxu1 %v8302_v7  ;;  %v8373_v7 = vld [vmem:[#allocation8 + $0x60c] ss:$24 sps:$4 sm:$0xff]  }
 0x1f3   :  { %4257 = vmatpush1.bf16.msra.mxu0 %v8263_v26  ;;  %4156 = vmatprep.subr.bf16.mxu1 %v8310_v4  ;;  %v8365_v26 = vld [vmem:[#allocation8 + $0x5d8] ss:$24 sps:$4 sm:$0xff]   ;;  %v9454_v4 = vsub.s32 2, %v9427_v50 }
 0x1f4   :  { %4258 = vmatprep.subr.bf16.mxu0 %v8268_v27  ;;  %v9457_v27 = vsub.s32 3, %v9427_v50 }
 0x1f6   :  { %4157 = vmatpush1.bf16.msra.mxu1 %v8308_v11  ;;  %v427_v11 = vrot.slane %v9429_v34, %v9457_v27 }
 0x1f7   :  { %4259 = vmatpush1.bf16.msra.mxu0 %v8266_v28  ;;  %4158 = vmatprep.subr.bf16.mxu1 %v8316_v49  ;;  %v423_v28 = vrot.slane %v9429_v34, %v9454_v4 }
 0x1f8   :  { %4260 = vmatprep.subr.bf16.mxu0 %v8271_v29 }
 0x1fa   :  { %4159 = vmatpush1.bf16.msra.mxu1 %v8314_v33 }
 0x1fb   :  { %4261 = vmatpush1.bf16.msra.mxu0 %v8269_v32  ;;  %4160 = vmatprep.subr.bf16.mxu1 %v8322_v35 }
 0x1fc   :  { %4273 = vmatprep.subr.bf16.mxu0 %v8277_v36 }
 0x1fe   :  { %4263 = vmatmul.mubr.bf16.vlgmr.msra.gmra.mrb[8].mxu0 %v9445_v63  ;;  %4161 = vmatpush1.bf16.msra.mxu1 %v8320_v38 }
 0x1ff   :  { %4274 = vmatpush1.bf16.msra.mxu0 %v8275_v37  ;;  %4162 = vmatprep.subr.bf16.mxu1 %v8328_v42 }
 0x200   :  { %4275 = vmatprep.subr.bf16.mxu0 %v8283_v43 }
 0x202   :  { %4163 = vmatpush1.bf16.msra.mxu1 %v8326_v46 }
 0x203   :  { %4276 = vmatpush1.bf16.msra.mxu0 %v8281_v45  ;;  %4164 = vmatprep.subr.bf16.mxu1 %v8334_v47 }
 0x204   :  { %4277 = vmatprep.subr.bf16.mxu0 %v8289_v48 }
 0x206   :  { %4165 = vmatpush1.bf16.msra.mxu1 %v8332_v52 }
 0x207   :  { %4278 = vmatpush1.bf16.msra.mxu0 %v8287_v51  ;;  %4166 = vmatprep.subr.bf16.mxu1 %v8340_v53 }
 0x208   :  { %4279 = vmatprep.subr.bf16.mxu0 %v8295_v54  ;;  %v8368_v54 = vld [vmem:[#allocation8 + $0x600] ss:$24 sps:$4 sm:$0xff]  }
 0x20a   :  { %4167 = vmatpush1.bf16.msra.mxu1 %v8338_v56  ;;  %v8376_v56 = vld [vmem:[#allocation8 + $0x634] ss:$24 sps:$4 sm:$0xff]  }
 0x20b   :  { %4280 = vmatpush1.bf16.msra.mxu0 %v8293_v55  ;;  %4168 = vmatprep.subr.bf16.mxu1 %v8346_v57  ;;  %v8371_v55 = vld [vmem:[#allocation8 + $0x608] ss:$24 sps:$4 sm:$0xff]   ;;  %v8379_v57 = vld [vmem:[#allocation8 + $0x63c] ss:$24 sps:$4 sm:$0xff]  }
 0x20c   :  { %4281 = vmatprep.subr.bf16.mxu0 %v8301_v39  ;;  %v8374_v39 = vld [vmem:[#allocation8 + $0x630] ss:$24 sps:$4 sm:$0xff]  }
 0x20e   :  { %4169 = vmatpush1.bf16.msra.mxu1 %v8344_v59  ;;  %v8382_v59 = vld [vmem:[#allocation8 + $0x664] ss:$24 sps:$4 sm:$0xff]  }
 0x20f   :  { %4282 = vmatpush1.bf16.msra.mxu0 %v8299_v58  ;;  %4170 = vmatprep.subr.bf16.mxu1 %v8352_v40  ;;  %v8377_v58 = vld [vmem:[#allocation8 + $0x638] ss:$24 sps:$4 sm:$0xff]   ;;  %v8385_v40 = vld [vmem:[#allocation8 + $0x66c] ss:$24 sps:$4 sm:$0xff]  }
 0x210   :  { %4283 = vmatprep.subr.bf16.mxu0 %v8307_v41  ;;  %v8380_v41 = vld [vmem:[#allocation8 + $0x660] ss:$24 sps:$4 sm:$0xff]  }
 0x212   :  { %4171 = vmatpush1.bf16.msra.mxu1 %v8350_v44  ;;  %v8388_v44 = vld [vmem:[#allocation8 + $0x694] ss:$24 sps:$4 sm:$0xff]  }
 0x213   :  { %4284 = vmatpush1.bf16.msra.mxu0 %v8305_v60  ;;  %4172 = vmatprep.subr.bf16.mxu1 %v8358_v61  ;;  %v8383_v60 = vld [vmem:[#allocation8 + $0x668] ss:$24 sps:$4 sm:$0xff]   ;;  %v8391_v61 = vld [vmem:[#allocation8 + $0x69c] ss:$24 sps:$4 sm:$0xff]  }
 0x214   :  { %4285 = vmatprep.subr.bf16.mxu0 %v8313_v62  ;;  %v8386_v62 = vld [vmem:[#allocation8 + $0x690] ss:$24 sps:$4 sm:$0xff]  }
 0x216   :  { %4173 = vmatpush1.bf16.msra.mxu1 %v8356_v1  ;;  %v8394_v1 = vld [vmem:[#allocation8 + $0x6c4] ss:$24 sps:$4 sm:$0xff]  }
 0x217   :  { %4286 = vmatpush1.bf16.msra.mxu0 %v8311_v0  ;;  %4174 = vmatprep.subr.bf16.mxu1 %v8364_v2  ;;  %v8389_v0 = vld [vmem:[#allocation8 + $0x698] ss:$24 sps:$4 sm:$0xff]   ;;  %v8397_v2 = vld [vmem:[#allocation8 + $0x6cc] ss:$24 sps:$4 sm:$0xff]  }
 0x218   :  { %4287 = vmatprep.subr.bf16.mxu0 %v8319_v5  ;;  %v8392_v5 = vld [vmem:[#allocation8 + $0x6c0] ss:$24 sps:$4 sm:$0xff]  }
 0x21a   :  { %4175 = vmatpush1.bf16.msra.mxu1 %v8362_v8  ;;  %v8400_v8 = vld [vmem:[#allocation8 + $0x6f4] ss:$24 sps:$4 sm:$0xff]  }
 0x21b   :  { %4288 = vmatpush1.bf16.msra.mxu0 %v8317_v6  ;;  %4187 = vmatprep.subr.bf16.mxu1 %v8370_v9  ;;  %v8395_v6 = vld [vmem:[#allocation8 + $0x6c8] ss:$24 sps:$4 sm:$0xff]   ;;  %v8403_v9 = vld [vmem:[#allocation8 + $0x6fc] ss:$24 sps:$4 sm:$0xff]  }
 0x21c   :  { %4289 = vmatprep.subr.bf16.mxu0 %v8325_v10  ;;  %v8398_v10 = vld [vmem:[#allocation8 + $0x6f0] ss:$24 sps:$4 sm:$0xff]  }
 0x21f   :  { %4290 = vmatpush1.bf16.msra.mxu0 %v8323_v12  ;;  %v8401_v12 = vld [vmem:[#allocation8 + $0x6f8] ss:$24 sps:$4 sm:$0xff]  }
 0x220   :  { %4291 = vmatprep.subr.bf16.mxu0 %v8331_v13  ;;  %v8406_v13 = vld [vmem:[#allocation8 + $0x724] ss:$24 sps:$4 sm:$0xff]  }
 0x223   :  { %4292 = vmatpush1.bf16.msra.mxu0 %v8329_v14  ;;  %v8409_v14 = vld [vmem:[#allocation8 + $0x72c] ss:$24 sps:$4 sm:$0xff]  }
 0x224   :  { %4293 = vmatprep.subr.bf16.mxu0 %v8337_v15  ;;  %v8404_v15 = vld [vmem:[#allocation8 + $0x720] ss:$24 sps:$4 sm:$0xff]  }
 0x227   :  { %4294 = vmatpush1.bf16.msra.mxu0 %v8335_v16  ;;  %v8407_v16 = vld [vmem:[#allocation8 + $0x728] ss:$24 sps:$4 sm:$0xff]  }
 0x228   :  { %4295 = vmatprep.subr.bf16.mxu0 %v8343_v17  ;;  %v8412_v17 = vld [vmem:[#allocation8 + $0x754] ss:$24 sps:$4 sm:$0xff]  }
 0x22b   :  { %4296 = vmatpush1.bf16.msra.mxu0 %v8341_v18  ;;  %v8415_v18 = vld [vmem:[#allocation8 + $0x75c] ss:$24 sps:$4 sm:$0xff]  }
 0x22c   :  { %4297 = vmatprep.subr.bf16.mxu0 %v8349_v19  ;;  %v8410_v19 = vld [vmem:[#allocation8 + $0x750] ss:$24 sps:$4 sm:$0xff]  }
 0x22f   :  { %4298 = vmatpush1.bf16.msra.mxu0 %v8347_v20  ;;  %v8413_v20 = vld [vmem:[#allocation8 + $0x758] ss:$24 sps:$4 sm:$0xff]  }
 0x230   :  { %4299 = vmatprep.subr.bf16.mxu0 %v8355_v21  ;;  %v8418_v21 = vld [vmem:[#allocation8 + $0x784] ss:$24 sps:$4 sm:$0xff]  }
 0x233   :  { %4300 = vmatpush1.bf16.msra.mxu0 %v8353_v22  ;;  %v8421_v22 = vld [vmem:[#allocation8 + $0x78c] ss:$24 sps:$4 sm:$0xff]  }
 0x234   :  { %4301 = vmatprep.subr.bf16.mxu0 %v8361_v23  ;;  %v8416_v23 = vld [vmem:[#allocation8 + $0x780] ss:$24 sps:$4 sm:$0xff]  }
 0x237   :  { %4302 = vmatpush1.bf16.msra.mxu0 %v8359_v24  ;;  %v8419_v24 = vld [vmem:[#allocation8 + $0x788] ss:$24 sps:$4 sm:$0xff]  }
 0x238   :  { %4303 = vmatprep.subr.bf16.mxu0 %v8367_v25  ;;  %v8424_v25 = vld [vmem:[#allocation8 + $0x7b4] ss:$24 sps:$4 sm:$0xff]  }
 0x23b   :  { %4304 = vmatpush1.bf16.msra.mxu0 %v8365_v26  ;;  %v8427_v26 = vld [vmem:[#allocation8 + $0x7bc] ss:$24 sps:$4 sm:$0xff]  }
 0x23c   :  { %4316 = vmatprep.subr.bf16.mxu0 %v8373_v7  ;;  %v8422_v7 = vld [vmem:[#allocation8 + $0x7b0] ss:$24 sps:$4 sm:$0xff]  }
 0x250   :  { %v2161_v49 = vpop.f32.mrb[4].mxu1 }
 0x251   :  { %v7623_v29 = vadd.f32 %v2161_v49, %v423_v28  ;;  %v2163_v32 = vpop.f32.mrb[5].mxu1  ;;  %v8433_v49 = vld [vmem:[#allocation8 + $0x7ec] ss:$24 sps:$4 sm:$0xff]  }
 0x252   :  { %v7624_v33 = vadd.f32 %v2163_v32, %v427_v11  ;;  %v2165_v35 = vpop.f32.mrb[6].mxu1  ;;  %v8431_v32 = vld [vmem:[#allocation8 + $0x7e8] ss:$24 sps:$4 sm:$0xff]  }
 0x253   :  { %v2313_v36 = vmul.f32 0.01, %v7623_v29  ;;  %v7625_v37 = vadd.f32 %v2165_v35, %v423_v28  ;;  %v2167_v38 = vpop.f32.mrb[7].mxu1  ;;  %vm2301_vm4 = vcmp.ge.f32.partialorder %v7623_v29, 0.0  ;;  %v8425_v28 = vld [vmem:[#allocation8 + $0x7b8] ss:$24 sps:$4 sm:$0xff]  }
 0x254   :  { %v2314_v42 = vmul.f32 0.01, %v7624_v33  ;;  %v7626_v43 = vadd.f32 %v2167_v38, %v427_v11  ;;  %vm2302_vm5 = vcmp.ge.f32.partialorder %v7624_v33, 0.0  ;;  %v8430_v11 = vld [vmem:[#allocation8 + $0x7e4] ss:$24 sps:$4 sm:$0xff]  }
 0x255   :  { %vm2307_vm6 = vcmp.ge.f32.partialorder %v7625_v37, 0.0  ;;  %v2319_v45 = vmul.f32 0.01, %v7625_v37  ;;  %v2325_v47 = vsel %vm2301_vm4, %v7623_v29, %v2313_v36  ;;  %v8428_v29 = vld [vmem:[#allocation8 + $0x7e0] ss:$24 sps:$4 sm:$0xff]  }
 0x256   :  { %vm2308_vm7 = vcmp.ge.f32.partialorder %v7626_v43, 0.0  ;;  %v2320_v46 = vmul.f32 0.01, %v7626_v43  ;;  %v2326_v34 = vsel %vm2302_vm5, %v7624_v33, %v2314_v42  ;;  %v8436_v33 = vld [vmem:[#allocation8 + $0x814] ss:$24 sps:$4 sm:$0xff]  }
 0x257   :  { %v2331_v48 = vsel %vm2307_vm6, %v7625_v37, %v2319_v45  ;;  %v8439_v35 = vld [vmem:[#allocation8 + $0x81c] ss:$24 sps:$4 sm:$0xff]   ;;  %v8434_v36 = vld [vmem:[#allocation8 + $0x810] ss:$24 sps:$4 sm:$0xff]   ;;  %v8445_v42 = vld [vmem:[#allocation8 + $0x84c] ss:$24 sps:$4 sm:$0xff]  }
 0x258   :  { %v9463_v51 = vpack.c.bf16 %v2331_v48, %v2325_v47  ;;  %v2332_v52 = vsel %vm2308_vm7, %v7626_v43, %v2320_v46  ;;  %v8437_v37 = vld [vmem:[#allocation8 + $0x818] ss:$24 sps:$4 sm:$0xff]   ;;  %v8442_v38 = vld [vmem:[#allocation8 + $0x844] ss:$24 sps:$4 sm:$0xff]   ;;  %v8443_v45 = vld [vmem:[#allocation8 + $0x848] ss:$24 sps:$4 sm:$0xff]  }
 0x259   :  { %v9465_v53 = vpack.c.bf16 %v2332_v52, %v2326_v34  ;;  %v8440_v43 = vld [vmem:[#allocation8 + $0x840] ss:$24 sps:$4 sm:$0xff]   ;;  %v9472_v46 = vsub.s32 4, %v9427_v50  ;;  %v8448_v47 = vld [vmem:[#allocation8 + $0x874] ss:$24 sps:$4 sm:$0xff]   ;;  %v9475_v34 = vsub.s32 5, %v9427_v50 }
 0x25a   :  { %v8451_v48 = vld [vmem:[#allocation8 + $0x87c] ss:$24 sps:$4 sm:$0xff]   ;;  %v8446_v52 = vld [vmem:[#allocation8 + $0x870] ss:$24 sps:$4 sm:$0xff]   ;;  %v8452_v50 = vld [vmem:[#allocation8 + $0x8a0] ss:$24 sps:$4 sm:$0xff]  }
 0x25b   :  { %4176 = vmatprep.mubr.bf16.mxu1 %v9465_v53  ;;  %4305 = vmatprep.mubr.bf16.mxu0 %v9465_v53 }
 0x25c   :  { %4177 = vmatmul.mubr.bf16.vlgmr.msra.gmra.mrb[8].mxu1 %v9463_v51  ;;  %4306 = vmatmul.mubr.bf16.vlgmr.msra.gmra.mrb[8].mxu0 %v9463_v51 }
 0x25d   :  { %4188 = vmatpush1.bf16.msra.mxu1 %v8368_v54  ;;  %4317 = vmatpush1.bf16.msra.mxu0 %v8371_v55  ;;  %v9044_v54 = vld [vmem:[#allocation7] sm:$0x3f] }
 0x25e   :  { %4189 = vmatprep.subr.bf16.mxu1 %v8376_v56  ;;  %4318 = vmatprep.subr.bf16.mxu0 %v8379_v57  ;;  %v431_v55 = vrot.slane %v9044_v54, %v9472_v46  ;;  %v8449_v56 = vld [vmem:[#allocation8 + $0x878] ss:$24 sps:$4 sm:$0xff]   ;;  %v435_v57 = vrot.slane %v9044_v54, %v9475_v34 }
 0x25f   :  { %v8494_v54 = vld [vmem:[#allocation8 + $0x1f0] ss:$24 sps:$4 sm:$0xff]  }
 0x261   :  { %4190 = vmatpush1.bf16.msra.mxu1 %v8374_v39  ;;  %4319 = vmatpush1.bf16.msra.mxu0 %v8377_v58  ;;  %v8454_v39 = vld [vmem:[#allocation8 + $0x8a4] ss:$24 sps:$4 sm:$0xff]  }
 0x262   :  { %4191 = vmatprep.subr.bf16.mxu1 %v8382_v59  ;;  %4320 = vmatprep.subr.bf16.mxu0 %v8385_v40  ;;  %v8457_v58 = vld [vmem:[#allocation8 + $0x8ac] ss:$24 sps:$4 sm:$0xff]  }
 0x265   :  { %4192 = vmatpush1.bf16.msra.mxu1 %v8380_v41  ;;  %4321 = vmatpush1.bf16.msra.mxu0 %v8383_v60  ;;  %v8455_v60 = vld [vmem:[#allocation8 + $0x8a8] ss:$24 sps:$4 sm:$0xff]  }
 0x266   :  { %4193 = vmatprep.subr.bf16.mxu1 %v8388_v44  ;;  %4322 = vmatprep.subr.bf16.mxu0 %v8391_v61 }
 0x269   :  { %4194 = vmatpush1.bf16.msra.mxu1 %v8386_v62  ;;  %4323 = vmatpush1.bf16.msra.mxu0 %v8389_v0  ;;  %v8460_v62 = vld [vmem:[#allocation8 + $0x8d4] ss:$24 sps:$4 sm:$0xff]  }
 0x26a   :  { %4195 = vmatprep.subr.bf16.mxu1 %v8394_v1  ;;  %4324 = vmatprep.subr.bf16.mxu0 %v8397_v2  ;;  %v8463_v0 = vld [vmem:[#allocation8 + $0x8dc] ss:$24 sps:$4 sm:$0xff]  }
 0x26d   :  { %4196 = vmatpush1.bf16.msra.mxu1 %v8392_v5  ;;  %4325 = vmatpush1.bf16.msra.mxu0 %v8395_v6 }
 0x26e   :  { %4197 = vmatprep.subr.bf16.mxu1 %v8400_v8  ;;  %4326 = vmatprep.subr.bf16.mxu0 %v8403_v9  ;;  %v8458_v9 = vld [vmem:[#allocation8 + $0x8d0] ss:$24 sps:$4 sm:$0xff]  }
 0x271   :  { %4198 = vmatpush1.bf16.msra.mxu1 %v8398_v10  ;;  %4327 = vmatpush1.bf16.msra.mxu0 %v8401_v12  ;;  %v8461_v12 = vld [vmem:[#allocation8 + $0x8d8] ss:$24 sps:$4 sm:$0xff]  }
 0x272   :  { %4199 = vmatprep.subr.bf16.mxu1 %v8406_v13  ;;  %4328 = vmatprep.subr.bf16.mxu0 %v8409_v14  ;;  %v8466_v14 = vld [vmem:[#allocation8 + $0x14] ss:$24 sps:$4 sm:$0xff]  }
 0x275   :  { %4200 = vmatpush1.bf16.msra.mxu1 %v8404_v15  ;;  %4329 = vmatpush1.bf16.msra.mxu0 %v8407_v16 }
 0x276   :  { %4201 = vmatprep.subr.bf16.mxu1 %v8412_v17  ;;  %4330 = vmatprep.subr.bf16.mxu0 %v8415_v18 }
 0x279   :  { %4202 = vmatpush1.bf16.msra.mxu1 %v8410_v19  ;;  %4331 = vmatpush1.bf16.msra.mxu0 %v8413_v20 }
 0x27a   :  { %4203 = vmatprep.subr.bf16.mxu1 %v8418_v21  ;;  %4332 = vmatprep.subr.bf16.mxu0 %v8421_v22  ;;  %v8464_v21 = vld [vmem:[#allocation8 + $0x10] ss:$24 sps:$4 sm:$0xff]   ;;  %v8469_v22 = vld [vmem:[#allocation8 + $0x44] ss:$24 sps:$4 sm:$0xff]  }
 0x27d   :  { %4204 = vmatpush1.bf16.msra.mxu1 %v8416_v23  ;;  %4333 = vmatpush1.bf16.msra.mxu0 %v8419_v24  ;;  %v8467_v23 = vld [vmem:[#allocation8 + $0x40] ss:$24 sps:$4 sm:$0xff]   ;;  %v8472_v24 = vld [vmem:[#allocation8 + $0x74] ss:$24 sps:$4 sm:$0xff]  }
 0x27e   :  { %4205 = vmatprep.subr.bf16.mxu1 %v8424_v25  ;;  %4334 = vmatprep.subr.bf16.mxu0 %v8427_v26  ;;  %v8470_v25 = vld [vmem:[#allocation8 + $0x70] ss:$24 sps:$4 sm:$0xff]   ;;  %v8475_v26 = vld [vmem:[#allocation8 + $0xa4] ss:$24 sps:$4 sm:$0xff]  }
 0x281   :  { %4206 = vmatpush1.bf16.msra.mxu1 %v8422_v7  ;;  %4335 = vmatpush1.bf16.msra.mxu0 %v8425_v28  ;;  %v8473_v7 = vld [vmem:[#allocation8 + $0xa0] ss:$24 sps:$4 sm:$0xff]   ;;  %v8478_v28 = vld [vmem:[#allocation8 + $0xd4] ss:$24 sps:$4 sm:$0xff]  }
 0x282   :  { %4207 = vmatprep.subr.bf16.mxu1 %v8430_v11  ;;  %4336 = vmatprep.subr.bf16.mxu0 %v8433_v49  ;;  %v8476_v11 = vld [vmem:[#allocation8 + $0xd0] ss:$24 sps:$4 sm:$0xff]   ;;  %v8481_v49 = vld [vmem:[#allocation8 + $0x104] ss:$24 sps:$4 sm:$0xff]  }
 0x285   :  { %4208 = vmatpush1.bf16.msra.mxu1 %v8428_v29  ;;  %4337 = vmatpush1.bf16.msra.mxu0 %v8431_v32  ;;  %v8479_v29 = vld [vmem:[#allocation8 + $0x100] ss:$24 sps:$4 sm:$0xff]   ;;  %v8484_v32 = vld [vmem:[#allocation8 + $0x134] ss:$24 sps:$4 sm:$0xff]  }
 0x286   :  { %4209 = vmatprep.subr.bf16.mxu1 %v8436_v33  ;;  %4338 = vmatprep.subr.bf16.mxu0 %v8439_v35  ;;  %v8487_v33 = vld [vmem:[#allocation8 + $0x164] ss:$24 sps:$4 sm:$0xff]   ;;  %v8485_v35 = vld [vmem:[#allocation8 + $0x160] ss:$24 sps:$4 sm:$0xff]  }
 0x289   :  { %4210 = vmatpush1.bf16.msra.mxu1 %v8434_v36  ;;  %4339 = vmatpush1.bf16.msra.mxu0 %v8437_v37  ;;  %v8490_v36 = vld [vmem:[#allocation8 + $0x194] ss:$24 sps:$4 sm:$0xff]   ;;  %v8488_v37 = vld [vmem:[#allocation8 + $0x190] ss:$24 sps:$4 sm:$0xff]  }
 0x28a   :  { %4211 = vmatprep.subr.bf16.mxu1 %v8442_v38  ;;  %4340 = vmatprep.subr.bf16.mxu0 %v8445_v42  ;;  %v8584_v38 = vld [vmem:[#allocation11] ss:$24 sps:$4 sm:$0xff]   ;;  %v8586_v42 = vld [vmem:[#allocation11 + $0x4] ss:$24 sps:$4 sm:$0xff]  }
 0x28d   :  { %4212 = vmatpush1.bf16.msra.mxu1 %v8440_v43  ;;  %4341 = vmatpush1.bf16.msra.mxu0 %v8443_v45  ;;  %v8493_v43 = vld [vmem:[#allocation8 + $0x1c4] ss:$24 sps:$4 sm:$0xff]   ;;  %v8491_v45 = vld [vmem:[#allocation8 + $0x1c0] ss:$24 sps:$4 sm:$0xff]  }
 0x28e   :  { %4213 = vmatprep.subr.bf16.mxu1 %v8448_v47  ;;  %4342 = vmatprep.subr.bf16.mxu0 %v8451_v48  ;;  %v8590_v47 = vld [vmem:[#allocation11 + $0x30] ss:$24 sps:$4 sm:$0xff]   ;;  %v8592_v48 = vld [vmem:[#allocation11 + $0x34] ss:$24 sps:$4 sm:$0xff]  }
 0x291   :  { %v2290_v59 = vpop.f32.mrb[4].mxu0  ;;  %4214 = vmatpush1.bf16.msra.mxu1 %v8446_v52  ;;  %4343 = vmatpush1.bf16.msra.mxu0 %v8449_v56  ;;  %v8496_v52 = vld [vmem:[#allocation8 + $0x1f4] ss:$24 sps:$4 sm:$0xff]  }
 0x292   :  { %v7627_v40 = vadd.f32 %v2290_v59, %v431_v55  ;;  %v2292_v41 = vpop.f32.mrb[5].mxu0  ;;  %4215 = vmatprep.subr.bf16.mxu1 %v8454_v39  ;;  %4344 = vmatprep.subr.bf16.mxu0 %v8457_v58  ;;  %v8598_v56 = vld [vmem:[#allocation11 + $0x64] ss:$24 sps:$4 sm:$0xff]   ;;  %v8602_v58 = vld [vmem:[#allocation11 + $0x90] ss:$24 sps:$4 sm:$0xff]  }
 0x293   :  { %v7628_v44 = vadd.f32 %v2292_v41, %v435_v57  ;;  %v2294_v61 = vpop.f32.mrb[6].mxu0  ;;  %v8497_v39 = vld [vmem:[#allocation8 + $0x220] ss:$24 sps:$4 sm:$0xff]   ;;  %v8500_v41 = vld [vmem:[#allocation8 + $0x250] ss:$24 sps:$4 sm:$0xff]  }
 0x294   :  { %v2315_v1 = vmul.f32 0.01, %v7627_v40  ;;  %v7629_v2 = vadd.f32 %v2294_v61, %v431_v55  ;;  %v2296_v5 = vpop.f32.mrb[7].mxu0  ;;  %vm2303_vm8 = vcmp.ge.f32.partialorder %v7627_v40, 0.0  ;;  %v8596_v55 = vld [vmem:[#allocation11 + $0x60] ss:$24 sps:$4 sm:$0xff]  }
 0x295   :  { %v2316_v6 = vmul.f32 0.01, %v7628_v44  ;;  %v7630_v8 = vadd.f32 %v2296_v5, %v435_v57  ;;  %vm2304_vm9 = vcmp.ge.f32.partialorder %v7628_v44, 0.0  ;;  %4216 = vmatpush1.bf16.msra.mxu1 %v8452_v50  ;;  %4345 = vmatpush1.bf16.msra.mxu0 %v8455_v60  ;;  %v8499_v57 = vld [vmem:[#allocation8 + $0x224] ss:$24 sps:$4 sm:$0xff]  }
 0x296   :  { %vm2309_vm10 = vcmp.ge.f32.partialorder %v7629_v2, 0.0  ;;  %v2321_v10 = vmul.f32 0.01, %v7629_v2  ;;  %4217 = vmatprep.subr.bf16.mxu1 %v8460_v62  ;;  %4346 = vmatprep.subr.bf16.mxu0 %v8463_v0  ;;  %v2327_v15 = vsel %vm2303_vm8, %v7627_v40, %v2315_v1  ;;  %v8604_v59 = vld [vmem:[#allocation11 + $0x94] ss:$24 sps:$4 sm:$0xff]  }
 0x297   :  { %vm2310_vm11 = vcmp.ge.f32.partialorder %v7630_v8, 0.0  ;;  %v2322_v13 = vmul.f32 0.01, %v7630_v8  ;;  %v2328_v18 = vsel %vm2304_vm9, %v7628_v44, %v2316_v6  ;;  %v8502_v40 = vld [vmem:[#allocation8 + $0x254] ss:$24 sps:$4 sm:$0xff]  }
 0x298   :  { %v2333_v16 = vsel %vm2309_vm10, %v7629_v2, %v2321_v10  ;;  %v8608_v50 = vld [vmem:[#allocation11 + $0xc0] ss:$24 sps:$4 sm:$0xff]   ;;  %v8610_v60 = vld [vmem:[#allocation11 + $0xc4] ss:$24 sps:$4 sm:$0xff]   ;;  %v8614_v62 = vld [vmem:[#allocation11 + $0xf0] ss:$24 sps:$4 sm:$0xff]  }
 0x299   :  { %v9479_v17 = vpack.c.bf16 %v2333_v16, %v2327_v15  ;;  %v2334_v19 = vsel %vm2310_vm11, %v7630_v8, %v2322_v13  ;;  %4218 = vmatpush1.bf16.msra.mxu1 %v8458_v9  ;;  %4347 = vmatpush1.bf16.msra.mxu0 %v8461_v12  ;;  %v8505_v44 = vld [vmem:[#allocation8 + $0x284] ss:$24 sps:$4 sm:$0xff]   ;;  %v8503_v61 = vld [vmem:[#allocation8 + $0x280] ss:$24 sps:$4 sm:$0xff]   ;;  %v8508_v1 = vld [vmem:[#allocation8 + $0x2b4] ss:$24 sps:$4 sm:$0xff]  }
 0x29a   :  { %v9481_v20 = vpack.c.bf16 %v2334_v19, %v2328_v18  ;;  %4359 = vmatprep.subr.bf16.mxu1 %v8466_v14  ;;  %6290 = vmatprep.subr.bf16.mxu0 %v8586_v42  ;;  %v8616_v0 = vld [vmem:[#allocation11 + $0xf4] ss:$24 sps:$4 sm:$0xff]   ;;  %v8620_v5 = vld [vmem:[#allocation11 + $0x120] ss:$24 sps:$4 sm:$0xff]   ;;  %v8622_v6 = vld [vmem:[#allocation11 + $0x124] ss:$24 sps:$4 sm:$0xff]  }
 0x29b   :  { %v8506_v2 = vld [vmem:[#allocation8 + $0x2b0] ss:$24 sps:$4 sm:$0xff]   ;;  %v8511_v8 = vld [vmem:[#allocation8 + $0x2e4] ss:$24 sps:$4 sm:$0xff]   ;;  %v8509_v9 = vld [vmem:[#allocation8 + $0x2e0] ss:$24 sps:$4 sm:$0xff]  }
 0x29c   :  { %4219 = vmatprep.mubr.bf16.mxu1 %v9481_v20  ;;  %4348 = vmatprep.mubr.bf16.mxu0 %v9481_v20  ;;  %v8626_v10 = vld [vmem:[#allocation11 + $0x150] ss:$24 sps:$4 sm:$0xff]   ;;  %v8628_v12 = vld [vmem:[#allocation11 + $0x154] ss:$24 sps:$4 sm:$0xff]   ;;  %v8632_v15 = vld [vmem:[#allocation11 + $0x180] ss:$24 sps:$4 sm:$0xff]  }
 0x29d   :  { %4220 = vmatmul.mubr.bf16.vlgmr.msra.gmra.mrb[8].mxu1 %v9479_v17  ;;  %4349 = vmatmul.mubr.bf16.vlgmr.msra.gmra.mrb[8].mxu0 %v9479_v17  ;;  %v8514_v13 = vld [vmem:[#allocation8 + $0x314] ss:$24 sps:$4 sm:$0xff]   ;;  %v8512_v14 = vld [vmem:[#allocation8 + $0x310] ss:$24 sps:$4 sm:$0xff]   ;;  %v8517_v18 = vld [vmem:[#allocation8 + $0x344] ss:$24 sps:$4 sm:$0xff]  }
 0x29e   :  { %4360 = vmatpush1.bf16.msra.mxu1 %v8464_v21  ;;  %4391 = vmatprep.mubr.bf16.mxu1 %v9447_v3  ;;  %v8482_v3 = vld [vmem:[#allocation8 + $0x130] ss:$24 sps:$4 sm:$0xff]   ;;  %v8515_v19 = vld [vmem:[#allocation8 + $0x340] ss:$24 sps:$4 sm:$0xff]   ;;  %v8535_v42 = vld [vmem:[#allocation8 + $0x464] ss:$24 sps:$4 sm:$0xff]  }
 0x29f   :  { %4361 = vmatprep.subr.bf16.mxu1 %v8469_v22  ;;  %6291 = vmatpush1.bf16.msra.mxu0 %v8584_v38  ;;  %v8634_v16 = vld [vmem:[#allocation11 + $0x184] ss:$24 sps:$4 sm:$0xff]   ;;  %v8638_v21 = vld [vmem:[#allocation11 + $0x1b0] ss:$24 sps:$4 sm:$0xff]   ;;  %v8640_v22 = vld [vmem:[#allocation11 + $0x1b4] ss:$24 sps:$4 sm:$0xff]  }
 0x2a0   :  { %6292 = vmatprep.subr.bf16.mxu0 %v8592_v48  ;;  %v8530_v38 = vld [vmem:[#allocation8 + $0x430] ss:$24 sps:$4 sm:$0xff]   ;;  %v8538_v48 = vld [vmem:[#allocation8 + $0x494] ss:$24 sps:$4 sm:$0xff]  }
 0x2a2   :  { %4362 = vmatpush1.bf16.msra.mxu1 %v8467_v23  ;;  %v8520_v23 = vld [vmem:[#allocation8 + $0x374] ss:$24 sps:$4 sm:$0xff]  }
 0x2a3   :  { %4363 = vmatprep.subr.bf16.mxu1 %v8472_v24  ;;  %6293 = vmatpush1.bf16.msra.mxu0 %v8590_v47  ;;  %v8518_v24 = vld [vmem:[#allocation8 + $0x370] ss:$24 sps:$4 sm:$0xff]   ;;  %v8533_v47 = vld [vmem:[#allocation8 + $0x460] ss:$24 sps:$4 sm:$0xff]  }
 0x2a4   :  { %6294 = vmatprep.subr.bf16.mxu0 %v8598_v56  ;;  %v8541_v56 = vld [vmem:[#allocation8 + $0x4c4] ss:$24 sps:$4 sm:$0xff]  }
 0x2a6   :  { %4364 = vmatpush1.bf16.msra.mxu1 %v8470_v25  ;;  %v8644_v25 = vld [vmem:[#allocation11 + $0x1e0] ss:$24 sps:$4 sm:$0xff]  }
 0x2a7   :  { %4365 = vmatprep.subr.bf16.mxu1 %v8475_v26  ;;  %6295 = vmatpush1.bf16.msra.mxu0 %v8596_v55  ;;  %v8646_v26 = vld [vmem:[#allocation11 + $0x1e4] ss:$24 sps:$4 sm:$0xff]  }
 0x2a8   :  { %6296 = vmatprep.subr.bf16.mxu0 %v8604_v59  ;;  %v8536_v55 = vld [vmem:[#allocation8 + $0x490] ss:$24 sps:$4 sm:$0xff]  }
 0x2a9   :  { %v8542_v59 = vld [vmem:[#allocation8 + $0x4f0] ss:$24 sps:$4 sm:$0xff]  }
 0x2aa   :  { %4366 = vmatpush1.bf16.msra.mxu1 %v8473_v7  ;;  %v8523_v7 = vld [vmem:[#allocation8 + $0x3a4] ss:$24 sps:$4 sm:$0xff]  }
 0x2ab   :  { %4367 = vmatprep.subr.bf16.mxu1 %v8478_v28  ;;  %6297 = vmatpush1.bf16.msra.mxu0 %v8602_v58  ;;  %v8650_v28 = vld [vmem:[#allocation11 + $0x210] ss:$24 sps:$4 sm:$0xff]  }
 0x2ac   :  { %6298 = vmatprep.subr.bf16.mxu0 %v8610_v60  ;;  %v8544_v58 = vld [vmem:[#allocation8 + $0x4f4] ss:$24 sps:$4 sm:$0xff]   ;;  %v8548_v60 = vld [vmem:[#allocation8 + $0x550] ss:$24 sps:$4 sm:$0xff]  }
 0x2ae   :  { %4368 = vmatpush1.bf16.msra.mxu1 %v8476_v11  ;;  %v8652_v11 = vld [vmem:[#allocation11 + $0x214] ss:$24 sps:$4 sm:$0xff]  }
 0x2af   :  { %4369 = vmatprep.subr.bf16.mxu1 %v8481_v49  ;;  %6299 = vmatpush1.bf16.msra.mxu0 %v8608_v50  ;;  %v8524_v49 = vld [vmem:[#allocation8 + $0x3d0] ss:$24 sps:$4 sm:$0xff]   ;;  %v8550_v50 = vld [vmem:[#allocation8 + $0x554] ss:$24 sps:$4 sm:$0xff]  }
 0x2b0   :  { %6300 = vmatprep.subr.bf16.mxu0 %v8616_v0  ;;  %v8554_v0 = vld [vmem:[#allocation8 + $0x5b0] ss:$24 sps:$4 sm:$0xff]  }
 0x2b2   :  { %4370 = vmatpush1.bf16.msra.mxu1 %v8479_v29  ;;  %v8656_v29 = vld [vmem:[#allocation11 + $0x240] ss:$24 sps:$4 sm:$0xff]  }
 0x2b3   :  { %4371 = vmatprep.subr.bf16.mxu1 %v8484_v32  ;;  %6301 = vmatpush1.bf16.msra.mxu0 %v8614_v62  ;;  %v8658_v32 = vld [vmem:[#allocation11 + $0x244] ss:$24 sps:$4 sm:$0xff]  }
 0x2b4   :  { %6302 = vmatprep.subr.bf16.mxu0 %v8622_v6  ;;  %v8556_v62 = vld [vmem:[#allocation8 + $0x5b4] ss:$24 sps:$4 sm:$0xff]   ;;  %v8560_v6 = vld [vmem:[#allocation8 + $0x610] ss:$24 sps:$4 sm:$0xff]  }
 0x2b6   :  { %4372 = vmatpush1.bf16.msra.mxu1 %v8482_v3  ;;  %v8529_v3 = vld [vmem:[#allocation8 + $0x404] ss:$24 sps:$4 sm:$0xff]  }
 0x2b7   :  { %4373 = vmatprep.subr.bf16.mxu1 %v8487_v33  ;;  %6303 = vmatpush1.bf16.msra.mxu0 %v8620_v5  ;;  %v8527_v33 = vld [vmem:[#allocation8 + $0x400] ss:$24 sps:$4 sm:$0xff]   ;;  %v8562_v5 = vld [vmem:[#allocation8 + $0x614] ss:$24 sps:$4 sm:$0xff]  }
 0x2b8   :  { %6304 = vmatprep.subr.bf16.mxu0 %v8628_v12  ;;  %v8566_v12 = vld [vmem:[#allocation8 + $0x670] ss:$24 sps:$4 sm:$0xff]  }
 0x2ba   :  { %4374 = vmatpush1.bf16.msra.mxu1 %v8485_v35  ;;  %v8662_v35 = vld [vmem:[#allocation11 + $0x270] ss:$24 sps:$4 sm:$0xff]  }
 0x2bb   :  { %4375 = vmatprep.subr.bf16.mxu1 %v8490_v36  ;;  %6305 = vmatpush1.bf16.msra.mxu0 %v8626_v10  ;;  %v8664_v36 = vld [vmem:[#allocation11 + $0x274] ss:$24 sps:$4 sm:$0xff]  }
 0x2bc   :  { %6306 = vmatprep.subr.bf16.mxu0 %v8634_v16  ;;  %v8568_v10 = vld [vmem:[#allocation8 + $0x674] ss:$24 sps:$4 sm:$0xff]   ;;  %v8572_v16 = vld [vmem:[#allocation8 + $0x6d0] ss:$24 sps:$4 sm:$0xff]  }
 0x2be   :  { %4376 = vmatpush1.bf16.msra.mxu1 %v8488_v37  ;;  %v8532_v37 = vld [vmem:[#allocation8 + $0x434] ss:$24 sps:$4 sm:$0xff]  }
 0x2bf   :  { %4377 = vmatprep.subr.bf16.mxu1 %v8493_v43  ;;  %6307 = vmatpush1.bf16.msra.mxu0 %v8632_v15  ;;  %v8670_v43 = vld [vmem:[#allocation11 + $0x2a4] ss:$24 sps:$4 sm:$0xff]  }
 0x2c0   :  { %6308 = vmatprep.subr.bf16.mxu0 %v8640_v22  ;;  %v8574_v15 = vld [vmem:[#allocation8 + $0x6d4] ss:$24 sps:$4 sm:$0xff]   ;;  %v8581_v22 = vld [vmem:[#allocation8 + $0x760] ss:$24 sps:$4 sm:$0xff]  }
 0x2c2   :  { %4378 = vmatpush1.bf16.msra.mxu1 %v8491_v45  ;;  %v8668_v45 = vld [vmem:[#allocation11 + $0x2a0] ss:$24 sps:$4 sm:$0xff]  }
 0x2c3   :  { %4379 = vmatprep.subr.bf16.mxu1 %v8496_v52  ;;  %6309 = vmatpush1.bf16.msra.mxu0 %v8638_v21  ;;  %v8676_v52 = vld [vmem:[#allocation11 + $0x2d4] ss:$24 sps:$4 sm:$0xff]  }
 0x2c4   :  { %6310 = vmatprep.subr.bf16.mxu0 %v8646_v26  ;;  %v8583_v21 = vld [vmem:[#allocation8 + $0x764] ss:$24 sps:$4 sm:$0xff]   ;;  %v8593_v26 = vld [vmem:[#allocation8 + $0x7c0] ss:$24 sps:$4 sm:$0xff]  }
 0x2c6   :  { %4380 = vmatpush1.bf16.msra.mxu1 %v8494_v54  ;;  %v8674_v54 = vld [vmem:[#allocation11 + $0x2d0] ss:$24 sps:$4 sm:$0xff]  }
 0x2c7   :  { %4381 = vmatprep.subr.bf16.mxu1 %v8499_v57  ;;  %6311 = vmatpush1.bf16.msra.mxu0 %v8644_v25  ;;  %v8682_v57 = vld [vmem:[#allocation11 + $0x304] ss:$24 sps:$4 sm:$0xff]  }
 0x2c8   :  { %6312 = vmatprep.subr.bf16.mxu0 %v8652_v11  ;;  %v8595_v25 = vld [vmem:[#allocation8 + $0x7c4] ss:$24 sps:$4 sm:$0xff]   ;;  %v8605_v11 = vld [vmem:[#allocation8 + $0x820] ss:$24 sps:$4 sm:$0xff]  }
 0x2ca   :  { %4382 = vmatpush1.bf16.msra.mxu1 %v8497_v39  ;;  %v8539_v39 = vld [vmem:[#allocation8 + $0x4c0] ss:$24 sps:$4 sm:$0xff]  }
 0x2cb   :  { %4383 = vmatprep.subr.bf16.mxu1 %v8502_v40  ;;  %6313 = vmatpush1.bf16.msra.mxu0 %v8650_v28  ;;  %v8547_v40 = vld [vmem:[#allocation8 + $0x524] ss:$24 sps:$4 sm:$0xff]  }
 0x2cc   :  { %6314 = vmatprep.subr.bf16.mxu0 %v8658_v32  ;;  %v8607_v28 = vld [vmem:[#allocation8 + $0x824] ss:$24 sps:$4 sm:$0xff]   ;;  %v8617_v32 = vld [vmem:[#allocation8 + $0x880] ss:$24 sps:$4 sm:$0xff]  }
 0x2ce   :  { %4384 = vmatpush1.bf16.msra.mxu1 %v8500_v41  ;;  %v8545_v41 = vld [vmem:[#allocation8 + $0x520] ss:$24 sps:$4 sm:$0xff]  }
 0x2cf   :  { %4385 = vmatprep.subr.bf16.mxu1 %v8505_v44  ;;  %6315 = vmatpush1.bf16.msra.mxu0 %v8656_v29  ;;  %v8553_v44 = vld [vmem:[#allocation8 + $0x584] ss:$24 sps:$4 sm:$0xff]  }
 0x2d0   :  { %6316 = vmatprep.subr.bf16.mxu0 %v8664_v36  ;;  %v8619_v29 = vld [vmem:[#allocation8 + $0x884] ss:$24 sps:$4 sm:$0xff]   ;;  %v8629_v36 = vld [vmem:[#allocation8 + $0x8e0] ss:$24 sps:$4 sm:$0xff]  }
 0x2d2   :  { %4386 = vmatpush1.bf16.msra.mxu1 %v8503_v61  ;;  %v8551_v61 = vld [vmem:[#allocation8 + $0x580] ss:$24 sps:$4 sm:$0xff]  }
 0x2d3   :  { %4387 = vmatprep.subr.bf16.mxu1 %v8508_v1  ;;  %6317 = vmatpush1.bf16.msra.mxu0 %v8662_v35  ;;  %v8559_v1 = vld [vmem:[#allocation8 + $0x5e4] ss:$24 sps:$4 sm:$0xff]  }
 0x2d4   :  { %6318 = vmatprep.subr.bf16.mxu0 %v8670_v43  ;;  %v8631_v35 = vld [vmem:[#allocation8 + $0x8e4] ss:$24 sps:$4 sm:$0xff]  }
 0x2d5   :  { %v8641_v43 = vld [vmem:[#allocation11 + $0x38] ss:$24 sps:$4 sm:$0xff]  }
 0x2d6   :  { %4388 = vmatpush1.bf16.msra.mxu1 %v8506_v2  ;;  %v8557_v2 = vld [vmem:[#allocation8 + $0x5e0] ss:$24 sps:$4 sm:$0xff]  }
 0x2d7   :  { %4389 = vmatprep.subr.bf16.mxu1 %v8511_v8  ;;  %6319 = vmatpush1.bf16.msra.mxu0 %v8668_v45  ;;  %v8565_v8 = vld [vmem:[#allocation8 + $0x644] ss:$24 sps:$4 sm:$0xff]   ;;  %v8649_v45 = vld [vmem:[#allocation11 + $0x6c] ss:$24 sps:$4 sm:$0xff]  }
 0x2d8   :  { %6320 = vmatprep.subr.bf16.mxu0 %v8676_v52  ;;  %v8653_v52 = vld [vmem:[#allocation11 + $0x98] ss:$24 sps:$4 sm:$0xff]  }
 0x2da   :  { %4390 = vmatpush1.bf16.msra.mxu1 %v8509_v9  ;;  %v8563_v9 = vld [vmem:[#allocation8 + $0x640] ss:$24 sps:$4 sm:$0xff]  }
 0x2db   :  { %4402 = vmatprep.subr.bf16.mxu1 %v8514_v13  ;;  %6321 = vmatpush1.bf16.msra.mxu0 %v8674_v54  ;;  %v8571_v13 = vld [vmem:[#allocation8 + $0x6a4] ss:$24 sps:$4 sm:$0xff]   ;;  %v8661_v54 = vld [vmem:[#allocation11 + $0xcc] ss:$24 sps:$4 sm:$0xff]  }
 0x2dc   :  { %6333 = vmatprep.subr.bf16.mxu0 %v8682_v57  ;;  %v8667_v57 = vld [vmem:[#allocation11 + $0xfc] ss:$24 sps:$4 sm:$0xff]  }
 0x2dd   :  { %4392 = vmatmul.mubr.bf16.vlgmr.msra.gmra.mrb[12].mxu1 %v9445_v63  ;;  %v8521_v63 = vld [vmem:[#allocation8 + $0x3a0] ss:$24 sps:$4 sm:$0xff]  }
 0x2de   :  { %4403 = vmatpush1.bf16.msra.mxu1 %v8512_v14  ;;  %4434 = vmatprep.mubr.bf16.mxu1 %v9465_v53  ;;  %v8526_v53 = vld [vmem:[#allocation8 + $0x3d4] ss:$24 sps:$4 sm:$0xff]   ;;  %v8569_v14 = vld [vmem:[#allocation8 + $0x6a0] ss:$24 sps:$4 sm:$0xff]  }
 0x2df   :  { %4404 = vmatprep.subr.bf16.mxu1 %v8517_v18  ;;  %v8577_v18 = vld [vmem:[#allocation8 + $0x704] ss:$24 sps:$4 sm:$0xff]  }
 0x2e2   :  { %4405 = vmatpush1.bf16.msra.mxu1 %v8515_v19  ;;  %v8580_v19 = vld [vmem:[#allocation8 + $0x734] ss:$24 sps:$4 sm:$0xff]  }
 0x2e3   :  { %4406 = vmatprep.subr.bf16.mxu1 %v8520_v23  ;;  %v8589_v23 = vld [vmem:[#allocation8 + $0x794] ss:$24 sps:$4 sm:$0xff]  }
 0x2e6   :  { %4407 = vmatpush1.bf16.msra.mxu1 %v8518_v24  ;;  %v8587_v24 = vld [vmem:[#allocation8 + $0x790] ss:$24 sps:$4 sm:$0xff]  }
 0x2e7   :  { %4408 = vmatprep.subr.bf16.mxu1 %v8523_v7  ;;  %v8601_v7 = vld [vmem:[#allocation8 + $0x7f4] ss:$24 sps:$4 sm:$0xff]  }
 0x2ea   :  { %4409 = vmatpush1.bf16.msra.mxu1 %v8521_v63  ;;  %v8599_v63 = vld [vmem:[#allocation8 + $0x7f0] ss:$24 sps:$4 sm:$0xff]  }
 0x2eb   :  { %4410 = vmatprep.subr.bf16.mxu1 %v8526_v53  ;;  %v8613_v53 = vld [vmem:[#allocation8 + $0x854] ss:$24 sps:$4 sm:$0xff]  }
 0x2ee   :  { %4411 = vmatpush1.bf16.msra.mxu1 %v8524_v49  ;;  %v8611_v49 = vld [vmem:[#allocation8 + $0x850] ss:$24 sps:$4 sm:$0xff]  }
 0x2ef   :  { %4412 = vmatprep.subr.bf16.mxu1 %v8529_v3  ;;  %v8625_v3 = vld [vmem:[#allocation8 + $0x8b4] ss:$24 sps:$4 sm:$0xff]  }
 0x2f2   :  { %4413 = vmatpush1.bf16.msra.mxu1 %v8527_v33  ;;  %v8623_v33 = vld [vmem:[#allocation8 + $0x8b0] ss:$24 sps:$4 sm:$0xff]  }
 0x2f3   :  { %4414 = vmatprep.subr.bf16.mxu1 %v8532_v37  ;;  %v8637_v37 = vld [vmem:[#allocation11 + $0xc] ss:$24 sps:$4 sm:$0xff]  }
 0x2f6   :  { %4415 = vmatpush1.bf16.msra.mxu1 %v8530_v38  ;;  %v8635_v38 = vld [vmem:[#allocation11 + $0x8] ss:$24 sps:$4 sm:$0xff]  }
 0x2f7   :  { %4416 = vmatprep.subr.bf16.mxu1 %v8535_v42  ;;  %v8643_v42 = vld [vmem:[#allocation11 + $0x3c] ss:$24 sps:$4 sm:$0xff]  }
 0x2fa   :  { %4417 = vmatpush1.bf16.msra.mxu1 %v8533_v47  ;;  %v8647_v47 = vld [vmem:[#allocation11 + $0x68] ss:$24 sps:$4 sm:$0xff]  }
 0x2fb   :  { %4418 = vmatprep.subr.bf16.mxu1 %v8538_v48  ;;  %v8655_v48 = vld [vmem:[#allocation11 + $0x9c] ss:$24 sps:$4 sm:$0xff]  }
 0x2fe   :  { %4419 = vmatpush1.bf16.msra.mxu1 %v8536_v55  ;;  %v8659_v55 = vld [vmem:[#allocation11 + $0xc8] ss:$24 sps:$4 sm:$0xff]  }
 0x2ff   :  { %4420 = vmatprep.subr.bf16.mxu1 %v8541_v56  ;;  %v9493_v56 = vld [vmem:[#allocation10] sm:$0x3f] }
 0x302   :  { %4421 = vmatpush1.bf16.msra.mxu1 %v8539_v39  ;;  %v2642_v39 = vrot.slane %v9493_v56, %v9454_v4 }
 0x303   :  { %4422 = vmatprep.subr.bf16.mxu1 %v8544_v58  ;;  %v8665_v58 = vld [vmem:[#allocation11 + $0xf8] ss:$24 sps:$4 sm:$0xff]  }
 0x306   :  { %4423 = vmatpush1.bf16.msra.mxu1 %v8542_v59  ;;  %v2638_v59 = vrot.slane %v9493_v56, %v9435_v31 }
 0x307   :  { %4424 = vmatprep.subr.bf16.mxu1 %v8547_v40  ;;  %v2646_v40 = vrot.slane %v9493_v56, %v9457_v27 }
 0x30a   :  { %4425 = vmatpush1.bf16.msra.mxu1 %v8545_v41  ;;  %v8673_v41 = vld [vmem:[#allocation11 + $0x12c] ss:$24 sps:$4 sm:$0xff]  }
 0x30b   :  { %4426 = vmatprep.subr.bf16.mxu1 %v8550_v50 }
 0x30e   :  { %4427 = vmatpush1.bf16.msra.mxu1 %v8548_v60 }
 0x30f   :  { %4428 = vmatprep.subr.bf16.mxu1 %v8553_v44 }
 0x312   :  { %4429 = vmatpush1.bf16.msra.mxu1 %v8551_v61 }
 0x313   :  { %4430 = vmatprep.subr.bf16.mxu1 %v8556_v62 }
 0x316   :  { %4431 = vmatpush1.bf16.msra.mxu1 %v8554_v0 }
 0x317   :  { %4432 = vmatprep.subr.bf16.mxu1 %v8559_v1 }
 0x31a   :  { %4433 = vmatpush1.bf16.msra.mxu1 %v8557_v2 }
 0x31b   :  { %4445 = vmatprep.subr.bf16.mxu1 %v8562_v5 }
 0x31d   :  { %4435 = vmatmul.mubr.bf16.vlgmr.msra.gmra.mrb[12].mxu1 %v9463_v51  ;;  %v8575_v51 = vld [vmem:[#allocation8 + $0x700] ss:$24 sps:$4 sm:$0xff]  }
 0x31e   :  { %4446 = vmatpush1.bf16.msra.mxu1 %v8560_v6  ;;  %4477 = vmatprep.mubr.bf16.mxu1 %v9481_v20  ;;  %v8578_v20 = vld [vmem:[#allocation8 + $0x730] ss:$24 sps:$4 sm:$0xff]  }
 0x31f   :  { %4447 = vmatprep.subr.bf16.mxu1 %v8565_v8  ;;  %v8671_v8 = vld [vmem:[#allocation11 + $0x128] ss:$24 sps:$4 sm:$0xff]  }
 0x322   :  { %4448 = vmatpush1.bf16.msra.mxu1 %v8563_v9  ;;  %v8679_v9 = vld [vmem:[#allocation11 + $0x15c] ss:$24 sps:$4 sm:$0xff]  }
 0x323   :  { %4449 = vmatprep.subr.bf16.mxu1 %v8568_v10 }
 0x326   :  { %4450 = vmatpush1.bf16.msra.mxu1 %v8566_v12 }
 0x327   :  { %4451 = vmatprep.subr.bf16.mxu1 %v8571_v13 }
 0x32a   :  { %4452 = vmatpush1.bf16.msra.mxu1 %v8569_v14 }
 0x32b   :  { %4453 = vmatprep.subr.bf16.mxu1 %v8574_v15 }
 0x32e   :  { %4454 = vmatpush1.bf16.msra.mxu1 %v8572_v16 }
 0x32f   :  { %4455 = vmatprep.subr.bf16.mxu1 %v8577_v18 }
 0x332   :  { %4456 = vmatpush1.bf16.msra.mxu1 %v8575_v51 }
 0x333   :  { %4457 = vmatprep.subr.bf16.mxu1 %v8580_v19 }
 0x336   :  { %4458 = vmatpush1.bf16.msra.mxu1 %v8578_v20 }
 0x337   :  { %4459 = vmatprep.subr.bf16.mxu1 %v8583_v21 }
 0x33a   :  { %4460 = vmatpush1.bf16.msra.mxu1 %v8581_v22 }
 0x33b   :  { %4461 = vmatprep.subr.bf16.mxu1 %v8589_v23  ;;  %v8677_v23 = vld [vmem:[#allocation11 + $0x158] ss:$24 sps:$4 sm:$0xff]  }
 0x33e   :  { %4462 = vmatpush1.bf16.msra.mxu1 %v8587_v24  ;;  %v8685_v24 = vld [vmem:[#allocation11 + $0x18c] ss:$24 sps:$4 sm:$0xff]  }
 0x33f   :  { %4463 = vmatprep.subr.bf16.mxu1 %v8595_v25 }
 0x342   :  { %4464 = vmatpush1.bf16.msra.mxu1 %v8593_v26 }
 0x343   :  { %4465 = vmatprep.subr.bf16.mxu1 %v8601_v7 }
 0x346   :  { %4466 = vmatpush1.bf16.msra.mxu1 %v8599_v63 }
 0x347   :  { %4467 = vmatprep.subr.bf16.mxu1 %v8607_v28 }
 0x34a   :  { %4468 = vmatpush1.bf16.msra.mxu1 %v8605_v11 }
 0x34b   :  { %4469 = vmatprep.subr.bf16.mxu1 %v8613_v53 }
 0x34e   :  { %4470 = vmatpush1.bf16.msra.mxu1 %v8611_v49 }
 0x34f   :  { %4471 = vmatprep.subr.bf16.mxu1 %v8619_v29 }
 0x352   :  { %4472 = vmatpush1.bf16.msra.mxu1 %v8617_v32 }
 0x353   :  { %4473 = vmatprep.subr.bf16.mxu1 %v8625_v3 }
 0x356   :  { %4474 = vmatpush1.bf16.msra.mxu1 %v8623_v33  ;;  %v8683_v33 = vld [vmem:[#allocation11 + $0x188] ss:$24 sps:$4 sm:$0xff]  }
 0x357   :  { %4475 = vmatprep.subr.bf16.mxu1 %v8631_v35 }
 0x35a   :  { %4476 = vmatpush1.bf16.msra.mxu1 %v8629_v36 }
 0x35b   :  { %6419 = vmatprep.subr.bf16.mxu1 %v8637_v37  ;;  %v8680_v37 = vld [vmem:[#allocation11 + $0x300] ss:$24 sps:$4 sm:$0xff]  }
 0x35d   :  { %4478 = vmatmul.mubr.bf16.vlgmr.msra.gmra.mrb[12].mxu1 %v9479_v17  ;;  %v2634_v17 = vrot.slane %v9493_v56, %v9432_v30 }
 0x35e   :  { %6420 = vmatpush1.bf16.msra.mxu1 %v8635_v38 }
 0x35f   :  { %6421 = vmatprep.subr.bf16.mxu1 %v8643_v42  ;;  %v8688_v42 = vld [vmem:[#allocation11 + $0x334] ss:$24 sps:$4 sm:$0xff]  }
 0x362   :  { %6422 = vmatpush1.bf16.msra.mxu1 %v8641_v43  ;;  %v8691_v43 = vld [vmem:[#allocation11 + $0x1bc] ss:$24 sps:$4 sm:$0xff]  }
 0x363   :  { %6423 = vmatprep.subr.bf16.mxu1 %v8649_v45  ;;  %v8689_v45 = vld [vmem:[#allocation11 + $0x1b8] ss:$24 sps:$4 sm:$0xff]  }
 0x366   :  { %6424 = vmatpush1.bf16.msra.mxu1 %v8647_v47  ;;  %v8686_v47 = vld [vmem:[#allocation11 + $0x330] ss:$24 sps:$4 sm:$0xff]  }
 0x367   :  { %6425 = vmatprep.subr.bf16.mxu1 %v8655_v48  ;;  %v8697_v48 = vld [vmem:[#allocation11 + $0x1ec] ss:$24 sps:$4 sm:$0xff]  }
 0x36a   :  { %6426 = vmatpush1.bf16.msra.mxu1 %v8653_v52  ;;  %v8694_v52 = vld [vmem:[#allocation11 + $0x364] ss:$24 sps:$4 sm:$0xff]  }
 0x36b   :  { %6427 = vmatprep.subr.bf16.mxu1 %v8661_v54  ;;  %v8695_v54 = vld [vmem:[#allocation11 + $0x1e8] ss:$24 sps:$4 sm:$0xff]  }
 0x36e   :  { %6428 = vmatpush1.bf16.msra.mxu1 %v8659_v55  ;;  %v8692_v55 = vld [vmem:[#allocation11 + $0x360] ss:$24 sps:$4 sm:$0xff]  }
 0x36f   :  { %6429 = vmatprep.subr.bf16.mxu1 %v8667_v57  ;;  %v8703_v57 = vld [vmem:[#allocation11 + $0x21c] ss:$24 sps:$4 sm:$0xff]  }
 0x370   :  { %v4221_v50 = vpop.f32.mrb[8].mxu1  ;;  %v4350_v60 = vpop.f32.mrb[8].mxu0 }
 0x371   :  { %v7631_v44 = vadd.f32 %v4221_v50, %v2634_v17  ;;  %v7635_v61 = vadd.f32 %v4350_v60, %v2642_v39  ;;  %v4223_v62 = vpop.f32.mrb[9].mxu1  ;;  %v4352_v0 = vpop.f32.mrb[9].mxu0  ;;  %v8704_v50 = vld [vmem:[#allocation11 + $0x3c0] ss:$24 sps:$4 sm:$0xff]   ;;  %v8715_v60 = vld [vmem:[#allocation11 + $0x27c] ss:$24 sps:$4 sm:$0xff]  }
 0x372   :  { %v7632_v1 = vadd.f32 %v4223_v62, %v2638_v59  ;;  %v7636_v2 = vadd.f32 %v4352_v0, %v2646_v40  ;;  %6430 = vmatpush1.bf16.msra.mxu1 %v8665_v58  ;;  %v4225_v5 = vpop.f32.mrb[10].mxu1  ;;  %v4354_v6 = vpop.f32.mrb[10].mxu0  ;;  %v8698_v58 = vld [vmem:[#allocation11 + $0x390] ss:$24 sps:$4 sm:$0xff]   ;;  %v8721_v0 = vld [vmem:[#allocation11 + $0x2ac] ss:$24 sps:$4 sm:$0xff]  }
 0x373   :  { %vm4488_vm12 = vcmp.ge.f32.partialorder %v7631_v44, 0.0  ;;  %v4500_v10 = vmul.f32 0.01, %v7631_v44  ;;  %vm4490_vm13 = vcmp.ge.f32.partialorder %v7635_v61, 0.0  ;;  %v4502_v12 = vmul.f32 0.01, %v7635_v61  ;;  %6431 = vmatprep.subr.bf16.mxu1 %v8673_v41 }
 0x374   :  { %vm4489_vm14 = vcmp.ge.f32.partialorder %v7632_v1, 0.0  ;;  %v4501_v13 = vmul.f32 0.01, %v7632_v1  ;;  %vm4491_vm15 = vcmp.ge.f32.partialorder %v7636_v2, 0.0  ;;  %v4503_v14 = vmul.f32 0.01, %v7636_v2 }
 0x375   :  { %v7633_v15 = vadd.f32 %v4225_v5, %v2634_v17  ;;  %v7637_v16 = vadd.f32 %v4354_v6, %v2642_v39  ;;  %v4227_v18 = vpop.f32.mrb[11].mxu1  ;;  %v4356_v51 = vpop.f32.mrb[11].mxu0  ;;  %v4512_v19 = vsel %vm4488_vm12, %v7631_v44, %v4500_v10  ;;  %v4514_v20 = vsel %vm4490_vm13, %v7635_v61, %v4502_v12  ;;  %v8700_v17 = vld [vmem:[#allocation11 + $0x394] ss:$24 sps:$4 sm:$0xff]   ;;  %v8701_v39 = vld [vmem:[#allocation11 + $0x218] ss:$24 sps:$4 sm:$0xff]  }
 0x376   :  { %v7634_v21 = vadd.f32 %v4227_v18, %v2638_v59  ;;  %v7638_v22 = vadd.f32 %v4356_v51, %v2646_v40  ;;  %6432 = vmatpush1.bf16.msra.mxu1 %v8671_v8  ;;  %v4513_v53 = vsel %vm4489_vm14, %v7632_v1, %v4501_v13  ;;  %v4515_v49 = vsel %vm4491_vm15, %v7636_v2, %v4503_v14  ;;  %v8709_v59 = vld [vmem:[#allocation11 + $0x24c] ss:$24 sps:$4 sm:$0xff]   ;;  %v8707_v41 = vld [vmem:[#allocation11 + $0x248] ss:$24 sps:$4 sm:$0xff]   ;;  %v8713_v61 = vld [vmem:[#allocation11 + $0x278] ss:$24 sps:$4 sm:$0xff]  }
 0x377   :  { %vm4494_vm0 = vcmp.ge.f32.partialorder %v7633_v15, 0.0  ;;  %v4506_v25 = vmul.f32 0.01, %v7633_v15  ;;  %vm4496_vm1 = vcmp.ge.f32.partialorder %v7637_v16, 0.0  ;;  %v4508_v26 = vmul.f32 0.01, %v7637_v16  ;;  %6433 = vmatprep.subr.bf16.mxu1 %v8679_v9 }
 0x378   :  { %vm4495_vm2 = vcmp.ge.f32.partialorder %v7634_v21, 0.0  ;;  %v4507_v7 = vmul.f32 0.01, %v7634_v21  ;;  %vm4497_vm3 = vcmp.ge.f32.partialorder %v7638_v22, 0.0  ;;  %v4509_v63 = vmul.f32 0.01, %v7638_v22 }
 0x379   :  { %v4518_v28 = vsel %vm4494_vm0, %v7633_v15, %v4506_v25  ;;  %v4520_v11 = vsel %vm4496_vm1, %v7637_v16, %v4508_v26  ;;  %v8706_v40 = vld [vmem:[#allocation11 + $0x3c4] ss:$24 sps:$4 sm:$0xff]   ;;  %v8712_v44 = vld [vmem:[#allocation11 + $0x3f4] ss:$24 sps:$4 sm:$0xff]   ;;  %v8710_v62 = vld [vmem:[#allocation11 + $0x3f0] ss:$24 sps:$4 sm:$0xff]  }
 0x37a   :  { %v9505_v29 = vpack.c.bf16 %v4518_v28, %v4512_v19  ;;  %v9507_v32 = vpack.c.bf16 %v4520_v11, %v4514_v20  ;;  %6434 = vmatpush1.bf16.msra.mxu1 %v8677_v23  ;;  %v4519_v3 = vsel %vm4495_vm2, %v7634_v21, %v4507_v7  ;;  %v4521_v35 = vsel %vm4497_vm3, %v7638_v22, %v4509_v63  ;;  %v8718_v1 = vld [vmem:[#allocation11 + $0x424] ss:$24 sps:$4 sm:$0xff]   ;;  %v8719_v2 = vld [vmem:[#allocation11 + $0x2a8] ss:$24 sps:$4 sm:$0xff]   ;;  %v8724_v8 = vld [vmem:[#allocation11 + $0x454] ss:$24 sps:$4 sm:$0xff]  }
 0x37b   :  { %v9509_v36 = vpack.c.bf16 %v4519_v3, %v4513_v53  ;;  %6435 = vmatprep.subr.bf16.mxu1 %v8685_v24  ;;  %v9511_v38 = vpack.c.bf16 %v4521_v35, %v4515_v49  ;;  %v8716_v5 = vld [vmem:[#allocation11 + $0x420] ss:$24 sps:$4 sm:$0xff]   ;;  %v8727_v6 = vld [vmem:[#allocation11 + $0x2dc] ss:$24 sps:$4 sm:$0xff]   ;;  %v8722_v10 = vld [vmem:[#allocation11 + $0x450] ss:$24 sps:$4 sm:$0xff]  }
 0x37c   :  { %v8725_v9 = vld [vmem:[#allocation11 + $0x2d8] ss:$24 sps:$4 sm:$0xff]   ;;  %v8733_v12 = vld [vmem:[#allocation11 + $0x30c] ss:$24 sps:$4 sm:$0xff]   ;;  %v8731_v14 = vld [vmem:[#allocation11 + $0x308] ss:$24 sps:$4 sm:$0xff]  }
 0x37d   :  { %6322 = vmatprep.mubr.bf16.mxu0 %v9509_v36  ;;  %6451 = vmatprep.mubr.bf16.mxu1 %v9509_v36  ;;  %v8730_v13 = vld [vmem:[#allocation11 + $0x484] ss:$24 sps:$4 sm:$0xff]   ;;  %v8728_v15 = vld [vmem:[#allocation11 + $0x480] ss:$24 sps:$4 sm:$0xff]   ;;  %v8736_v18 = vld [vmem:[#allocation11 + $0x4b4] ss:$24 sps:$4 sm:$0xff]  }
 0x37e   :  { %6323 = vmatmul.mubr.bf16.vlgmr.msra.gmra.mrb[12].mxu0 %v9505_v29  ;;  %6436 = vmatpush1.bf16.msra.mxu1 %v8683_v33  ;;  %v8739_v16 = vld [vmem:[#allocation11 + $0x33c] ss:$24 sps:$4 sm:$0xff]   ;;  %v8737_v51 = vld [vmem:[#allocation11 + $0x338] ss:$24 sps:$4 sm:$0xff]   ;;  %v8745_v20 = vld [vmem:[#allocation11 + $0x36c] ss:$24 sps:$4 sm:$0xff]  }
 0x37f   :  { %6334 = vmatpush1.bf16.msra.mxu0 %v8680_v37  ;;  %6365 = vmatprep.mubr.bf16.mxu0 %v9511_v38  ;;  %v8734_v19 = vld [vmem:[#allocation11 + $0x4b0] ss:$24 sps:$4 sm:$0xff]   ;;  %v8742_v21 = vld [vmem:[#allocation11 + $0x4e4] ss:$24 sps:$4 sm:$0xff]   ;;  %v8740_v23 = vld [vmem:[#allocation11 + $0x4e0] ss:$24 sps:$4 sm:$0xff]  }
 0x380   :  { %6335 = vmatprep.subr.bf16.mxu0 %v8688_v42  ;;  %6437 = vmatprep.subr.bf16.mxu1 %v8691_v43  ;;  %v8743_v22 = vld [vmem:[#allocation11 + $0x368] ss:$24 sps:$4 sm:$0xff]   ;;  %v8751_v24 = vld [vmem:[#allocation11 + $0x39c] ss:$24 sps:$4 sm:$0xff]   ;;  %v8749_v26 = vld [vmem:[#allocation11 + $0x398] ss:$24 sps:$4 sm:$0xff]  }
 0x381   :  { %v8748_v25 = vld [vmem:[#allocation11 + $0x514] ss:$24 sps:$4 sm:$0xff]   ;;  %v8746_v7 = vld [vmem:[#allocation11 + $0x510] ss:$24 sps:$4 sm:$0xff]   ;;  %v8754_v28 = vld [vmem:[#allocation11 + $0x544] ss:$24 sps:$4 sm:$0xff]  }
 0x382   :  { %6438 = vmatpush1.bf16.msra.mxu1 %v8689_v45  ;;  %v8757_v63 = vld [vmem:[#allocation11 + $0x3cc] ss:$24 sps:$4 sm:$0xff]   ;;  %v8755_v11 = vld [vmem:[#allocation11 + $0x3c8] ss:$24 sps:$4 sm:$0xff]   ;;  %v8763_v49 = vld [vmem:[#allocation11 + $0x3fc] ss:$24 sps:$4 sm:$0xff]  }
 0x383   :  { %6336 = vmatpush1.bf16.msra.mxu0 %v8686_v47  ;;  %6439 = vmatprep.subr.bf16.mxu1 %v8697_v48  ;;  %v8752_v53 = vld [vmem:[#allocation11 + $0x540] ss:$24 sps:$4 sm:$0xff]   ;;  %v8760_v3 = vld [vmem:[#allocation11 + $0x574] ss:$24 sps:$4 sm:$0xff]   ;;  %v8758_v35 = vld [vmem:[#allocation11 + $0x570] ss:$24 sps:$4 sm:$0xff]  }
 0x384   :  { %6337 = vmatprep.subr.bf16.mxu0 %v8694_v52  ;;  %v8761_v33 = vld [vmem:[#allocation11 + $0x3f8] ss:$24 sps:$4 sm:$0xff]   ;;  %v8769_v37 = vld [vmem:[#allocation11 + $0x42c] ss:$24 sps:$4 sm:$0xff]   ;;  %v8767_v43 = vld [vmem:[#allocation11 + $0x428] ss:$24 sps:$4 sm:$0xff]  }
 0x385   :  { %v8766_v42 = vld [vmem:[#allocation11 + $0x5a4] ss:$24 sps:$4 sm:$0xff]   ;;  %v8764_v45 = vld [vmem:[#allocation11 + $0x5a0] ss:$24 sps:$4 sm:$0xff]   ;;  %v8772_v48 = vld [vmem:[#allocation11 + $0x5d4] ss:$24 sps:$4 sm:$0xff]  }
 0x386   :  { %6440 = vmatpush1.bf16.msra.mxu1 %v8695_v54  ;;  %v8775_v47 = vld [vmem:[#allocation11 + $0x45c] ss:$24 sps:$4 sm:$0xff]   ;;  %v8773_v52 = vld [vmem:[#allocation11 + $0x458] ss:$24 sps:$4 sm:$0xff]  }
 0x387   :  { %6338 = vmatpush1.bf16.msra.mxu0 %v8692_v55  ;;  %6441 = vmatprep.subr.bf16.mxu1 %v8703_v57  ;;  %v8770_v54 = vld [vmem:[#allocation11 + $0x5d0] ss:$24 sps:$4 sm:$0xff]   ;;  %v8778_v55 = vld [vmem:[#allocation11 + $0x48c] ss:$24 sps:$4 sm:$0xff]  }
 0x388   :  { %6339 = vmatprep.subr.bf16.mxu0 %v8700_v17  ;;  %v8802_v57 = vld [vmem:[#allocation11 + $0x604] ss:$24 sps:$4 sm:$0xff]   ;;  %v8776_v17 = vld [vmem:[#allocation11 + $0x488] ss:$24 sps:$4 sm:$0xff]  }
 0x38a   :  { %6442 = vmatpush1.bf16.msra.mxu1 %v8701_v39  ;;  %v8781_v39 = vld [vmem:[#allocation11 + $0x4bc] ss:$24 sps:$4 sm:$0xff]  }
 0x38b   :  { %6340 = vmatpush1.bf16.msra.mxu0 %v8698_v58  ;;  %6443 = vmatprep.subr.bf16.mxu1 %v8709_v59  ;;  %v8800_v58 = vld [vmem:[#allocation11 + $0x600] ss:$24 sps:$4 sm:$0xff]   ;;  %v8808_v59 = vld [vmem:[#allocation11 + $0x634] ss:$24 sps:$4 sm:$0xff]  }
 0x38c   :  { %6341 = vmatprep.subr.bf16.mxu0 %v8706_v40  ;;  %v8779_v40 = vld [vmem:[#allocation11 + $0x4b8] ss:$24 sps:$4 sm:$0xff]  }
 0x38e   :  { %6444 = vmatpush1.bf16.msra.mxu1 %v8707_v41  ;;  %v8784_v41 = vld [vmem:[#allocation11 + $0x4ec] ss:$24 sps:$4 sm:$0xff]  }
 0x38f   :  { %6342 = vmatpush1.bf16.msra.mxu0 %v8704_v50  ;;  %6445 = vmatprep.subr.bf16.mxu1 %v8715_v60  ;;  %v8806_v50 = vld [vmem:[#allocation11 + $0x630] ss:$24 sps:$4 sm:$0xff]   ;;  %v8814_v60 = vld [vmem:[#allocation11 + $0x664] ss:$24 sps:$4 sm:$0xff]  }
 0x390   :  { %6343 = vmatprep.subr.bf16.mxu0 %v8712_v44  ;;  %v8782_v44 = vld [vmem:[#allocation11 + $0x4e8] ss:$24 sps:$4 sm:$0xff]  }
 0x392   :  { %6446 = vmatpush1.bf16.msra.mxu1 %v8713_v61  ;;  %v8787_v61 = vld [vmem:[#allocation11 + $0x51c] ss:$24 sps:$4 sm:$0xff]  }
 0x393   :  { %6344 = vmatpush1.bf16.msra.mxu0 %v8710_v62  ;;  %6447 = vmatprep.subr.bf16.mxu1 %v8721_v0  ;;  %v8812_v62 = vld [vmem:[#allocation11 + $0x660] ss:$24 sps:$4 sm:$0xff]   ;;  %v8820_v0 = vld [vmem:[#allocation11 + $0x694] ss:$24 sps:$4 sm:$0xff]  }
 0x394   :  { %6345 = vmatprep.subr.bf16.mxu0 %v8718_v1  ;;  %v8785_v1 = vld [vmem:[#allocation11 + $0x518] ss:$24 sps:$4 sm:$0xff]  }
 0x396   :  { %6448 = vmatpush1.bf16.msra.mxu1 %v8719_v2  ;;  %v8790_v2 = vld [vmem:[#allocation11 + $0x54c] ss:$24 sps:$4 sm:$0xff]  }
 0x397   :  { %6346 = vmatpush1.bf16.msra.mxu0 %v8716_v5  ;;  %6449 = vmatprep.subr.bf16.mxu1 %v8727_v6  ;;  %v8818_v5 = vld [vmem:[#allocation11 + $0x690] ss:$24 sps:$4 sm:$0xff]   ;;  %v8826_v6 = vld [vmem:[#allocation11 + $0x6c4] ss:$24 sps:$4 sm:$0xff]  }
 0x398   :  { %6347 = vmatprep.subr.bf16.mxu0 %v8724_v8  ;;  %v8788_v8 = vld [vmem:[#allocation11 + $0x548] ss:$24 sps:$4 sm:$0xff]  }
 0x39a   :  { %6450 = vmatpush1.bf16.msra.mxu1 %v8725_v9  ;;  %v8793_v9 = vld [vmem:[#allocation11 + $0x57c] ss:$24 sps:$4 sm:$0xff]  }
 0x39b   :  { %6348 = vmatpush1.bf16.msra.mxu0 %v8722_v10  ;;  %6462 = vmatprep.subr.bf16.mxu1 %v8733_v12  ;;  %v8824_v10 = vld [vmem:[#allocation11 + $0x6c0] ss:$24 sps:$4 sm:$0xff]   ;;  %v8832_v12 = vld [vmem:[#allocation11 + $0x6f4] ss:$24 sps:$4 sm:$0xff]  }
 0x39c   :  { %6349 = vmatprep.subr.bf16.mxu0 %v8730_v13  ;;  %v8791_v13 = vld [vmem:[#allocation11 + $0x578] ss:$24 sps:$4 sm:$0xff]  }
 0x39d   :  { %6452 = vmatmul.mubr.bf16.vlgmr.msra.gmra.mrb[16].mxu1 %v9505_v29 }
 0x39e   :  { %6463 = vmatpush1.bf16.msra.mxu1 %v8731_v14  ;;  %6494 = vmatprep.mubr.bf16.mxu1 %v9511_v38  ;;  %v8796_v14 = vld [vmem:[#allocation11 + $0x5ac] ss:$24 sps:$4 sm:$0xff]  }
 0x39f   :  { %6350 = vmatpush1.bf16.msra.mxu0 %v8728_v15  ;;  %6464 = vmatprep.subr.bf16.mxu1 %v8739_v16  ;;  %v8830_v15 = vld [vmem:[#allocation11 + $0x6f0] ss:$24 sps:$4 sm:$0xff]   ;;  %v8838_v16 = vld [vmem:[#allocation11 + $0x724] ss:$24 sps:$4 sm:$0xff]  }
 0x3a0   :  { %6351 = vmatprep.subr.bf16.mxu0 %v8736_v18  ;;  %v8794_v18 = vld [vmem:[#allocation11 + $0x5a8] ss:$24 sps:$4 sm:$0xff]  }
 0x3a2   :  { %6465 = vmatpush1.bf16.msra.mxu1 %v8737_v51  ;;  %v8799_v51 = vld [vmem:[#allocation11 + $0x5dc] ss:$24 sps:$4 sm:$0xff]  }
 0x3a3   :  { %6352 = vmatpush1.bf16.msra.mxu0 %v8734_v19  ;;  %6466 = vmatprep.subr.bf16.mxu1 %v8745_v20  ;;  %v8836_v19 = vld [vmem:[#allocation11 + $0x720] ss:$24 sps:$4 sm:$0xff]   ;;  %v8844_v20 = vld [vmem:[#allocation11 + $0x754] ss:$24 sps:$4 sm:$0xff]  }
 0x3a4   :  { %6353 = vmatprep.subr.bf16.mxu0 %v8742_v21  ;;  %v8797_v21 = vld [vmem:[#allocation11 + $0x5d8] ss:$24 sps:$4 sm:$0xff]  }
 0x3a6   :  { %6467 = vmatpush1.bf16.msra.mxu1 %v8743_v22  ;;  %v8805_v22 = vld [vmem:[#allocation11 + $0x60c] ss:$24 sps:$4 sm:$0xff]  }
 0x3a7   :  { %6354 = vmatpush1.bf16.msra.mxu0 %v8740_v23  ;;  %6468 = vmatprep.subr.bf16.mxu1 %v8751_v24  ;;  %v8842_v23 = vld [vmem:[#allocation11 + $0x750] ss:$24 sps:$4 sm:$0xff]   ;;  %v8850_v24 = vld [vmem:[#allocation11 + $0x784] ss:$24 sps:$4 sm:$0xff]  }
 0x3a8   :  { %6355 = vmatprep.subr.bf16.mxu0 %v8748_v25  ;;  %v8803_v25 = vld [vmem:[#allocation11 + $0x608] ss:$24 sps:$4 sm:$0xff]  }
 0x3aa   :  { %6469 = vmatpush1.bf16.msra.mxu1 %v8749_v26  ;;  %v8811_v26 = vld [vmem:[#allocation11 + $0x63c] ss:$24 sps:$4 sm:$0xff]  }
 0x3ab   :  { %6356 = vmatpush1.bf16.msra.mxu0 %v8746_v7  ;;  %6470 = vmatprep.subr.bf16.mxu1 %v8757_v63  ;;  %v8848_v7 = vld [vmem:[#allocation11 + $0x780] ss:$24 sps:$4 sm:$0xff]   ;;  %v8856_v63 = vld [vmem:[#allocation11 + $0x7b4] ss:$24 sps:$4 sm:$0xff]  }
 0x3ac   :  { %6357 = vmatprep.subr.bf16.mxu0 %v8754_v28  ;;  %v8809_v28 = vld [vmem:[#allocation11 + $0x638] ss:$24 sps:$4 sm:$0xff]  }
 0x3ae   :  { %6471 = vmatpush1.bf16.msra.mxu1 %v8755_v11  ;;  %v8817_v11 = vld [vmem:[#allocation11 + $0x66c] ss:$24 sps:$4 sm:$0xff]  }
 0x3af   :  { %6358 = vmatpush1.bf16.msra.mxu0 %v8752_v53  ;;  %6472 = vmatprep.subr.bf16.mxu1 %v8763_v49  ;;  %v8854_v53 = vld [vmem:[#allocation11 + $0x7b0] ss:$24 sps:$4 sm:$0xff]   ;;  %v8862_v49 = vld [vmem:[#allocation11 + $0x7e4] ss:$24 sps:$4 sm:$0xff]  }
 0x3b0   :  { %6359 = vmatprep.subr.bf16.mxu0 %v8760_v3  ;;  %v8815_v3 = vld [vmem:[#allocation11 + $0x668] ss:$24 sps:$4 sm:$0xff]  }
 0x3b2   :  { %6473 = vmatpush1.bf16.msra.mxu1 %v8761_v33  ;;  %v8823_v33 = vld [vmem:[#allocation11 + $0x69c] ss:$24 sps:$4 sm:$0xff]  }
 0x3b3   :  { %6360 = vmatpush1.bf16.msra.mxu0 %v8758_v35  ;;  %6474 = vmatprep.subr.bf16.mxu1 %v8769_v37  ;;  %v8860_v35 = vld [vmem:[#allocation11 + $0x7e0] ss:$24 sps:$4 sm:$0xff]   ;;  %v8868_v37 = vld [vmem:[#allocation11 + $0x814] ss:$24 sps:$4 sm:$0xff]  }
 0x3b4   :  { %6361 = vmatprep.subr.bf16.mxu0 %v8766_v42  ;;  %v8821_v42 = vld [vmem:[#allocation11 + $0x698] ss:$24 sps:$4 sm:$0xff]  }
 0x3b6   :  { %6475 = vmatpush1.bf16.msra.mxu1 %v8767_v43  ;;  %v8829_v43 = vld [vmem:[#allocation11 + $0x6cc] ss:$24 sps:$4 sm:$0xff]  }
 0x3b7   :  { %6362 = vmatpush1.bf16.msra.mxu0 %v8764_v45  ;;  %6476 = vmatprep.subr.bf16.mxu1 %v8775_v47  ;;  %v8866_v45 = vld [vmem:[#allocation11 + $0x810] ss:$24 sps:$4 sm:$0xff]   ;;  %v8874_v47 = vld [vmem:[#allocation11 + $0x844] ss:$24 sps:$4 sm:$0xff]  }
 0x3b8   :  { %6363 = vmatprep.subr.bf16.mxu0 %v8772_v48  ;;  %v8827_v48 = vld [vmem:[#allocation11 + $0x6c8] ss:$24 sps:$4 sm:$0xff]  }
 0x3ba   :  { %6477 = vmatpush1.bf16.msra.mxu1 %v8773_v52  ;;  %v8835_v52 = vld [vmem:[#allocation11 + $0x6fc] ss:$24 sps:$4 sm:$0xff]  }
 0x3bb   :  { %6364 = vmatpush1.bf16.msra.mxu0 %v8770_v54  ;;  %6478 = vmatprep.subr.bf16.mxu1 %v8778_v55  ;;  %v8872_v54 = vld [vmem:[#allocation11 + $0x840] ss:$24 sps:$4 sm:$0xff]   ;;  %v8880_v55 = vld [vmem:[#allocation11 + $0x874] ss:$24 sps:$4 sm:$0xff]  }
 0x3bc   :  { %6376 = vmatprep.subr.bf16.mxu0 %v8802_v57  ;;  %v8833_v57 = vld [vmem:[#allocation11 + $0x6f8] ss:$24 sps:$4 sm:$0xff]  }
 0x3be   :  { %6366 = vmatmul.mubr.bf16.vlgmr.msra.gmra.mrb[12].mxu0 %v9507_v32  ;;  %6479 = vmatpush1.bf16.msra.mxu1 %v8776_v17  ;;  %v8841_v17 = vld [vmem:[#allocation11 + $0x72c] ss:$24 sps:$4 sm:$0xff]  }
 0x3bf   :  { %6480 = vmatprep.subr.bf16.mxu1 %v8781_v39  ;;  %6377 = vmatpush1.bf16.msra.mxu0 %v8800_v58  ;;  %v8878_v39 = vld [vmem:[#allocation11 + $0x870] ss:$24 sps:$4 sm:$0xff]   ;;  %v8886_v58 = vld [vmem:[#allocation11 + $0x8a4] ss:$24 sps:$4 sm:$0xff]  }
 0x3c0   :  { %6378 = vmatprep.subr.bf16.mxu0 %v8808_v59  ;;  %v8839_v59 = vld [vmem:[#allocation11 + $0x728] ss:$24 sps:$4 sm:$0xff]  }
 0x3c2   :  { %6481 = vmatpush1.bf16.msra.mxu1 %v8779_v40  ;;  %v8847_v40 = vld [vmem:[#allocation11 + $0x75c] ss:$24 sps:$4 sm:$0xff]  }
 0x3c3   :  { %6482 = vmatprep.subr.bf16.mxu1 %v8784_v41  ;;  %6379 = vmatpush1.bf16.msra.mxu0 %v8806_v50  ;;  %v8884_v41 = vld [vmem:[#allocation11 + $0x8a0] ss:$24 sps:$4 sm:$0xff]   ;;  %v8892_v50 = vld [vmem:[#allocation11 + $0x8d4] ss:$24 sps:$4 sm:$0xff]  }
 0x3c4   :  { %6380 = vmatprep.subr.bf16.mxu0 %v8814_v60  ;;  %v8845_v60 = vld [vmem:[#allocation11 + $0x758] ss:$24 sps:$4 sm:$0xff]  }
 0x3c6   :  { %6483 = vmatpush1.bf16.msra.mxu1 %v8782_v44  ;;  %v8853_v44 = vld [vmem:[#allocation11 + $0x78c] ss:$24 sps:$4 sm:$0xff]  }
 0x3c7   :  { %6484 = vmatprep.subr.bf16.mxu1 %v8787_v61  ;;  %6381 = vmatpush1.bf16.msra.mxu0 %v8812_v62  ;;  %v8890_v61 = vld [vmem:[#allocation11 + $0x8d0] ss:$24 sps:$4 sm:$0xff]   ;;  %v8898_v62 = vld [vmem:[#allocation11 + $0x14] ss:$24 sps:$4 sm:$0xff]  }
 0x3c8   :  { %6382 = vmatprep.subr.bf16.mxu0 %v8820_v0  ;;  %v8851_v0 = vld [vmem:[#allocation11 + $0x788] ss:$24 sps:$4 sm:$0xff]  }
 0x3ca   :  { %6485 = vmatpush1.bf16.msra.mxu1 %v8785_v1  ;;  %v8859_v1 = vld [vmem:[#allocation11 + $0x7bc] ss:$24 sps:$4 sm:$0xff]  }
 0x3cb   :  { %6486 = vmatprep.subr.bf16.mxu1 %v8790_v2  ;;  %6383 = vmatpush1.bf16.msra.mxu0 %v8818_v5  ;;  %v8857_v2 = vld [vmem:[#allocation11 + $0x7b8] ss:$24 sps:$4 sm:$0xff]   ;;  %v8865_v5 = vld [vmem:[#allocation11 + $0x7ec] ss:$24 sps:$4 sm:$0xff]  }
 0x3cc   :  { %6384 = vmatprep.subr.bf16.mxu0 %v8826_v6  ;;  %v8863_v6 = vld [vmem:[#allocation11 + $0x7e8] ss:$24 sps:$4 sm:$0xff]  }
 0x3ce   :  { %6487 = vmatpush1.bf16.msra.mxu1 %v8788_v8  ;;  %v8871_v8 = vld [vmem:[#allocation11 + $0x81c] ss:$24 sps:$4 sm:$0xff]  }
 0x3cf   :  { %6488 = vmatprep.subr.bf16.mxu1 %v8793_v9  ;;  %6385 = vmatpush1.bf16.msra.mxu0 %v8824_v10  ;;  %v8869_v9 = vld [vmem:[#allocation11 + $0x818] ss:$24 sps:$4 sm:$0xff]   ;;  %v8877_v10 = vld [vmem:[#allocation11 + $0x84c] ss:$24 sps:$4 sm:$0xff]  }
 0x3d0   :  { %6386 = vmatprep.subr.bf16.mxu0 %v8832_v12  ;;  %v8875_v12 = vld [vmem:[#allocation11 + $0x848] ss:$24 sps:$4 sm:$0xff]  }
 0x3d2   :  { %6489 = vmatpush1.bf16.msra.mxu1 %v8791_v13  ;;  %v8883_v13 = vld [vmem:[#allocation11 + $0x87c] ss:$24 sps:$4 sm:$0xff]  }
 0x3d3   :  { %6490 = vmatprep.subr.bf16.mxu1 %v8796_v14  ;;  %6387 = vmatpush1.bf16.msra.mxu0 %v8830_v15  ;;  %v8881_v14 = vld [vmem:[#allocation11 + $0x878] ss:$24 sps:$4 sm:$0xff]   ;;  %v8889_v15 = vld [vmem:[#allocation11 + $0x8ac] ss:$24 sps:$4 sm:$0xff]  }
 0x3d4   :  { %6388 = vmatprep.subr.bf16.mxu0 %v8838_v16  ;;  %v8887_v16 = vld [vmem:[#allocation11 + $0x8a8] ss:$24 sps:$4 sm:$0xff]  }
 0x3d6   :  { %6491 = vmatpush1.bf16.msra.mxu1 %v8794_v18  ;;  %v8895_v18 = vld [vmem:[#allocation11 + $0x8dc] ss:$24 sps:$4 sm:$0xff]  }
 0x3d7   :  { %6492 = vmatprep.subr.bf16.mxu1 %v8799_v51  ;;  %6389 = vmatpush1.bf16.msra.mxu0 %v8836_v19  ;;  %v8893_v51 = vld [vmem:[#allocation11 + $0x8d8] ss:$24 sps:$4 sm:$0xff]   ;;  %v2650_v19 = vrot.slane %v9493_v56, %v9472_v46 }
 0x3d8   :  { %6390 = vmatprep.subr.bf16.mxu0 %v8844_v20  ;;  %v2654_v20 = vrot.slane %v9493_v56, %v9475_v34 }
 0x3da   :  { %6493 = vmatpush1.bf16.msra.mxu1 %v8797_v21 }
 0x3db   :  { %6505 = vmatprep.subr.bf16.mxu1 %v8805_v22  ;;  %6391 = vmatpush1.bf16.msra.mxu0 %v8842_v23 }
 0x3dc   :  { %6392 = vmatprep.subr.bf16.mxu0 %v8850_v24 }
 0x3dd   :  { %6495 = vmatmul.mubr.bf16.vlgmr.msra.gmra.mrb[16].mxu1 %v9507_v32 }
 0x3de   :  { %6506 = vmatpush1.bf16.msra.mxu1 %v8803_v25 }
 0x3df   :  { %6507 = vmatprep.subr.bf16.mxu1 %v8811_v26  ;;  %6393 = vmatpush1.bf16.msra.mxu0 %v8848_v7 }
 0x3e0   :  { %6394 = vmatprep.subr.bf16.mxu0 %v8856_v63 }
 0x3e2   :  { %6508 = vmatpush1.bf16.msra.mxu1 %v8809_v28 }
 0x3e3   :  { %6509 = vmatprep.subr.bf16.mxu1 %v8817_v11  ;;  %6395 = vmatpush1.bf16.msra.mxu0 %v8854_v53 }
 0x3e4   :  { %6396 = vmatprep.subr.bf16.mxu0 %v8862_v49 }
 0x3e6   :  { %6510 = vmatpush1.bf16.msra.mxu1 %v8815_v3 }
 0x3e7   :  { %6511 = vmatprep.subr.bf16.mxu1 %v8823_v33  ;;  %6397 = vmatpush1.bf16.msra.mxu0 %v8860_v35 }
 0x3e8   :  { %6398 = vmatprep.subr.bf16.mxu0 %v8868_v37 }
 0x3ea   :  { %6512 = vmatpush1.bf16.msra.mxu1 %v8821_v42 }
 0x3eb   :  { %6513 = vmatprep.subr.bf16.mxu1 %v8829_v43  ;;  %6399 = vmatpush1.bf16.msra.mxu0 %v8866_v45  ;;  %v8896_v43 = vld [vmem:[#allocation11 + $0x10] ss:$24 sps:$4 sm:$0xff]   ;;  %v8901_v45 = vld [vmem:[#allocation11 + $0x44] ss:$24 sps:$4 sm:$0xff]  }
 0x3ec   :  { %6400 = vmatprep.subr.bf16.mxu0 %v8874_v47  ;;  %v8899_v47 = vld [vmem:[#allocation11 + $0x40] ss:$24 sps:$4 sm:$0xff]  }
 0x3ee   :  { %6514 = vmatpush1.bf16.msra.mxu1 %v8827_v48  ;;  %v8904_v48 = vld [vmem:[#allocation11 + $0x74] ss:$24 sps:$4 sm:$0xff]  }
 0x3ef   :  { %6515 = vmatprep.subr.bf16.mxu1 %v8835_v52  ;;  %6401 = vmatpush1.bf16.msra.mxu0 %v8872_v54  ;;  %v8902_v52 = vld [vmem:[#allocation11 + $0x70] ss:$24 sps:$4 sm:$0xff]   ;;  %v8907_v54 = vld [vmem:[#allocation11 + $0xa4] ss:$24 sps:$4 sm:$0xff]  }
 0x3f0   :  { %6402 = vmatprep.subr.bf16.mxu0 %v8880_v55  ;;  %v8905_v55 = vld [vmem:[#allocation11 + $0xa0] ss:$24 sps:$4 sm:$0xff]  }
 0x3f2   :  { %6516 = vmatpush1.bf16.msra.mxu1 %v8833_v57  ;;  %v8910_v57 = vld [vmem:[#allocation11 + $0xd4] ss:$24 sps:$4 sm:$0xff]  }
 0x3f3   :  { %6517 = vmatprep.subr.bf16.mxu1 %v8841_v17  ;;  %6403 = vmatpush1.bf16.msra.mxu0 %v8878_v39  ;;  %v8908_v17 = vld [vmem:[#allocation11 + $0xd0] ss:$24 sps:$4 sm:$0xff]   ;;  %v8913_v39 = vld [vmem:[#allocation11 + $0x104] ss:$24 sps:$4 sm:$0xff]  }
 0x3f4   :  { %6404 = vmatprep.subr.bf16.mxu0 %v8886_v58  ;;  %v8911_v58 = vld [vmem:[#allocation11 + $0x100] ss:$24 sps:$4 sm:$0xff]  }
 0x3f6   :  { %6518 = vmatpush1.bf16.msra.mxu1 %v8839_v59  ;;  %v8916_v59 = vld [vmem:[#allocation11 + $0x134] ss:$24 sps:$4 sm:$0xff]  }
 0x3f7   :  { %6519 = vmatprep.subr.bf16.mxu1 %v8847_v40  ;;  %6405 = vmatpush1.bf16.msra.mxu0 %v8884_v41  ;;  %v8919_v40 = vld [vmem:[#allocation11 + $0x164] ss:$24 sps:$4 sm:$0xff]   ;;  %v8917_v41 = vld [vmem:[#allocation11 + $0x160] ss:$24 sps:$4 sm:$0xff]  }
 0x3f8   :  { %6406 = vmatprep.subr.bf16.mxu0 %v8892_v50  ;;  %v8922_v50 = vld [vmem:[#allocation11 + $0x194] ss:$24 sps:$4 sm:$0xff]  }
 0x3fa   :  { %6520 = vmatpush1.bf16.msra.mxu1 %v8845_v60  ;;  %v8920_v60 = vld [vmem:[#allocation11 + $0x190] ss:$24 sps:$4 sm:$0xff]  }
 0x3fb   :  { %6521 = vmatprep.subr.bf16.mxu1 %v8853_v44  ;;  %6407 = vmatpush1.bf16.msra.mxu0 %v8890_v61  ;;  %v8925_v44 = vld [vmem:[#allocation11 + $0x1c4] ss:$24 sps:$4 sm:$0xff]   ;;  %v8923_v61 = vld [vmem:[#allocation11 + $0x1c0] ss:$24 sps:$4 sm:$0xff]  }
 0x3fc   :  { %6548 = vmatprep.subr.bf16.mxu0 %v8898_v62  ;;  %v8928_v62 = vld [vmem:[#allocation11 + $0x1f4] ss:$24 sps:$4 sm:$0xff]  }
 0x3fe   :  { %6522 = vmatpush1.bf16.msra.mxu1 %v8851_v0  ;;  %v8926_v0 = vld [vmem:[#allocation11 + $0x1f0] ss:$24 sps:$4 sm:$0xff]  }
 0x3ff   :  { %6523 = vmatprep.subr.bf16.mxu1 %v8859_v1  ;;  %v8931_v1 = vld [vmem:[#allocation11 + $0x224] ss:$24 sps:$4 sm:$0xff]  }
 0x402   :  { %6524 = vmatpush1.bf16.msra.mxu1 %v8857_v2  ;;  %v8929_v2 = vld [vmem:[#allocation11 + $0x220] ss:$24 sps:$4 sm:$0xff]  }
 0x403   :  { %6525 = vmatprep.subr.bf16.mxu1 %v8865_v5  ;;  %v8934_v5 = vld [vmem:[#allocation11 + $0x254] ss:$24 sps:$4 sm:$0xff]  }
 0x406   :  { %6526 = vmatpush1.bf16.msra.mxu1 %v8863_v6  ;;  %v8932_v6 = vld [vmem:[#allocation11 + $0x250] ss:$24 sps:$4 sm:$0xff]  }
 0x407   :  { %6527 = vmatprep.subr.bf16.mxu1 %v8871_v8  ;;  %v8937_v8 = vld [vmem:[#allocation11 + $0x284] ss:$24 sps:$4 sm:$0xff]  }
 0x40a   :  { %6528 = vmatpush1.bf16.msra.mxu1 %v8869_v9  ;;  %v8935_v9 = vld [vmem:[#allocation11 + $0x280] ss:$24 sps:$4 sm:$0xff]  }
 0x40b   :  { %6529 = vmatprep.subr.bf16.mxu1 %v8877_v10  ;;  %v8940_v10 = vld [vmem:[#allocation11 + $0x2b4] ss:$24 sps:$4 sm:$0xff]  }
 0x40e   :  { %6530 = vmatpush1.bf16.msra.mxu1 %v8875_v12  ;;  %v8938_v12 = vld [vmem:[#allocation11 + $0x2b0] ss:$24 sps:$4 sm:$0xff]  }
 0x40f   :  { %6531 = vmatprep.subr.bf16.mxu1 %v8883_v13  ;;  %v8943_v13 = vld [vmem:[#allocation11 + $0x2e4] ss:$24 sps:$4 sm:$0xff]  }
 0x412   :  { %6532 = vmatpush1.bf16.msra.mxu1 %v8881_v14  ;;  %v8941_v14 = vld [vmem:[#allocation11 + $0x2e0] ss:$24 sps:$4 sm:$0xff]  }
 0x413   :  { %6533 = vmatprep.subr.bf16.mxu1 %v8889_v15  ;;  %v8946_v15 = vld [vmem:[#allocation11 + $0x314] ss:$24 sps:$4 sm:$0xff]  }
 0x416   :  { %6534 = vmatpush1.bf16.msra.mxu1 %v8887_v16  ;;  %v8944_v16 = vld [vmem:[#allocation11 + $0x310] ss:$24 sps:$4 sm:$0xff]  }
 0x417   :  { %6535 = vmatprep.subr.bf16.mxu1 %v8895_v18  ;;  %v8949_v18 = vld [vmem:[#allocation11 + $0x344] ss:$24 sps:$4 sm:$0xff]  }
 0x41a   :  { %6536 = vmatpush1.bf16.msra.mxu1 %v8893_v51  ;;  %v8947_v51 = vld [vmem:[#allocation11 + $0x340] ss:$24 sps:$4 sm:$0xff]  }
 0x430   :  { %v4479_v21 = vpop.f32.mrb[12].mxu1 }
 0x431   :  { %v7639_v22 = vadd.f32 %v4479_v21, %v2650_v19  ;;  %v4481_v23 = vpop.f32.mrb[13].mxu1  ;;  %v8955_v21 = vld [vmem:[#allocation11 + $0x3a4] ss:$24 sps:$4 sm:$0xff]  }
 0x432   :  { %v7640_v24 = vadd.f32 %v4481_v23, %v2654_v20  ;;  %v4483_v25 = vpop.f32.mrb[14].mxu1  ;;  %v8958_v23 = vld [vmem:[#allocation11 + $0x3d4] ss:$24 sps:$4 sm:$0xff]  }
 0x433   :  { %v4504_v26 = vmul.f32 0.01, %v7639_v22  ;;  %v7641_v7 = vadd.f32 %v4483_v25, %v2650_v19  ;;  %v4485_v63 = vpop.f32.mrb[15].mxu1  ;;  %vm4492_vm4 = vcmp.ge.f32.partialorder %v7639_v22, 0.0  ;;  %v8952_v19 = vld [vmem:[#allocation11 + $0x374] ss:$24 sps:$4 sm:$0xff]  }
 0x434   :  { %v4505_v28 = vmul.f32 0.01, %v7640_v24  ;;  %v7642_v11 = vadd.f32 %v4485_v63, %v2654_v20  ;;  %vm4493_vm5 = vcmp.ge.f32.partialorder %v7640_v24, 0.0  ;;  %v8950_v20 = vld [vmem:[#allocation11 + $0x370] ss:$24 sps:$4 sm:$0xff]  }
 0x435   :  { %vm4498_vm6 = vcmp.ge.f32.partialorder %v7641_v7, 0.0  ;;  %v4510_v53 = vmul.f32 0.01, %v7641_v7  ;;  %v4516_v3 = vsel %vm4492_vm4, %v7639_v22, %v4504_v26  ;;  %v8953_v22 = vld [vmem:[#allocation11 + $0x3a0] ss:$24 sps:$4 sm:$0xff]  }
 0x436   :  { %vm4499_vm7 = vcmp.ge.f32.partialorder %v7642_v11, 0.0  ;;  %v4511_v49 = vmul.f32 0.01, %v7642_v11  ;;  %v4517_v56 = vsel %vm4493_vm5, %v7640_v24, %v4505_v28  ;;  %v8956_v24 = vld [vmem:[#allocation11 + $0x3d0] ss:$24 sps:$4 sm:$0xff]  }
 0x437   :  { %v4522_v33 = vsel %vm4498_vm6, %v7641_v7, %v4510_v53  ;;  %v8961_v25 = vld [vmem:[#allocation11 + $0x404] ss:$24 sps:$4 sm:$0xff]   ;;  %v8964_v26 = vld [vmem:[#allocation11 + $0x434] ss:$24 sps:$4 sm:$0xff]   ;;  %v8965_v63 = vld [vmem:[#allocation11 + $0x460] ss:$24 sps:$4 sm:$0xff]  }
 0x438   :  { %v9525_v35 = vpack.c.bf16 %v4522_v33, %v4516_v3  ;;  %v4523_v37 = vsel %vm4499_vm7, %v7642_v11, %v4511_v49  ;;  %v8967_v7 = vld [vmem:[#allocation11 + $0x464] ss:$24 sps:$4 sm:$0xff]   ;;  %v8970_v28 = vld [vmem:[#allocation11 + $0x494] ss:$24 sps:$4 sm:$0xff]   ;;  %v8968_v11 = vld [vmem:[#allocation11 + $0x490] ss:$24 sps:$4 sm:$0xff]  }
 0x439   :  { %v9527_v42 = vpack.c.bf16 %v4523_v37, %v4517_v56  ;;  %v8973_v53 = vld [vmem:[#allocation11 + $0x4c4] ss:$24 sps:$4 sm:$0xff]   ;;  %v8971_v49 = vld [vmem:[#allocation11 + $0x4c0] ss:$24 sps:$4 sm:$0xff]   ;;  %v8976_v3 = vld [vmem:[#allocation11 + $0x4f4] ss:$24 sps:$4 sm:$0xff]  }
 0x43a   :  { %v8974_v33 = vld [vmem:[#allocation11 + $0x4f0] ss:$24 sps:$4 sm:$0xff]   ;;  %v8979_v56 = vld [vmem:[#allocation11 + $0x524] ss:$24 sps:$4 sm:$0xff]   ;;  %v8977_v37 = vld [vmem:[#allocation11 + $0x520] ss:$24 sps:$4 sm:$0xff]  }
 0x43b   :  { %6408 = vmatprep.mubr.bf16.mxu0 %v9527_v42  ;;  %6537 = vmatprep.mubr.bf16.mxu1 %v9527_v42 }
 0x43c   :  { %6409 = vmatmul.mubr.bf16.vlgmr.msra.gmra.mrb[12].mxu0 %v9525_v35  ;;  %6538 = vmatmul.mubr.bf16.vlgmr.msra.gmra.mrb[16].mxu1 %v9525_v35 }
 0x43d   :  { %6549 = vmatpush1.bf16.msra.mxu0 %v8896_v43  ;;  %6580 = vmatprep.mubr.bf16.mxu0 %v9509_v36  ;;  %v8914_v36 = vld [vmem:[#allocation11 + $0x130] ss:$24 sps:$4 sm:$0xff]   ;;  %v8982_v43 = vld [vmem:[#allocation11 + $0x554] ss:$24 sps:$4 sm:$0xff]  }
 0x43e   :  { %6550 = vmatprep.subr.bf16.mxu0 %v8901_v45  ;;  %v8980_v45 = vld [vmem:[#allocation11 + $0x550] ss:$24 sps:$4 sm:$0xff]  }
 0x441   :  { %6551 = vmatpush1.bf16.msra.mxu0 %v8899_v47  ;;  %v8985_v47 = vld [vmem:[#allocation11 + $0x584] ss:$24 sps:$4 sm:$0xff]  }
 0x442   :  { %6552 = vmatprep.subr.bf16.mxu0 %v8904_v48  ;;  %v8983_v48 = vld [vmem:[#allocation11 + $0x580] ss:$24 sps:$4 sm:$0xff]  }
 0x445   :  { %6553 = vmatpush1.bf16.msra.mxu0 %v8902_v52  ;;  %v8988_v52 = vld [vmem:[#allocation11 + $0x5b4] ss:$24 sps:$4 sm:$0xff]  }
 0x446   :  { %6554 = vmatprep.subr.bf16.mxu0 %v8907_v54  ;;  %v8986_v54 = vld [vmem:[#allocation11 + $0x5b0] ss:$24 sps:$4 sm:$0xff]  }
 0x449   :  { %6555 = vmatpush1.bf16.msra.mxu0 %v8905_v55  ;;  %v8991_v55 = vld [vmem:[#allocation11 + $0x5e4] ss:$24 sps:$4 sm:$0xff]  }
 0x44a   :  { %6556 = vmatprep.subr.bf16.mxu0 %v8910_v57  ;;  %v8989_v57 = vld [vmem:[#allocation11 + $0x5e0] ss:$24 sps:$4 sm:$0xff]  }
 0x44d   :  { %6557 = vmatpush1.bf16.msra.mxu0 %v8908_v17  ;;  %v8994_v17 = vld [vmem:[#allocation11 + $0x614] ss:$24 sps:$4 sm:$0xff]  }
 0x44e   :  { %6558 = vmatprep.subr.bf16.mxu0 %v8913_v39  ;;  %v8992_v39 = vld [vmem:[#allocation11 + $0x610] ss:$24 sps:$4 sm:$0xff]  }
 0x451   :  { %6559 = vmatpush1.bf16.msra.mxu0 %v8911_v58  ;;  %v8997_v58 = vld [vmem:[#allocation11 + $0x644] ss:$24 sps:$4 sm:$0xff]  }
 0x452   :  { %6560 = vmatprep.subr.bf16.mxu0 %v8916_v59  ;;  %v8995_v59 = vld [vmem:[#allocation11 + $0x640] ss:$24 sps:$4 sm:$0xff]  }
 0x455   :  { %6561 = vmatpush1.bf16.msra.mxu0 %v8914_v36  ;;  %v9000_v36 = vld [vmem:[#allocation11 + $0x674] ss:$24 sps:$4 sm:$0xff]  }
 0x456   :  { %6562 = vmatprep.subr.bf16.mxu0 %v8919_v40  ;;  %v8998_v40 = vld [vmem:[#allocation11 + $0x670] ss:$24 sps:$4 sm:$0xff]  }
 0x459   :  { %6563 = vmatpush1.bf16.msra.mxu0 %v8917_v41  ;;  %v9003_v41 = vld [vmem:[#allocation11 + $0x6a4] ss:$24 sps:$4 sm:$0xff]  }
 0x45a   :  { %6564 = vmatprep.subr.bf16.mxu0 %v8922_v50  ;;  %v9001_v50 = vld [vmem:[#allocation11 + $0x6a0] ss:$24 sps:$4 sm:$0xff]  }
 0x45d   :  { %6565 = vmatpush1.bf16.msra.mxu0 %v8920_v60  ;;  %v9006_v60 = vld [vmem:[#allocation11 + $0x6d4] ss:$24 sps:$4 sm:$0xff]  }
 0x45e   :  { %6566 = vmatprep.subr.bf16.mxu0 %v8925_v44  ;;  %v9004_v44 = vld [vmem:[#allocation11 + $0x6d0] ss:$24 sps:$4 sm:$0xff]  }
 0x461   :  { %6567 = vmatpush1.bf16.msra.mxu0 %v8923_v61  ;;  %v9009_v61 = vld [vmem:[#allocation11 + $0x704] ss:$24 sps:$4 sm:$0xff]  }
 0x462   :  { %6568 = vmatprep.subr.bf16.mxu0 %v8928_v62  ;;  %v9012_v62 = vld [vmem:[#allocation11 + $0x734] ss:$24 sps:$4 sm:$0xff]  }
 0x465   :  { %6569 = vmatpush1.bf16.msra.mxu0 %v8926_v0  ;;  %v9015_v0 = vld [vmem:[#allocation11 + $0x764] ss:$24 sps:$4 sm:$0xff]  }
 0x466   :  { %6570 = vmatprep.subr.bf16.mxu0 %v8931_v1  ;;  %v9013_v1 = vld [vmem:[#allocation11 + $0x760] ss:$24 sps:$4 sm:$0xff]  }
 0x469   :  { %6571 = vmatpush1.bf16.msra.mxu0 %v8929_v2  ;;  %v9018_v2 = vld [vmem:[#allocation11 + $0x794] ss:$24 sps:$4 sm:$0xff]  }
 0x46a   :  { %6572 = vmatprep.subr.bf16.mxu0 %v8934_v5  ;;  %v9016_v5 = vld [vmem:[#allocation11 + $0x790] ss:$24 sps:$4 sm:$0xff]  }
 0x46d   :  { %6573 = vmatpush1.bf16.msra.mxu0 %v8932_v6  ;;  %v9021_v6 = vld [vmem:[#allocation11 + $0x7c4] ss:$24 sps:$4 sm:$0xff]  }
 0x46e   :  { %6574 = vmatprep.subr.bf16.mxu0 %v8937_v8  ;;  %v9019_v8 = vld [vmem:[#allocation11 + $0x7c0] ss:$24 sps:$4 sm:$0xff]  }
 0x471   :  { %6575 = vmatpush1.bf16.msra.mxu0 %v8935_v9  ;;  %v9024_v9 = vld [vmem:[#allocation11 + $0x7f4] ss:$24 sps:$4 sm:$0xff]  }
 0x472   :  { %6576 = vmatprep.subr.bf16.mxu0 %v8940_v10  ;;  %v9022_v10 = vld [vmem:[#allocation11 + $0x7f0] ss:$24 sps:$4 sm:$0xff]  }
 0x475   :  { %6577 = vmatpush1.bf16.msra.mxu0 %v8938_v12  ;;  %v9027_v12 = vld [vmem:[#allocation11 + $0x824] ss:$24 sps:$4 sm:$0xff]  }
 0x476   :  { %6578 = vmatprep.subr.bf16.mxu0 %v8943_v13  ;;  %v9025_v13 = vld [vmem:[#allocation11 + $0x820] ss:$24 sps:$4 sm:$0xff]  }
 0x479   :  { %6579 = vmatpush1.bf16.msra.mxu0 %v8941_v14  ;;  %v9030_v14 = vld [vmem:[#allocation11 + $0x854] ss:$24 sps:$4 sm:$0xff]  }
 0x47a   :  { %6591 = vmatprep.subr.bf16.mxu0 %v8946_v15  ;;  %v9028_v15 = vld [vmem:[#allocation11 + $0x850] ss:$24 sps:$4 sm:$0xff]  }
 0x47c   :  { %6581 = vmatmul.mubr.bf16.vlgmr.msra.gmra.mrb[16].mxu0 %v9505_v29  ;;  %v8959_v29 = vld [vmem:[#allocation11 + $0x400] ss:$24 sps:$4 sm:$0xff]  }
 0x47d   :  { %6592 = vmatpush1.bf16.msra.mxu0 %v8944_v16  ;;  %6623 = vmatprep.mubr.bf16.mxu0 %v9511_v38  ;;  %v8962_v38 = vld [vmem:[#allocation11 + $0x430] ss:$24 sps:$4 sm:$0xff]   ;;  %v9033_v16 = vld [vmem:[#allocation11 + $0x884] ss:$24 sps:$4 sm:$0xff]  }
 0x47e   :  { %6593 = vmatprep.subr.bf16.mxu0 %v8949_v18  ;;  %v9031_v18 = vld [vmem:[#allocation11 + $0x880] ss:$24 sps:$4 sm:$0xff]  }
 0x481   :  { %6594 = vmatpush1.bf16.msra.mxu0 %v8947_v51  ;;  %v9036_v51 = vld [vmem:[#allocation11 + $0x8b4] ss:$24 sps:$4 sm:$0xff]  }
 0x482   :  { %6595 = vmatprep.subr.bf16.mxu0 %v8952_v19  ;;  %v9034_v19 = vld [vmem:[#allocation11 + $0x8b0] ss:$24 sps:$4 sm:$0xff]  }
 0x485   :  { %6596 = vmatpush1.bf16.msra.mxu0 %v8950_v20  ;;  %v9039_v20 = vld [vmem:[#allocation11 + $0x8e4] ss:$24 sps:$4 sm:$0xff]  }
 0x486   :  { %6597 = vmatprep.subr.bf16.mxu0 %v8955_v21  ;;  %v9037_v21 = vld [vmem:[#allocation11 + $0x8e0] ss:$24 sps:$4 sm:$0xff]  }
 0x489   :  { %6598 = vmatpush1.bf16.msra.mxu0 %v8953_v22  ;;  %v4818_v22 = vld [vmem:[#allocation13] sm:$0x3f] }
 0x48a   :  { %6599 = vmatprep.subr.bf16.mxu0 %v8958_v23  ;;  %v4823_v23 = vrot.slane %v4818_v22, %v9432_v30 }
 0x48d   :  { %6600 = vmatpush1.bf16.msra.mxu0 %v8956_v24  ;;  %v4831_v24 = vrot.slane %v4818_v22, %v9454_v4 }
 0x48e   :  { %6601 = vmatprep.subr.bf16.mxu0 %v8961_v25  ;;  %v4827_v25 = vrot.slane %v4818_v22, %v9435_v31 }
 0x491   :  { %6602 = vmatpush1.bf16.msra.mxu0 %v8959_v29  ;;  %v4835_v29 = vrot.slane %v4818_v22, %v9457_v27 }
 0x492   :  { %6603 = vmatprep.subr.bf16.mxu0 %v8964_v26 }
 0x495   :  { %6604 = vmatpush1.bf16.msra.mxu0 %v8962_v38 }
 0x496   :  { %6605 = vmatprep.subr.bf16.mxu0 %v8967_v7 }
 0x499   :  { %6606 = vmatpush1.bf16.msra.mxu0 %v8965_v63 }
 0x49a   :  { %6607 = vmatprep.subr.bf16.mxu0 %v8970_v28 }
 0x49d   :  { %6608 = vmatpush1.bf16.msra.mxu0 %v8968_v11 }
 0x49e   :  { %6609 = vmatprep.subr.bf16.mxu0 %v8973_v53 }
 0x4a1   :  { %6610 = vmatpush1.bf16.msra.mxu0 %v8971_v49 }
 0x4a2   :  { %6611 = vmatprep.subr.bf16.mxu0 %v8976_v3 }
 0x4a5   :  { %6612 = vmatpush1.bf16.msra.mxu0 %v8974_v33 }
 0x4a6   :  { %6613 = vmatprep.subr.bf16.mxu0 %v8979_v56 }
 0x4a9   :  { %6614 = vmatpush1.bf16.msra.mxu0 %v8977_v37 }
 0x4aa   :  { %6615 = vmatprep.subr.bf16.mxu0 %v8982_v43 }
 0x4ad   :  { %6616 = vmatpush1.bf16.msra.mxu0 %v8980_v45 }
 0x4ae   :  { %6617 = vmatprep.subr.bf16.mxu0 %v8985_v47 }
 0x4b1   :  { %6618 = vmatpush1.bf16.msra.mxu0 %v8983_v48 }
 0x4b2   :  { %6619 = vmatprep.subr.bf16.mxu0 %v8988_v52 }
 0x4b5   :  { %6620 = vmatpush1.bf16.msra.mxu0 %v8986_v54 }
 0x4b6   :  { %6621 = vmatprep.subr.bf16.mxu0 %v8991_v55 }
 0x4b9   :  { %6622 = vmatpush1.bf16.msra.mxu0 %v8989_v57 }
 0x4ba   :  { %6634 = vmatprep.subr.bf16.mxu0 %v8994_v17 }
 0x4bc   :  { %6624 = vmatmul.mubr.bf16.vlgmr.msra.gmra.mrb[16].mxu0 %v9507_v32  ;;  %v9007_v32 = vld [vmem:[#allocation11 + $0x700] ss:$24 sps:$4 sm:$0xff]  }
 0x4bd   :  { %6635 = vmatpush1.bf16.msra.mxu0 %v8992_v39  ;;  %6666 = vmatprep.mubr.bf16.mxu0 %v9527_v42  ;;  %v9010_v42 = vld [vmem:[#allocation11 + $0x730] ss:$24 sps:$4 sm:$0xff]  }
 0x4be   :  { %6636 = vmatprep.subr.bf16.mxu0 %v8997_v58 }
 0x4c1   :  { %6637 = vmatpush1.bf16.msra.mxu0 %v8995_v59 }
 0x4c2   :  { %6638 = vmatprep.subr.bf16.mxu0 %v9000_v36 }
 0x4c5   :  { %6639 = vmatpush1.bf16.msra.mxu0 %v8998_v40 }
 0x4c6   :  { %6640 = vmatprep.subr.bf16.mxu0 %v9003_v41 }
 0x4c9   :  { %6641 = vmatpush1.bf16.msra.mxu0 %v9001_v50  ;;  %v4839_v50 = vrot.slane %v4818_v22, %v9472_v46 }
 0x4ca   :  { %6642 = vmatprep.subr.bf16.mxu0 %v9006_v60  ;;  %v4843_v60 = vrot.slane %v4818_v22, %v9475_v34 }
 0x4cd   :  { %6643 = vmatpush1.bf16.msra.mxu0 %v9004_v44 }
 0x4ce   :  { %6644 = vmatprep.subr.bf16.mxu0 %v9009_v61 }
 0x4d1   :  { %6645 = vmatpush1.bf16.msra.mxu0 %v9007_v32 }
 0x4d2   :  { %6646 = vmatprep.subr.bf16.mxu0 %v9012_v62 }
 0x4d5   :  { %6647 = vmatpush1.bf16.msra.mxu0 %v9010_v42 }
 0x4d6   :  { %6648 = vmatprep.subr.bf16.mxu0 %v9015_v0 }
 0x4d9   :  { %6649 = vmatpush1.bf16.msra.mxu0 %v9013_v1 }
 0x4da   :  { %6650 = vmatprep.subr.bf16.mxu0 %v9018_v2 }
 0x4dd   :  { %6651 = vmatpush1.bf16.msra.mxu0 %v9016_v5 }
 0x4de   :  { %6652 = vmatprep.subr.bf16.mxu0 %v9021_v6 }
 0x4e1   :  { %6653 = vmatpush1.bf16.msra.mxu0 %v9019_v8 }
 0x4e2   :  { %6654 = vmatprep.subr.bf16.mxu0 %v9024_v9 }
 0x4e5   :  { %6655 = vmatpush1.bf16.msra.mxu0 %v9022_v10 }
 0x4e6   :  { %6656 = vmatprep.subr.bf16.mxu0 %v9027_v12 }
 0x4e9   :  { %6657 = vmatpush1.bf16.msra.mxu0 %v9025_v13 }
 0x4ea   :  { %6658 = vmatprep.subr.bf16.mxu0 %v9030_v14 }
 0x4ed   :  { %6659 = vmatpush1.bf16.msra.mxu0 %v9028_v15 }
 0x4ee   :  { %6660 = vmatprep.subr.bf16.mxu0 %v9033_v16 }
 0x4f1   :  { %6661 = vmatpush1.bf16.msra.mxu0 %v9031_v18 }
 0x4f2   :  { %6662 = vmatprep.subr.bf16.mxu0 %v9036_v51 }
 0x4f5   :  { %6663 = vmatpush1.bf16.msra.mxu0 %v9034_v19 }
 0x4f6   :  { %6664 = vmatprep.subr.bf16.mxu0 %v9039_v20 }
 0x4f9   :  { %6665 = vmatpush1.bf16.msra.mxu0 %v9037_v21 }
 0x4fc   :  { %6667 = vmatmul.mubr.bf16.vlgmr.msra.gmra.mrb[16].mxu0 %v9525_v35 }
 0x50f   :  { %v6410_v26 = vpop.f32.mrb[12].mxu0  ;;  %v6539_v38 = vpop.f32.mrb[16].mxu1 }
 0x510   :  { %v7643_v7 = vadd.f32 %v6410_v26, %v4823_v23  ;;  %v7647_v63 = vadd.f32 %v6539_v38, %v4831_v24  ;;  %v6412_v28 = vpop.f32.mrb[13].mxu0  ;;  %v6541_v11 = vpop.f32.mrb[17].mxu1 }
 0x511   :  { %v7644_v53 = vadd.f32 %v6412_v28, %v4827_v25  ;;  %v7648_v49 = vadd.f32 %v6541_v11, %v4835_v29  ;;  %v6414_v3 = vpop.f32.mrb[14].mxu0  ;;  %v6543_v33 = vpop.f32.mrb[18].mxu1 }
 0x512   :  { %vm6677_vm8 = vcmp.ge.f32.partialorder %v7643_v7, 0.0  ;;  %v6689_v35 = vmul.f32 0.01, %v7643_v7  ;;  %vm6679_vm9 = vcmp.ge.f32.partialorder %v7647_v63, 0.0  ;;  %v6691_v30 = vmul.f32 0.01, %v7647_v63 }
 0x513   :  { %vm6678_vm10 = vcmp.ge.f32.partialorder %v7644_v53, 0.0  ;;  %v6690_v4 = vmul.f32 0.01, %v7644_v53  ;;  %vm6680_vm11 = vcmp.ge.f32.partialorder %v7648_v49, 0.0  ;;  %v6692_v31 = vmul.f32 0.01, %v7648_v49 }
 0x514   :  { %v6701_v56 = vsel %vm6677_vm8, %v7643_v7, %v6689_v35  ;;  %v6703_v27 = vsel %vm6679_vm9, %v7647_v63, %v6691_v30  ;;  %v7645_v37 = vadd.f32 %v6414_v3, %v4823_v23  ;;  %v7649_v43 = vadd.f32 %v6543_v33, %v4831_v24  ;;  %v6416_v45 = vpop.f32.mrb[15].mxu0  ;;  %v6545_v47 = vpop.f32.mrb[19].mxu1 }
 0x515   :  { %6713 = vst [vmem:[#allocation14] sm:$0xff] %v6701_v56  ;;  %6715 = vst [vmem:[#allocation14 + $0x10] sm:$0xff] %v6703_v27  ;;  %v6702_v48 = vsel %vm6678_vm10, %v7644_v53, %v6690_v4  ;;  %v6704_v52 = vsel %vm6680_vm11, %v7648_v49, %v6692_v31  ;;  %v7646_v54 = vadd.f32 %v6416_v45, %v4827_v25 }
 0x516   :  { %v7650_v55 = vadd.f32 %v6545_v47, %v4835_v29  ;;  %6714 = vst [vmem:[#allocation14 + $0x8] sm:$0xff] %v6702_v48  ;;  %6716 = vst [vmem:[#allocation14 + $0x18] sm:$0xff] %v6704_v52  ;;  %vm6683_vm12 = vcmp.ge.f32.partialorder %v7645_v37, 0.0  ;;  %v6695_v57 = vmul.f32 0.01, %v7645_v37  ;;  %vm6685_vm13 = vcmp.ge.f32.partialorder %v7649_v43, 0.0 }
 0x517   :  { %v6697_v17 = vmul.f32 0.01, %v7649_v43  ;;  %vm6684_vm14 = vcmp.ge.f32.partialorder %v7646_v54, 0.0  ;;  %v6696_v39 = vmul.f32 0.01, %v7646_v54 }
 0x518   :  { %vm6686_vm15 = vcmp.ge.f32.partialorder %v7650_v55, 0.0  ;;  %v6698_v58 = vmul.f32 0.01, %v7650_v55  ;;  %v6707_v59 = vsel %vm6683_vm12, %v7645_v37, %v6695_v57 }
 0x519   :  { %v6709_v36 = vsel %vm6685_vm13, %v7649_v43, %v6697_v17  ;;  %6719 = vst [vmem:[#allocation14 + $0x30] sm:$0xff] %v6707_v59  ;;  %v6708_v40 = vsel %vm6684_vm14, %v7646_v54, %v6696_v39 }
 0x51a   :  { %6721 = vst [vmem:[#allocation14 + $0x40] sm:$0xff] %v6709_v36  ;;  %v6710_v41 = vsel %vm6686_vm15, %v7650_v55, %v6698_v58  ;;  %6720 = vst [vmem:[#allocation14 + $0x38] sm:$0xff] %v6708_v40 }
 0x51b   :  { %6722 = vst [vmem:[#allocation14 + $0x48] sm:$0xff] %v6710_v41 }
 0x5cf   :  { %v6668_v44 = vpop.f32.mrb[16].mxu0 }
 0x5d0   :  { %v7651_v61 = vadd.f32 %v6668_v44, %v4839_v50  ;;  %v6670_v32 = vpop.f32.mrb[17].mxu0 }
 0x5d1   :  { %v7652_v62 = vadd.f32 %v6670_v32, %v4843_v60  ;;  %v6672_v42 = vpop.f32.mrb[18].mxu0 }
 0x5d2   :  { %vm6681_vm0 = vcmp.ge.f32.partialorder %v7651_v61, 0.0  ;;  %v6693_v0 = vmul.f32 0.01, %v7651_v61  ;;  %v7653_v1 = vadd.f32 %v6672_v42, %v4839_v50  ;;  %v6674_v2 = vpop.f32.mrb[19].mxu0 }
 0x5d3   :  { %vm6682_vm1 = vcmp.ge.f32.partialorder %v7652_v62, 0.0  ;;  %v6694_v5 = vmul.f32 0.01, %v7652_v62  ;;  %v7654_v6 = vadd.f32 %v6674_v2, %v4843_v60 }
 0x5d4   :  { %v6705_v8 = vsel %vm6681_vm0, %v7651_v61, %v6693_v0  ;;  %vm6687_vm2 = vcmp.ge.f32.partialorder %v7653_v1, 0.0  ;;  %v6699_v9 = vmul.f32 0.01, %v7653_v1 }
 0x5d5   :  { %6717 = vst [vmem:[#allocation14 + $0x20] sm:$0xff] %v6705_v8  ;;  %v6706_v46 = vsel %vm6682_vm1, %v7652_v62, %v6694_v5  ;;  %vm6688_vm3 = vcmp.ge.f32.partialorder %v7654_v6, 0.0  ;;  %v6700_v34 = vmul.f32 0.01, %v7654_v6 }
 0x5d6   :  { %6718 = vst [vmem:[#allocation14 + $0x28] sm:$0xff] %v6706_v46  ;;  %v6711_v10 = vsel %vm6687_vm2, %v7653_v1, %v6699_v9 }
 0x5d7   :  { %6723 = vst [vmem:[#allocation14 + $0x50] sm:$0xff] %v6711_v10  ;;  %v6712_v12 = vsel %vm6688_vm3, %v7654_v6, %v6700_v34 }
 0x5d8   :  { %6724 = vst [vmem:[#allocation14 + $0x58] sm:$0xff] %v6712_v12 }
 0x5d9   :  { %9210 = shalt.err (!%p9207_p4)
}
 0x5da   :  { %s9211_s0 = scalar_lea.hbm %s9564_s7, 1536 }
 0x5db   :  { %p9212_p5 = scmp.ne.s32.totalorder %s9564_s7, %s9211_s0  ;;  %p9215_p6 = scmp.lt.u32.totalorder %s9211_s0, %s9564_s7 }
 0x5dd   :  { %p9217_p7 = pnand %p9215_p6, %p9212_p5 }
 0x5df   :  { %9220 = shalt.err (!%p9217_p7)
}
 0x5e0   :  { %s9241_s17 = smov 768   ;;  %s9242_s18 = smov 48  }
 0x5e1   :  { %6736 = dma.vmem_to_hbm [thread:$0]  %s6731_s12, 1536, %s9564_s7, [#allocation4], %s9241_s17, %s9241_s17, %s9242_s18  }
 0x5e2   :  { %9229 = dma.done.wait [#allocation4], 1536  }
 0x5e3   :  { %9230 = vsyncadd [#allocation4], 4294965760 }
 0x5e4   :  { %6740 = vsyncpa [#allocation3], 1 }
 0x5e5   :  { %6741 = vsyncpa [#allocation6], 1 }
 0x5e6   :  { %6742 = vsyncpa [#allocation9], 1 }
 0x5e7   :  { %6743 = vsyncpa [#allocation12], 1 }
 0x5e8   :  { %6744 = vsyncpa [#allocation4], 1 }

</bundles_post_ra>
